<compile_context>
chip_gen: v6e
topology: v6e:2x2x1
jax: 0.10.0
libtpu: 0.0.40
codegen_flags: <defaults>
</compile_context>

<pallas_src>
import functools

import jax
import jax.numpy as jnp
import numpy as np
from jax.experimental import pallas as pl
from jax.experimental.pallas import tpu as pltpu


def _shifted(a, s, axis):
    """b[..., i, ...] = a[..., i + s, ...] along `axis`; zero-filled outside [0, L)."""
    if s == 0:
        return a
    L = a.shape[axis]
    zshape = list(a.shape)
    zshape[axis] = abs(s)
    zeros = jnp.zeros(tuple(zshape), a.dtype)
    idx = [slice(None)] * a.ndim
    if s > 0:
        idx[axis] = slice(s, L)
        return jnp.concatenate([a[tuple(idx)], zeros], axis=axis)
    idx[axis] = slice(0, L + s)
    return jnp.concatenate([zeros, a[tuple(idx)]], axis=axis)


def _asym_conv(y2d, w_ref, bias, *, H, W, C, axis, k, dil):
    """1-D k-tap conv along `axis` (0 = H, 1 = W) with full channel mixing.

    matmul-first: a single MXU matmul  [H*W, C] @ [C, k*C]  produces the
    channel-mixed partial product of every tap (weight columns are tap-major:
    col = t*C + c_out, concatenated offline).  The k partials are then
    shift-added along the conv axis with zero-padded borders; bias added once.
    Returns (H*W, C) float32.
    """
    p = ((k - 1) // 2) * dil
    a = jnp.dot(y2d, w_ref[...], preferred_element_type=jnp.float32)   # (H*W, k*C)
    a3 = a.reshape(H, W, k * C)
    out = None
    for t in range(k):
        part = _shifted(a3[:, :, t * C:(t + 1) * C], t * dil - p, axis)
        out = part if out is None else out + part
    return (out + bias).reshape(H * W, C)


def fcu_kernel(x_ref,
               w1v_ref, b1v_ref, w1h_ref, s1_ref,
               w2v_ref, b2v_ref, w2h_ref, s2_ref,
               o_ref, *, k, dilation):
    _, H, W, C = x_ref.shape
    conv = functools.partial(_asym_conv, H=H, W=W, C=C, k=k)

    x = x_ref[0].astype(jnp.float32).reshape(H * W, C)

    # ---- conv1: (k,1) + bias + ReLU, then (1,k) + (bias+BN folded) + ReLU ----
    y = jnp.maximum(conv(x, w1v_ref, b1v_ref[...], axis=0, dil=1), 0.0)
    y = jnp.maximum(conv(y, w1h_ref, s1_ref[...], axis=1, dil=1), 0.0)

    # ---- conv2 (dilated): (k,1) + bias + ReLU, then (1,k) + (bias+BN), no act ----
    y = jnp.maximum(conv(y, w2v_ref, b2v_ref[...], axis=0, dil=dilation), 0.0)
    y = conv(y, w2h_ref, s2_ref[...], axis=1, dil=dilation)

    # TODO(synk): nn.Dropout is identity at inference; training-mode RNG mask not implemented.
    # Residual + final ReLU; x re-read here so it is not held live across the 4 convs.
    out = jnp.maximum(y + x_ref[0].astype(jnp.float32).reshape(H * W, C), 0.0)
    o_ref[0] = out.reshape(H, W, C).astype(o_ref.dtype)


def fcu_pallas(x_nhwc, params, *, k, dilation):
    """params = (w1v, b1v, w1h, b1h, bn1s, bn1t, w2v, b2v, w2h, b2h, bn2s, bn2t),
    conv weights shaped (k, C_in, C_out); biases / BN affine terms shaped (1, C)."""
    (w1v, b1v, w1h, b1h, bn1s, bn1t, w2v, b2v, w2h, b2h, bn2s, bn2t) = params
    N, H, W, C = x_nhwc.shape
    f32 = jnp.float32

    # ---- offline weight prep (tiny arrays, done once in the wrapper) ----
    def cat_taps(w):  # (k, C_in, C_out) -> (C_in, k*C_out) with tap-major columns
        return jnp.transpose(w.astype(f32), (1, 0, 2)).reshape(C, k * C)

    # (k,1) conv weights + their biases (no BN on the lw branch).
    w1v_f, b1 = cat_taps(w1v), b1v.astype(f32)
    w2v_f, b2 = cat_taps(w2v), b2v.astype(f32)
    # (1,k) conv weights: fold eval-mode BN scale into the output columns and the
    # conv bias into the BN shift, so the kernel does a single add, no BN pass.
    w1h_f = cat_taps(w1h.astype(f32) * bn1s.astype(f32).reshape(1, 1, C))
    s1 = b1h.astype(f32) * bn1s.astype(f32) + bn1t.astype(f32)
    w2h_f = cat_taps(w2h.astype(f32) * bn2s.astype(f32).reshape(1, 1, C))
    s2 = b2h.astype(f32) * bn2s.astype(f32) + bn2t.astype(f32)

    x_spec = pl.BlockSpec((1, H, W, C), lambda n: (n, 0, 0, 0))
    w_spec = pl.BlockSpec((C, k * C), lambda n: (0, 0))   # constant block -> DMA'd once
    b_spec = pl.BlockSpec((1, C), lambda n: (0, 0))

    itemsize = jnp.dtype(x_nhwc.dtype).itemsize
    param_bytes = 4 * (C * k * C + C) * 4
    cost = pl.CostEstimate(
        flops=8 * N * H * W * k * C * C + 8 * N * H * W * C,
        transcendentals=0,
        bytes_accessed=2 * N * H * W * C * itemsize + param_bytes)

    kern = functools.partial(fcu_kernel, k=k, dilation=dilation)
    return pl.pallas_call(
        kern,
        out_shape=jax.ShapeDtypeStruct(x_nhwc.shape, x_nhwc.dtype),
        grid=(N,),
        in_specs=[x_spec,
                  w_spec, b_spec, w_spec, b_spec,
                  w_spec, b_spec, w_spec, b_spec],
        out_specs=x_spec,
        compiler_params=pltpu.CompilerParams(
            dimension_semantics=("parallel",),
            vmem_limit_bytes=32 * 1024 * 1024),
        cost_estimate=cost,
    )(x_nhwc, w1v_f, b1, w1h_f, s1, w2v_f, b2, w2h_f, s2)


# ---------------- pure-JAX reference (uses RAW, unfolded params) ----------------
def _conv_ref(x, w, b, *, axis, dil, pad):
    if axis == 1:                       # (k, 1) kernel, vertical (along H)
        rhs = w[:, None, :, :]          # HWIO
        padding = ((pad, pad), (0, 0))
        rhs_dil = (dil, 1)
    else:                               # (1, k) kernel, horizontal (along W)
        rhs = w[None, :, :, :]
        padding = ((0, 0), (pad, pad))
        rhs_dil = (1, dil)
    y = jax.lax.conv_general_dilated(
        x, rhs, window_strides=(1, 1), padding=padding, rhs_dilation=rhs_dil,
        dimension_numbers=('NHWC', 'HWIO', 'NHWC'))
    return y + b.reshape(1, 1, 1, -1)


def fcu_ref(x, params, *, k, dilation):
    (w1v, b1v, w1h, b1h, s1, t1, w2v, b2v, w2h, b2h, s2, t2) = params
    p1 = (k - 1) // 2
    p2 = p1 * dilation
    y = jax.nn.relu(_conv_ref(x, w1v, b1v[0], axis=1, dil=1, pad=p1))
    y = jax.nn.relu(_conv_ref(y, w1h, b1h[0], axis=2, dil=1, pad=p1)
                    * s1.reshape(1, 1, 1, -1) + t1.reshape(1, 1, 1, -1))
    y = jax.nn.relu(_conv_ref(y, w2v, b2v[0], axis=1, dil=dilation, pad=p2))
    y = (_conv_ref(y, w2h, b2h[0], axis=2, dil=dilation, pad=p2)
         * s2.reshape(1, 1, 1, -1) + t2.reshape(1, 1, 1, -1))
    return jax.nn.relu(y + x)


if __name__ == "__main__":
    key = jax.random.PRNGKey(0)
    N, C, H, W = 2, 64, 16, 16       # PyTorch NCHW input shape: (2, 64, 16, 16)
    k, dilation = 3, 2               # kernel_size=3, dilation=2
    bn_eps = 1e-5

    keys = jax.random.split(key, 11)

    def wgen(kk):  # (tap, c_in, c_out) == transpose of torch's (c_out, c_in, k, 1)
        return 0.07 * jax.random.normal(kk, (k, C, C), jnp.float32)

    def bgen(kk):
        return 0.05 * jax.random.normal(kk, (1, C), jnp.float32)

    w1v, w1h, w2v, w2h = (wgen(keys[i]) for i in range(4))
    b1v, b1h, b2v, b2h = (bgen(keys[i]) for i in range(4, 8))

    def bn_affine(kk):  # fold eval-mode BatchNorm (gamma,beta,mean,var) into scale/shift
        kg, kb, km, kv = jax.random.split(kk, 4)
        gamma = 1.0 + 0.1 * jax.random.normal(kg, (C,), jnp.float32)
        beta = 0.1 * jax.random.normal(kb, (C,), jnp.float32)
        mean = 0.1 * jax.random.normal(km, (C,), jnp.float32)
        var = 1.0 + 0.1 * jax.nn.softplus(jax.random.normal(kv, (C,), jnp.float32))
        scale = gamma / jnp.sqrt(var + bn_eps)
        shift = beta - mean * scale
        return scale.reshape(1, C), shift.reshape(1, C)

    bn1s, bn1t = bn_affine(keys[8])
    bn2s, bn2t = bn_affine(keys[9])

    x_nchw = jax.random.normal(keys[10], (N, C, H, W), jnp.float32)
    x_nhwc = jnp.transpose(x_nchw, (0, 2, 3, 1))     # glue: NCHW -> NHWC

    params = (w1v, b1v, w1h, b1h, bn1s, bn1t,
              w2v, b2v, w2h, b2h, bn2s, bn2t)

    out = fcu_pallas(x_nhwc, params, k=k, dilation=dilation)
    out = jax.block_until_ready(out)

    ref = fcu_ref(x_nhwc, params, k=k, dilation=dilation)
    np.testing.assert_allclose(np.asarray(out), np.asarray(ref), rtol=2e-4, atol=2e-4)

    print("KERNEL_OK")
</pallas_src>

<mosaic_0001>
module attributes {stable_mosaic.version = 11 : i64} {
  func.func @fcu_kernel(%arg0: i32, %arg1: memref<1x16x16x64xf32, #tpu.memory_space<vmem>>, %arg2: memref<64x192xf32, #tpu.memory_space<vmem>>, %arg3: memref<1x64xf32, #tpu.memory_space<vmem>>, %arg4: memref<64x192xf32, #tpu.memory_space<vmem>>, %arg5: memref<1x64xf32, #tpu.memory_space<vmem>>, %arg6: memref<64x192xf32, #tpu.memory_space<vmem>>, %arg7: memref<1x64xf32, #tpu.memory_space<vmem>>, %arg8: memref<64x192xf32, #tpu.memory_space<vmem>>, %arg9: memref<1x64xf32, #tpu.memory_space<vmem>>, %arg10: memref<1x16x16x64xf32, #tpu.memory_space<vmem>>) attributes {dimension_semantics = [#tpu.dimension_semantics<parallel>], iteration_bounds = array<i64: 2>, scalar_prefetch = 0 : i64, scratch_operands = 0 : i64, tpu.core_type = #tpu.core_type<tc>, window_params = [{transform_indices = @transform_0, window_bounds = array<i64: 1, 16, 16, 64>}, {pipeline_mode = #tpu.pipeline_mode<synchronous>, transform_indices = @transform_1, window_bounds = array<i64: 64, 192>}, {pipeline_mode = #tpu.pipeline_mode<synchronous>, transform_indices = @transform_2, window_bounds = array<i64: 1, 64>}, {pipeline_mode = #tpu.pipeline_mode<synchronous>, transform_indices = @transform_3, window_bounds = array<i64: 64, 192>}, {pipeline_mode = #tpu.pipeline_mode<synchronous>, transform_indices = @transform_4, window_bounds = array<i64: 1, 64>}, {pipeline_mode = #tpu.pipeline_mode<synchronous>, transform_indices = @transform_5, window_bounds = array<i64: 64, 192>}, {pipeline_mode = #tpu.pipeline_mode<synchronous>, transform_indices = @transform_6, window_bounds = array<i64: 1, 64>}, {pipeline_mode = #tpu.pipeline_mode<synchronous>, transform_indices = @transform_7, window_bounds = array<i64: 64, 192>}, {pipeline_mode = #tpu.pipeline_mode<synchronous>, transform_indices = @transform_8, window_bounds = array<i64: 1, 64>}, {transform_indices = @transform_9, window_bounds = array<i64: 1, 16, 16, 64>}]} {
    %c0 = arith.constant 0 : index
    %c0_0 = arith.constant 0 : index
    %c0_1 = arith.constant 0 : index
    %c0_2 = arith.constant 0 : index
    %0 = vector.load %arg1[%c0, %c0_0, %c0_1, %c0_2] : memref<1x16x16x64xf32, #tpu.memory_space<vmem>>, vector<1x16x16x64xf32>
    %1 = vector.shape_cast %0 : vector<1x16x16x64xf32> to vector<16x16x64xf32>
    %2 = vector.shape_cast %1 : vector<16x16x64xf32> to vector<256x64xf32>
    %c0_3 = arith.constant 0 : index
    %c0_4 = arith.constant 0 : index
    %3 = vector.load %arg3[%c0_3, %c0_4] : memref<1x64xf32, #tpu.memory_space<vmem>>, vector<1x64xf32>
    %c0_5 = arith.constant 0 : index
    %c0_6 = arith.constant 0 : index
    %4 = vector.load %arg2[%c0_5, %c0_6] : memref<64x192xf32, #tpu.memory_space<vmem>>, vector<64x192xf32>
    %cst = arith.constant dense<0.000000e+00> : vector<256x192xf32>
    %5 = tpu.matmul %2, %4, %cst {dimension_numbers = #tpu.dot_dimension_numbers<[1], [0], [0], [1], [0, 0, 1, 1], [], []>} : vector<256x64xf32>, vector<64x192xf32>, vector<256x192xf32> -> vector<256x192xf32>
    %6 = vector.shape_cast %5 : vector<256x192xf32> to vector<16x16x192xf32>
    %7 = vector.extract_strided_slice %6 {offsets = [0, 0, 0], sizes = [16, 16, 64], strides = [1, 1, 1]} : vector<16x16x192xf32> to vector<16x16x64xf32>
    %cst_7 = arith.constant 0.000000e+00 : f32
    %8 = vector.broadcast %cst_7 : f32 to vector<1x16x64xf32>
    %9 = vector.extract_strided_slice %7 {offsets = [0, 0, 0], sizes = [15, 16, 64], strides = [1, 1, 1]} : vector<16x16x64xf32> to vector<15x16x64xf32>
    %10 = tpu.concatenate %8, %9 in 0 : vector<1x16x64xf32>, vector<15x16x64xf32> -> vector<16x16x64xf32>
    %11 = vector.extract_strided_slice %6 {offsets = [0, 0, 64], sizes = [16, 16, 64], strides = [1, 1, 1]} : vector<16x16x192xf32> to vector<16x16x64xf32>
    %12 = arith.addf %10, %11 : vector<16x16x64xf32>
    %13 = vector.extract_strided_slice %6 {offsets = [0, 0, 128], sizes = [16, 16, 64], strides = [1, 1, 1]} : vector<16x16x192xf32> to vector<16x16x64xf32>
    %cst_8 = arith.constant 0.000000e+00 : f32
    %14 = vector.broadcast %cst_8 : f32 to vector<1x16x64xf32>
    %15 = vector.extract_strided_slice %13 {offsets = [1, 0, 0], sizes = [15, 16, 64], strides = [1, 1, 1]} : vector<16x16x64xf32> to vector<15x16x64xf32>
    %16 = tpu.concatenate %15, %14 in 0 : vector<15x16x64xf32>, vector<1x16x64xf32> -> vector<16x16x64xf32>
    %17 = arith.addf %12, %16 : vector<16x16x64xf32>
    %18 = vector.shape_cast %3 : vector<1x64xf32> to vector<1x1x64xf32>
    %19 = vector.broadcast %18 : vector<1x1x64xf32> to vector<16x16x64xf32>
    %20 = arith.addf %17, %19 : vector<16x16x64xf32>
    %21 = vector.shape_cast %20 : vector<16x16x64xf32> to vector<256x64xf32>
    %cst_9 = arith.constant 0.000000e+00 : f32
    %22 = vector.broadcast %cst_9 : f32 to vector<256x64xf32>
    %23 = arith.maximumf %21, %22 : vector<256x64xf32>
    %c0_10 = arith.constant 0 : index
    %c0_11 = arith.constant 0 : index
    %24 = vector.load %arg5[%c0_10, %c0_11] : memref<1x64xf32, #tpu.memory_space<vmem>>, vector<1x64xf32>
    %c0_12 = arith.constant 0 : index
    %c0_13 = arith.constant 0 : index
    %25 = vector.load %arg4[%c0_12, %c0_13] : memref<64x192xf32, #tpu.memory_space<vmem>>, vector<64x192xf32>
    %cst_14 = arith.constant dense<0.000000e+00> : vector<256x192xf32>
    %26 = tpu.matmul %23, %25, %cst_14 {dimension_numbers = #tpu.dot_dimension_numbers<[1], [0], [0], [1], [0, 0, 1, 1], [], []>} : vector<256x64xf32>, vector<64x192xf32>, vector<256x192xf32> -> vector<256x192xf32>
    %27 = vector.shape_cast %26 : vector<256x192xf32> to vector<16x16x192xf32>
    %28 = vector.extract_strided_slice %27 {offsets = [0, 0, 0], sizes = [16, 16, 64], strides = [1, 1, 1]} : vector<16x16x192xf32> to vector<16x16x64xf32>
    %cst_15 = arith.constant 0.000000e+00 : f32
    %29 = vector.broadcast %cst_15 : f32 to vector<16x1x64xf32>
    %30 = vector.extract_strided_slice %28 {offsets = [0, 0, 0], sizes = [16, 15, 64], strides = [1, 1, 1]} : vector<16x16x64xf32> to vector<16x15x64xf32>
    %31 = tpu.concatenate %29, %30 in 1 : vector<16x1x64xf32>, vector<16x15x64xf32> -> vector<16x16x64xf32>
    %32 = vector.extract_strided_slice %27 {offsets = [0, 0, 64], sizes = [16, 16, 64], strides = [1, 1, 1]} : vector<16x16x192xf32> to vector<16x16x64xf32>
    %33 = arith.addf %31, %32 : vector<16x16x64xf32>
    %34 = vector.extract_strided_slice %27 {offsets = [0, 0, 128], sizes = [16, 16, 64], strides = [1, 1, 1]} : vector<16x16x192xf32> to vector<16x16x64xf32>
    %cst_16 = arith.constant 0.000000e+00 : f32
    %35 = vector.broadcast %cst_16 : f32 to vector<16x1x64xf32>
    %36 = vector.extract_strided_slice %34 {offsets = [0, 1, 0], sizes = [16, 15, 64], strides = [1, 1, 1]} : vector<16x16x64xf32> to vector<16x15x64xf32>
    %37 = tpu.concatenate %36, %35 in 1 : vector<16x15x64xf32>, vector<16x1x64xf32> -> vector<16x16x64xf32>
    %38 = arith.addf %33, %37 : vector<16x16x64xf32>
    %39 = vector.shape_cast %24 : vector<1x64xf32> to vector<1x1x64xf32>
    %40 = vector.broadcast %39 : vector<1x1x64xf32> to vector<16x16x64xf32>
    %41 = arith.addf %38, %40 : vector<16x16x64xf32>
    %42 = vector.shape_cast %41 : vector<16x16x64xf32> to vector<256x64xf32>
    %cst_17 = arith.constant 0.000000e+00 : f32
    %43 = vector.broadcast %cst_17 : f32 to vector<256x64xf32>
    %44 = arith.maximumf %42, %43 : vector<256x64xf32>
    %c0_18 = arith.constant 0 : index
    %c0_19 = arith.constant 0 : index
    %45 = vector.load %arg7[%c0_18, %c0_19] : memref<1x64xf32, #tpu.memory_space<vmem>>, vector<1x64xf32>
    %c0_20 = arith.constant 0 : index
    %c0_21 = arith.constant 0 : index
    %46 = vector.load %arg6[%c0_20, %c0_21] : memref<64x192xf32, #tpu.memory_space<vmem>>, vector<64x192xf32>
    %cst_22 = arith.constant dense<0.000000e+00> : vector<256x192xf32>
    %47 = tpu.matmul %44, %46, %cst_22 {dimension_numbers = #tpu.dot_dimension_numbers<[1], [0], [0], [1], [0, 0, 1, 1], [], []>} : vector<256x64xf32>, vector<64x192xf32>, vector<256x192xf32> -> vector<256x192xf32>
    %48 = vector.shape_cast %47 : vector<256x192xf32> to vector<16x16x192xf32>
    %49 = vector.extract_strided_slice %48 {offsets = [0, 0, 0], sizes = [16, 16, 64], strides = [1, 1, 1]} : vector<16x16x192xf32> to vector<16x16x64xf32>
    %cst_23 = arith.constant 0.000000e+00 : f32
    %50 = vector.broadcast %cst_23 : f32 to vector<2x16x64xf32>
    %51 = vector.extract_strided_slice %49 {offsets = [0, 0, 0], sizes = [14, 16, 64], strides = [1, 1, 1]} : vector<16x16x64xf32> to vector<14x16x64xf32>
    %52 = tpu.concatenate %50, %51 in 0 : vector<2x16x64xf32>, vector<14x16x64xf32> -> vector<16x16x64xf32>
    %53 = vector.extract_strided_slice %48 {offsets = [0, 0, 64], sizes = [16, 16, 64], strides = [1, 1, 1]} : vector<16x16x192xf32> to vector<16x16x64xf32>
    %54 = arith.addf %52, %53 : vector<16x16x64xf32>
    %55 = vector.extract_strided_slice %48 {offsets = [0, 0, 128], sizes = [16, 16, 64], strides = [1, 1, 1]} : vector<16x16x192xf32> to vector<16x16x64xf32>
    %cst_24 = arith.constant 0.000000e+00 : f32
    %56 = vector.broadcast %cst_24 : f32 to vector<2x16x64xf32>
    %57 = vector.extract_strided_slice %55 {offsets = [2, 0, 0], sizes = [14, 16, 64], strides = [1, 1, 1]} : vector<16x16x64xf32> to vector<14x16x64xf32>
    %58 = tpu.concatenate %57, %56 in 0 : vector<14x16x64xf32>, vector<2x16x64xf32> -> vector<16x16x64xf32>
    %59 = arith.addf %54, %58 : vector<16x16x64xf32>
    %60 = vector.shape_cast %45 : vector<1x64xf32> to vector<1x1x64xf32>
    %61 = vector.broadcast %60 : vector<1x1x64xf32> to vector<16x16x64xf32>
    %62 = arith.addf %59, %61 : vector<16x16x64xf32>
    %63 = vector.shape_cast %62 : vector<16x16x64xf32> to vector<256x64xf32>
    %cst_25 = arith.constant 0.000000e+00 : f32
    %64 = vector.broadcast %cst_25 : f32 to vector<256x64xf32>
    %65 = arith.maximumf %63, %64 : vector<256x64xf32>
    %c0_26 = arith.constant 0 : index
    %c0_27 = arith.constant 0 : index
    %66 = vector.load %arg9[%c0_26, %c0_27] : memref<1x64xf32, #tpu.memory_space<vmem>>, vector<1x64xf32>
    %c0_28 = arith.constant 0 : index
    %c0_29 = arith.constant 0 : index
    %67 = vector.load %arg8[%c0_28, %c0_29] : memref<64x192xf32, #tpu.memory_space<vmem>>, vector<64x192xf32>
    %cst_30 = arith.constant dense<0.000000e+00> : vector<256x192xf32>
    %68 = tpu.matmul %65, %67, %cst_30 {dimension_numbers = #tpu.dot_dimension_numbers<[1], [0], [0], [1], [0, 0, 1, 1], [], []>} : vector<256x64xf32>, vector<64x192xf32>, vector<256x192xf32> -> vector<256x192xf32>
    %69 = vector.shape_cast %68 : vector<256x192xf32> to vector<16x16x192xf32>
    %70 = vector.extract_strided_slice %69 {offsets = [0, 0, 0], sizes = [16, 16, 64], strides = [1, 1, 1]} : vector<16x16x192xf32> to vector<16x16x64xf32>
    %cst_31 = arith.constant 0.000000e+00 : f32
    %71 = vector.broadcast %cst_31 : f32 to vector<16x2x64xf32>
    %72 = vector.extract_strided_slice %70 {offsets = [0, 0, 0], sizes = [16, 14, 64], strides = [1, 1, 1]} : vector<16x16x64xf32> to vector<16x14x64xf32>
    %73 = tpu.concatenate %71, %72 in 1 : vector<16x2x64xf32>, vector<16x14x64xf32> -> vector<16x16x64xf32>
    %74 = vector.extract_strided_slice %69 {offsets = [0, 0, 64], sizes = [16, 16, 64], strides = [1, 1, 1]} : vector<16x16x192xf32> to vector<16x16x64xf32>
    %75 = arith.addf %73, %74 : vector<16x16x64xf32>
    %76 = vector.extract_strided_slice %69 {offsets = [0, 0, 128], sizes = [16, 16, 64], strides = [1, 1, 1]} : vector<16x16x192xf32> to vector<16x16x64xf32>
    %cst_32 = arith.constant 0.000000e+00 : f32
    %77 = vector.broadcast %cst_32 : f32 to vector<16x2x64xf32>
    %78 = vector.extract_strided_slice %76 {offsets = [0, 2, 0], sizes = [16, 14, 64], strides = [1, 1, 1]} : vector<16x16x64xf32> to vector<16x14x64xf32>
    %79 = tpu.concatenate %78, %77 in 1 : vector<16x14x64xf32>, vector<16x2x64xf32> -> vector<16x16x64xf32>
    %80 = arith.addf %75, %79 : vector<16x16x64xf32>
    %81 = vector.shape_cast %66 : vector<1x64xf32> to vector<1x1x64xf32>
    %82 = vector.broadcast %81 : vector<1x1x64xf32> to vector<16x16x64xf32>
    %83 = arith.addf %80, %82 : vector<16x16x64xf32>
    %84 = vector.shape_cast %83 : vector<16x16x64xf32> to vector<256x64xf32>
    %c0_33 = arith.constant 0 : index
    %c0_34 = arith.constant 0 : index
    %c0_35 = arith.constant 0 : index
    %c0_36 = arith.constant 0 : index
    %85 = vector.load %arg1[%c0_33, %c0_34, %c0_35, %c0_36] : memref<1x16x16x64xf32, #tpu.memory_space<vmem>>, vector<1x16x16x64xf32>
    %86 = vector.shape_cast %85 : vector<1x16x16x64xf32> to vector<16x16x64xf32>
    %87 = vector.shape_cast %86 : vector<16x16x64xf32> to vector<256x64xf32>
    %88 = arith.addf %84, %87 : vector<256x64xf32>
    %cst_37 = arith.constant 0.000000e+00 : f32
    %89 = vector.broadcast %cst_37 : f32 to vector<256x64xf32>
    %90 = arith.maximumf %88, %89 : vector<256x64xf32>
    %91 = vector.shape_cast %90 : vector<256x64xf32> to vector<16x16x64xf32>
    %c0_38 = arith.constant 0 : index
    %c0_39 = arith.constant 0 : index
    %c0_40 = arith.constant 0 : index
    %c0_41 = arith.constant 0 : index
    %92 = vector.load %arg10[%c0_38, %c0_39, %c0_40, %c0_41] : memref<1x16x16x64xf32, #tpu.memory_space<vmem>>, vector<1x16x16x64xf32>
    %93 = vector.shape_cast %92 : vector<1x16x16x64xf32> to vector<16x16x64xf32>
    %94 = vector.shape_cast %91 : vector<16x16x64xf32> to vector<1x16x16x64xf32>
    tpu.vector_store %arg10[%c0_38, %c0_39, %c0_40, %c0_41], %94 {strides = array<i32>} : memref<1x16x16x64xf32, #tpu.memory_space<vmem>>, vector<1x16x16x64xf32>,
    return
  }
  func.func @transform_0(%arg0: i32) -> (i32, i32, i32, i32) {
    %c0_i32 = arith.constant 0 : i32
    %c0_i32_0 = arith.constant 0 : i32
    %c0_i32_1 = arith.constant 0 : i32
    %c0_i32_2 = arith.constant 0 : i32
    return %arg0, %c0_i32, %c0_i32_0, %c0_i32_1 : i32, i32, i32, i32
  }
  func.func @transform_1(%arg0: i32) -> (i32, i32) {
    %c0_i32 = arith.constant 0 : i32
    %c0_i32_0 = arith.constant 0 : i32
    %c0_i32_1 = arith.constant 0 : i32
    return %c0_i32, %c0_i32_0 : i32, i32
  }
  func.func @transform_2(%arg0: i32) -> (i32, i32) {
    %c0_i32 = arith.constant 0 : i32
    %c0_i32_0 = arith.constant 0 : i32
    %c0_i32_1 = arith.constant 0 : i32
    return %c0_i32, %c0_i32_0 : i32, i32
  }
  func.func @transform_3(%arg0: i32) -> (i32, i32) {
    %c0_i32 = arith.constant 0 : i32
    %c0_i32_0 = arith.constant 0 : i32
    %c0_i32_1 = arith.constant 0 : i32
    return %c0_i32, %c0_i32_0 : i32, i32
  }
  func.func @transform_4(%arg0: i32) -> (i32, i32) {
    %c0_i32 = arith.constant 0 : i32
    %c0_i32_0 = arith.constant 0 : i32
    %c0_i32_1 = arith.constant 0 : i32
    return %c0_i32, %c0_i32_0 : i32, i32
  }
  func.func @transform_5(%arg0: i32) -> (i32, i32) {
    %c0_i32 = arith.constant 0 : i32
    %c0_i32_0 = arith.constant 0 : i32
    %c0_i32_1 = arith.constant 0 : i32
    return %c0_i32, %c0_i32_0 : i32, i32
  }
  func.func @transform_6(%arg0: i32) -> (i32, i32) {
    %c0_i32 = arith.constant 0 : i32
    %c0_i32_0 = arith.constant 0 : i32
    %c0_i32_1 = arith.constant 0 : i32
    return %c0_i32, %c0_i32_0 : i32, i32
  }
  func.func @transform_7(%arg0: i32) -> (i32, i32) {
    %c0_i32 = arith.constant 0 : i32
    %c0_i32_0 = arith.constant 0 : i32
    %c0_i32_1 = arith.constant 0 : i32
    return %c0_i32, %c0_i32_0 : i32, i32
  }
  func.func @transform_8(%arg0: i32) -> (i32, i32) {
    %c0_i32 = arith.constant 0 : i32
    %c0_i32_0 = arith.constant 0 : i32
    %c0_i32_1 = arith.constant 0 : i32
    return %c0_i32, %c0_i32_0 : i32, i32
  }
  func.func @transform_9(%arg0: i32) -> (i32, i32, i32, i32) {
    %c0_i32 = arith.constant 0 : i32
    %c0_i32_0 = arith.constant 0 : i32
    %c0_i32_1 = arith.constant 0 : i32
    %c0_i32_2 = arith.constant 0 : i32
    return %arg0, %c0_i32, %c0_i32_0, %c0_i32_1 : i32, i32, i32, i32
  }
}

</mosaic_0001>

<bundles_post_ra>
// kernel: tpu_custom_call.1
= control target key start
LH: loop header
LB: loop body
LE: loop exit
PB: predicated region body
PF: predicated region fallthrough
CT: control target
= control target key end

     0   :  { %s6217_s0 = inlined_call_operand.hbm [shape: f32[2,16,16,64], index: 0, kind: input, shape index: {}]   ;;  %s6218_s1 = inlined_call_operand.hbm [shape: f32[64,192], index: 1, kind: input, shape index: {}]   ;;  %s6219_s2 = inlined_call_operand.vmem [shape: f32[1,64], index: 2, kind: input, shape index: {}]   ;;  %s6220_s3 = inlined_call_operand.hbm [shape: f32[64,192], index: 3, kind: input, shape index: {}]   ;;  %s6221_s4 = inlined_call_operand.vmem [shape: f32[1,64], index: 4, kind: input, shape index: {}]   ;;  %s6222_s5 = inlined_call_operand.hbm [shape: f32[64,192], index: 5, kind: input, shape index: {}]   ;;  %s6223_s6 = inlined_call_operand.vmem [shape: f32[1,64], index: 6, kind: input, shape index: {}]   ;;  %s6224_s7 = inlined_call_operand.hbm [shape: f32[64,192], index: 7, kind: input, shape index: {}]   ;;  %s6225_s8 = inlined_call_operand.vmem [shape: f32[1,64], index: 8, kind: input, shape index: {}]   ;;  %s6226_s9 = inlined_call_operand.hbm [shape: f32[2,16,16,64], index: 9, kind: output, shape index: {}]  }
   0x1   :  { %6305 = sst [smem:[#allocation25_spill]] %s6218_s1 }
   0x2   :  { %6306 = sst [smem:[#allocation26_spill]] %s6220_s3 }
   0x3   :  { %6307 = sst [smem:[#allocation27_spill]] %s6222_s5 }
   0x4   :  { %14 = vsyncpa [#allocation3], 0 }
   0x5   :  { %16 = vsyncpa [#allocation3 + $0x1], 0 }
   0x6   :  { %17 = vsyncpa [#allocation6], 0 }
   0x7   :  { %18 = vsyncpa [#allocation9], 0 }
   0x8   :  { %19 = vsyncpa [#allocation4], 0 }
   0x9   :  { %21 = vsyncpa [#allocation4 + $0x1], 0  ;;  %s4158_s30 = smov 0   ;;  %s4160_s10 = smov 0  }
   0xa   :  { %s4162_s11 = smov 0   ;;  %s4164_s12 = smov 0  }
   0xb LB: > { %s4179_s13 = sadd.s32 4294967295, %s4092_s12   ;;  %s3605_s14 = sadd.s32 4294967294, %s4092_s12   ;;  %s4092_s12 = sphi %s4164_s12, %s6434_s12   ;;  %s4088_s11 = sphi %s4162_s11, %s6433_s11   ;;  %s4084_s10 = sphi %s4160_s10, %s6432_s10   ;;  %s4080_s30 = sphi %s4158_s30, %s6431_s30  }
   0xc   : > { %p47_p0 = scmp.ne.s32.totalorder %s4084_s10, %s4080_s30  ;;  %p6227_p1 = scmp.eq.s32.totalorder %s4179_s13, 0 }
   0xd   : > { %p239_p2 = scmp.eq.s32.totalorder %s4179_s13, 1  ;;  %p245_p3 = scmp.eq.s32.totalorder %s3605_s14, 1 }
   0xe   : > { %p4188_p4 = por %p6227_p1, %p47_p0  ;;  %p3606_p5 = scmp.ge.s32.totalorder %s4092_s12, 1 }
   0xf   : > { %p4193_p6 = por %p245_p3, %p47_p0  ;;  %p252_p7 = scmp.lt.s32.totalorder %s4092_s12, 3 }
  0x10   : > { %s6308_s15 = scalar_select %p4188_p4, 1, 0 }
  0x11   : > { %s6309_s16 = scalar_select %p4193_p6, 1, 0 }
  0x12   : > { %p4198_p8 = pnand %p3606_p5, %p252_p7  ;;  %s4094_s18 = smov [#allocation5]  }
  0x13   : > { %s264_s19 = sshll.u32 %s4094_s18, 4  ;;  %s4095_s21 = smov [#allocation8]   ;;  %s265_s19 = int_to_ptr.vmem [resolvable:$true] %s264_s19 }
  0x14   : > { %s6310_s17 = scalar_select %p4198_p8, 1, 0 }
  0x15   : > { %p3781_p9 = pneg %p4198_p8  ;;  %s296_s22 = sshll.u32 %s4095_s21, 4  ;;  %s297_s22 = int_to_ptr.vmem [resolvable:$true] %s296_s22 }
  0x16   : > { %s4096_s23 = smov [#allocation7]   ;;  %s3899_s25 = scalar_lea.vmem %s265_s19, 2048 }
  0x17   : > { %p4207_p11 = pnand %p3781_p9, %p6227_p1  ;;  %s280_s24 = sshll.u32 %s4096_s23, 4  ;;  %s281_s24 = int_to_ptr.vmem [resolvable:$true] %s280_s24 }
  0x18   : > { %p3900_p13 = scmp.ne.s32.totalorder %s265_s19, %s3899_s25  ;;  %p3907_p5 = scmp.lt.s32.totalorder %s265_s19, %s265_s19 }
  0x19   : > { %p3890_p12 = pneg %p4207_p11  ;;  %p3908_p7 = scmp.lt.s32.totalorder %s3899_s25, %s3899_s25 }
  0x1b   : > { %p3902_p0 = pnand %p3900_p13, %p3890_p12  ;;  %p3909_p9 = por %p3908_p7, %p3907_p5 }
  0x1d   : > { %p3903_p3 = pneg %p3902_p0 }
  0x1f   : > { %p3910_p10 = pnand %p3909_p9, %p3903_p3 }
  0x21   : > { %3913 = shalt.err (!%p3910_p10)
}
  0x22   : > { %s4097_s26 = smov 256   ;;  %s4098_s27 = smov 16  }
  0x23   : > { %s6312_s1 = sld [smem:[#allocation25_spill]]  ;;  %s3925_s14 = scalar_lea.vmem %s297_s22, 2048 }
  0x24   : > { %p3926_p13 = scmp.ne.s32.totalorder %s297_s22, %s3925_s14  ;;  %p3933_p3 = scmp.lt.s32.totalorder %s297_s22, %s297_s22 }
  0x25   : > { %p3934_p10 = scmp.lt.s32.totalorder %s3925_s14, %s3925_s14 }
  0x26   : > { %p3928_p0 = pnand %p3926_p13, %p3890_p12 }
  0x27   : > { %p3935_p7 = por %p3934_p10, %p3933_p3 }
  0x28   : > { %p3929_p5 = pneg %p3928_p0 }
  0x29   : > { %3784 = dma.hbm_to_vmem [thread:$0]  (!%p4207_p11), %s6312_s1, 2048, %s265_s19, [#allocation6], %s4097_s26, %s4097_s26, %s4098_s27  }
  0x2a   : > { %p3936_p9 = pnand %p3935_p7, %p3929_p5 }
  0x2c   : > { %3939 = shalt.err (!%p3936_p9)
}
  0x2d   : > { %s6313_s5 = sld [smem:[#allocation27_spill]]  ;;  %s3951_s19 = scalar_lea.vmem %s281_s24, 2048 }
  0x2e   : > { %p3952_p1 = scmp.ne.s32.totalorder %s281_s24, %s3951_s19  ;;  %p3959_p3 = scmp.lt.s32.totalorder %s281_s24, %s281_s24 }
  0x2f   : > { %p3960_p5 = scmp.lt.s32.totalorder %s3951_s19, %s3951_s19 }
  0x30   : > { %p3954_p13 = pnand %p3952_p1, %p3890_p12 }
  0x31   : > { %p3961_p10 = por %p3960_p5, %p3959_p3 }
  0x32   : > { %p3955_p0 = pneg %p3954_p13 }
  0x33   : > { %3790 = dma.hbm_to_vmem [thread:$0]  (!%p4207_p11), %s6313_s5, 2048, %s297_s22, [#allocation9], %s4097_s26, %s4097_s26, %s4098_s27  }
  0x34   : > { %p3962_p7 = pnand %p3961_p10, %p3955_p0 }
  0x36   : > { %3965 = shalt.err (!%p3962_p7)
}
  0x37   : > { %s6314_s3 = sld [smem:[#allocation26_spill]]  ;;  %s4099_s22 = smov [#allocation10]  }
  0x38   : > { %s312_s28 = sshll.u32 %s4099_s22, 4  ;;  %s313_s28 = int_to_ptr.vmem [resolvable:$true] %s312_s28 }
  0x39   : > { %s3977_s29 = scalar_lea.vmem %s313_s28, 2048  ;;  %p3985_p0 = scmp.lt.s32.totalorder %s313_s28, %s313_s28 }
  0x3a   : > { %p3978_p1 = scmp.ne.s32.totalorder %s313_s28, %s3977_s29  ;;  %p3986_p3 = scmp.lt.s32.totalorder %s3977_s29, %s3977_s29 }
  0x3c   : > { %p3980_p9 = pnand %p3978_p1, %p3890_p12  ;;  %p3987_p5 = por %p3986_p3, %p3985_p0 }
  0x3d   : > { %3787 = dma.hbm_to_vmem [thread:$0]  (!%p4207_p11), %s6314_s3, 2048, %s281_s24, [#allocation6], %s4097_s26, %s4097_s26, %s4098_s27  }
  0x3e   : > { %p3981_p13 = pneg %p3980_p9 }
  0x40   : > { %p3988_p10 = pnand %p3987_p5, %p3981_p13 }
  0x42   : > { %3991 = shalt.err (!%p3988_p10)
}
  0x43   : > { %3793 = dma.hbm_to_vmem [thread:$0]  (!%p4207_p11), %s6224_s7, 2048, %s313_s28, [#allocation9], %s4097_s26, %s4097_s26, %s4098_s27  }
  0x44   : > { %s4258_s18 = sadd.s32 1, %s4092_s12   ;;  %s34_s20 = sadd.s32 1, %s4088_s11 }
  0x45   : > { %s31_s21 = ssub.s32 %s4092_s12, %s4258_s18  ;;  %p41_p12 = scmp.ne.s32.totalorder %s4088_s11, %s4084_s10 }
  0x46   : > { %p32_p7 = scmp.eq.s32.totalorder %s31_s21, 0  ;;  %p42_p1 = scmp.eq.s32.totalorder %s4092_s12, 0 }
  0x47   : > { %p4268_p9 = por %p239_p2, %p41_p12  ;;  %p3806_p13 = scmp.lt.s32.totalorder %s4092_s12, 2 }
  0x48   : > { %s4274_s23 = scalar_select %p32_p7, %s4088_s11, %s34_s20  }
  0x49   : > { %s6315_s19 = scalar_select %p4268_p9, 1, 0 }
  0x4a   : > { %p43_p0 = por %p42_p1, %p41_p12  ;;  %s329_s25 = sand.u32 1, %s4088_s11  }
  0x4b   : > { %s3612_s22 = sshll.u32 %s329_s25, 8  ;;  %s3759_s26 = sshll.u32 %s4092_s12, 12 }
  0x4c   : > { %s4281_s29 = scalar_lea.hbm %s6217_s0, %s3759_s26  ;;  %s333_s24 = scalar_lea.vmem [#allocation2], %s3612_s22 }
  0x4d   : > { %s340_s14 = sshll.u32 %s333_s24, 4  ;;  %p4285_p2 = pnand %p3806_p13, %p43_p0  ;;  %s4283_s14 = int_to_ptr.vmem [resolvable:$true] %s340_s14 }
  0x4e   : > { %s4289_s20 = scalar_lea.sflag [#allocation3], %s329_s25  ;;  %s3992_s1 = scalar_lea.hbm %s4281_s29, 4096 }
  0x4f   : > { %p3993_p11 = scmp.ne.s32.totalorder %s4281_s29, %s3992_s1  ;;  %p3994_p3 = pneg %p4285_p2 }
  0x50   : > { %s3997_s22 = scalar_lea.hbm %s6217_s0, 8192  ;;  %p3998_p12 = scmp.lt.s32.totalorder %s4281_s29, %s6217_s0 }
  0x51   : > { %p3995_p5 = pnand %p3994_p3, %p3993_p11  ;;  %p3999_p7 = scmp.lt.s32.totalorder %s3997_s22, %s3992_s1 }
  0x53   : > { %p3996_p10 = pneg %p3995_p5  ;;  %p4000_p1 = por %p3999_p7, %p3998_p12 }
  0x55   : > { %p4001_p13 = pnand %p4000_p1, %p3996_p10 }
  0x57   : > { %4004 = shalt.err (!%p4001_p13)
}
  0x58   : > { %s4005_s25 = scalar_lea.vmem %s4283_s14, 4096  ;;  %s4100_s3 = smov [#allocation2]  }
  0x59   : > { %p4006_p0 = scmp.ne.s32.totalorder %s4283_s14, %s4005_s25  ;;  %s4010_s5 = sshll.u32 %s4100_s3, 4  ;;  %s4011_s5 = int_to_ptr.vmem [resolvable:$false] %s4010_s5 }
  0x5a   : > { %s4012_s26 = scalar_lea.vmem %s4011_s5, 8192  ;;  %p4013_p5 = scmp.lt.s32.totalorder %s4283_s14, %s4011_s5 }
  0x5b   : > { %p4008_p6 = pnand %p4006_p0, %p3994_p3  ;;  %p4014_p9 = scmp.lt.s32.totalorder %s4012_s26, %s4005_s25 }
  0x5d   : > { %p4009_p11 = pneg %p4008_p6  ;;  %p4015_p4 = por %p4014_p9, %p4013_p5 }
  0x5f   : > { %p4016_p8 = pnand %p4015_p4, %p4009_p11 }
  0x61   : > { %4019 = shalt.err (!%p4016_p8)
}
  0x62   : > { %s4101_s1 = smov 128   ;;  %s4102_s27 = smov 8  }
  0x63   : > { %3797 = dma.hbm_to_vmem [thread:$0]  (!%p4285_p2), %s4281_s29, 4096, %s4283_s14, %s4289_s20, %s4101_s1, %s4101_s1, %s4102_s27  }
  0x64   : > { %p6317_p3 = scmp.ne.s32.totalorder %s6310_s17, 0 }
  0x66   : > { %352 = sbr.rel (%p6317_p3) target bundleno = 1539 (0x603), region = 56 }
  0x6b   : > { %s4313_s3 = sand.u32 1, %s4084_s10   ;;  %p6318_p4 = scmp.ne.s32.totalorder %s6308_s15, 0 }
  0x6c   : > { %s3616_s5 = sshll.u32 %s4313_s3, 8  ;;  %s355_s22 = scalar_lea.sflag [#allocation3], %s4313_s3 }
  0x6d   : > { %s4319_s28 = scalar_lea.vmem [#allocation2], %s3616_s5 }
  0x6e   : > { %4063 = dma.done.wait (%p6318_p4), %s355_s22, 4096  }
  0x6f   : > { %4065 = vsyncadd (%p6318_p4), %s355_s22, 4294963200  ;;  %p6319_p6 = scmp.eq.s32.totalorder %s4179_s13, 0 }
  0x71   : > { %4067 = dma.done.wait (%p6319_p6), [#allocation6], 4096   ;;  %p6320_p8 = pmov %p6319_p6 }
  0x72   : > { %p6321_p9 = pmov %p6319_p6 }
  0x73   : > { %4069 = vsyncadd (%p6320_p8), [#allocation6], 4294963200 }
  0x74   : > { %4071 = dma.done.wait (%p6321_p9), [#allocation9], 4096   ;;  %p6322_p2 = pmov %p6319_p6 }
  0x75   : > { %v6231_v0 = vmov 0.0   ;;  %v457_v1 = vld [vmem:[#allocation5 + $0x78] sm:$0xff]  ;;  %v456_v2 = vld [vmem:[#allocation5 + $0x70] sm:$0xff]  ;;  %v455_v3 = vld [vmem:[#allocation5 + $0x68] sm:$0xff]  ;;  %vm458_vm0 = vcmask 523264   ;;  %s4104_s15 = smov 64  }
  0x76   : > { %4073 = vsyncadd (%p6322_p2), [#allocation9], 4294963200  ;;  %619 = vmatprep.mubr.f32.mxu0 %v6231_v0  ;;  %1249 = vmatprep.mubr.f32.mxu1 %v6231_v0  ;;  %v454_v4 = vld [vmem:[#allocation5 + $0x60] sm:$0xff]  ;;  %v453_v5 = vld [vmem:[#allocation5 + $0x58] sm:$0xff]  ;;  %vm1474_vm1 = vcmask 1040384   ;;  %vm1731_vm2 = vcmask 1046528  }
  0x77   : > { %571 = vmatprep.subr.mxu0 %v457_v1  ;;  %v452_v6 = vld [vmem:[#allocation5 + $0x50] sm:$0xff]  ;;  %v451_v7 = vld [vmem:[#allocation5 + $0x48] sm:$0xff]  ;;  %v450_v8 = vld [vmem:[#allocation5 + $0x40] sm:$0xff]  ;;  %vm3217_vm3 = vcmask 1045504   ;;  %vm2960_vm4 = vcmask 1041408   ;;  %s5915_s1 = scalar_lea.vmem [#allocation11], %s3616_s5 }
  0x78   : > { %572 = vmatpush1.msra.mxu0 %v456_v2  ;;  %v449_v9 = vld [vmem:[#allocation5 + $0x38] sm:$0xff]  ;;  %v448_v10 = vld [vmem:[#allocation5 + $0x30] sm:$0xff]  ;;  %v447_v11 = vld [vmem:[#allocation5 + $0x28] sm:$0xff]  ;;  %s3760_s27 = sshll.u32 %s4179_s13, 12  ;;  %s3494_s5 = sshll.u32 %s5915_s1, 4  ;;  %s6172_s5 = int_to_ptr.vmem [resolvable:$true] %s3494_s5 }
  0x79   : > { %573 = vmatprep.subr.mxu0 %v455_v3  ;;  %v446_v12 = vld [vmem:[#allocation5 + $0x20] sm:$0xff]  ;;  %v445_v13 = vld [vmem:[#allocation5 + $0x18] sm:$0xff]  ;;  %v444_v14 = vld [vmem:[#allocation5 + $0x10] sm:$0xff]  ;;  %s6170_s17 = scalar_lea.hbm %s6226_s9, %s3760_s27  ;;  %s3481_s29 = scalar_lea.sflag [#allocation4], %s4313_s3 }
  0x7a   : > { %574 = vmatpush1.msra.mxu0 %v454_v4  ;;  %v443_v15 = vld [vmem:[#allocation5 + $0x8] sm:$0xff]  ;;  %v442_v16 = vld [vmem:[#allocation5] sm:$0xff]  ;;  %v411_v19 = vld [vmem:[%s4319_s28 + $0x10] sm:$0xff]  ;;  %s4020_s13 = scalar_lea.vmem %s6172_s5, 4096  ;;  %p6428_p12 = scmp.ne.s32.totalorder %s6315_s19, 0 }
  0x7b   : > { %575 = vmatprep.subr.mxu0 %v453_v5  ;;  %v409_v17 = vld [vmem:[%s4319_s28] sm:$0xff]  ;;  %v410_v18 = vld [vmem:[%s4319_s28 + $0x8] sm:$0xff]  ;;  %v412_v20 = vld [vmem:[%s4319_s28 + $0x18] sm:$0xff]  ;;  %p4021_p10 = scmp.ne.s32.totalorder %s6172_s5, %s4020_s13 }
  0x7c   : > { %576 = vmatpush1.msra.mxu0 %v452_v6  ;;  %v413_v21 = vld [vmem:[%s4319_s28 + $0x20] sm:$0xff]  ;;  %v414_v22 = vld [vmem:[%s4319_s28 + $0x28] sm:$0xff]  ;;  %v415_v23 = vld [vmem:[%s4319_s28 + $0x30] sm:$0xff] }
  0x7d   : > { %577 = vmatprep.subr.mxu0 %v451_v7  ;;  %v416_v24 = vld [vmem:[%s4319_s28 + $0x38] sm:$0xff]  ;;  %v417_v25 = vld [vmem:[%s4319_s28 + $0x40] sm:$0xff]  ;;  %v418_v26 = vld [vmem:[%s4319_s28 + $0x48] sm:$0xff]  ;;  %p4022_p7 = pnand %p4021_p10, %p6428_p12 }
  0x7e   : > { %578 = vmatpush1.msra.mxu0 %v450_v8  ;;  %v419_v27 = vld [vmem:[%s4319_s28 + $0x50] sm:$0xff]  ;;  %v420_v28 = vld [vmem:[%s4319_s28 + $0x58] sm:$0xff]  ;;  %v421_v29 = vld [vmem:[%s4319_s28 + $0x60] sm:$0xff] }
  0x7f   : > { %579 = vmatprep.subr.mxu0 %v449_v9  ;;  %v422_v30 = vld [vmem:[%s4319_s28 + $0x68] sm:$0xff]  ;;  %v423_v31 = vld [vmem:[%s4319_s28 + $0x70] sm:$0xff]  ;;  %v424_v32 = vld [vmem:[%s4319_s28 + $0x78] sm:$0xff]  ;;  %p4023_p1 = pneg %p4022_p7 }
  0x80   : > { %580 = vmatpush1.msra.mxu0 %v448_v10  ;;  %v425_v33 = vld [vmem:[%s4319_s28 + $0x80] sm:$0xff]  ;;  %v426_v34 = vld [vmem:[%s4319_s28 + $0x88] sm:$0xff]  ;;  %v427_v35 = vld [vmem:[%s4319_s28 + $0x90] sm:$0xff] }
  0x81   : > { %581 = vmatprep.subr.mxu0 %v447_v11  ;;  %v428_v36 = vld [vmem:[%s4319_s28 + $0x98] sm:$0xff]  ;;  %v429_v37 = vld [vmem:[%s4319_s28 + $0xa0] sm:$0xff]  ;;  %v430_v38 = vld [vmem:[%s4319_s28 + $0xa8] sm:$0xff] }
  0x82   : > { %582 = vmatpush1.msra.mxu0 %v446_v12  ;;  %v431_v39 = vld [vmem:[%s4319_s28 + $0xb0] sm:$0xff]  ;;  %v432_v40 = vld [vmem:[%s4319_s28 + $0xb8] sm:$0xff]  ;;  %v433_v41 = vld [vmem:[%s4319_s28 + $0xc0] sm:$0xff] }
  0x83   : > { %583 = vmatprep.subr.mxu0 %v445_v13  ;;  %v434_v42 = vld [vmem:[%s4319_s28 + $0xc8] sm:$0xff]  ;;  %v435_v43 = vld [vmem:[%s4319_s28 + $0xd0] sm:$0xff]  ;;  %v436_v44 = vld [vmem:[%s4319_s28 + $0xd8] sm:$0xff] }
  0x84   : > { %584 = vmatpush1.msra.mxu0 %v444_v14  ;;  %v437_v45 = vld [vmem:[%s4319_s28 + $0xe0] sm:$0xff]  ;;  %v438_v46 = vld [vmem:[%s4319_s28 + $0xe8] sm:$0xff]  ;;  %v439_v47 = vld [vmem:[%s4319_s28 + $0xf0] sm:$0xff] }
  0x85   : > { %585 = vmatprep.subr.mxu0 %v443_v15  ;;  %v440_v48 = vld [vmem:[%s4319_s28 + $0xf8] sm:$0xff]  ;;  %v1087_v50 = vld [vmem:[#allocation7 + $0x70] sm:$0xff]  ;;  %v1086_v51 = vld [vmem:[#allocation7 + $0x68] sm:$0xff] }
  0x86   : > { %586 = vmatpush1.msra.mxu0 %v442_v16  ;;  %v1088_v49 = vld [vmem:[#allocation7 + $0x78] sm:$0xff]  ;;  %v1085_v52 = vld [vmem:[#allocation7 + $0x60] sm:$0xff]  ;;  %v1083_v54 = vld [vmem:[#allocation7 + $0x50] sm:$0xff] }
  0x87   : > { %3622 = vmatmul.mubr.msk.f32.vlgmr.msra.gmra.mxu0 %vm458_vm0, %v409_v17  ;;  %1201 = vmatprep.subr.mxu1 %v1088_v49  ;;  %v1084_v53 = vld [vmem:[#allocation7 + $0x58] sm:$0xff]  ;;  %v1082_v55 = vld [vmem:[#allocation7 + $0x48] sm:$0xff]  ;;  %v1081_v56 = vld [vmem:[#allocation7 + $0x40] sm:$0xff] }
  0x88   : > { %624 = vmatprep.mubr.f32.mxu0 %v6231_v0  ;;  %1202 = vmatpush1.msra.mxu1 %v1087_v50  ;;  %v1080_v57 = vld [vmem:[#allocation7 + $0x38] sm:$0xff]  ;;  %v1079_v58 = vld [vmem:[#allocation7 + $0x30] sm:$0xff]  ;;  %v1078_v59 = vld [vmem:[#allocation7 + $0x28] sm:$0xff] }
  0x89   : > { %1203 = vmatprep.subr.mxu1 %v1086_v51  ;;  %v1077_v60 = vld [vmem:[#allocation7 + $0x20] sm:$0xff]  ;;  %v1076_v61 = vld [vmem:[#allocation7 + $0x18] sm:$0xff]  ;;  %v1075_v62 = vld [vmem:[#allocation7 + $0x10] sm:$0xff] }
  0x8a   : > { %1204 = vmatpush1.msra.mxu1 %v1085_v52  ;;  %v1074_v63 = vld [vmem:[#allocation7 + $0x8] sm:$0xff]  ;;  %v1073_v1 = vld [vmem:[#allocation7] sm:$0xff] }
  0x8b   : > { %3623 = vmatmul.mubr.msk.f32.gmra.mxu0 %vm458_vm0, %v410_v18  ;;  %1205 = vmatprep.subr.mxu1 %v1084_v53 }
  0x8c   : > { %629 = vmatprep.mubr.f32.mxu0 %v6231_v0  ;;  %1206 = vmatpush1.msra.mxu1 %v1083_v54 }
  0x8d   : > { %1207 = vmatprep.subr.mxu1 %v1082_v55 }
  0x8e   : > { %1208 = vmatpush1.msra.mxu1 %v1081_v56 }
  0x8f   : > { %3624 = vmatmul.mubr.msk.f32.gmra.mxu0 %vm458_vm0, %v411_v19  ;;  %1209 = vmatprep.subr.mxu1 %v1080_v57 }
  0x90   : > { %635 = vmatprep.mubr.f32.mxu0 %v6231_v0  ;;  %1210 = vmatpush1.msra.mxu1 %v1079_v58 }
  0x91   : > { %1211 = vmatprep.subr.mxu1 %v1078_v59 }
  0x92   : > { %1212 = vmatpush1.msra.mxu1 %v1077_v60  ;;  %v4604_v60 = vld [vmem:[%s6219_s2] ss:$0 sm:$0xff] }
  0x93   : > { %3625 = vmatmul.mubr.msk.f32.gmra.mxu0 %vm458_vm0, %v412_v20  ;;  %1213 = vmatprep.subr.mxu1 %v1076_v61 }
  0x94   : > { %641 = vmatprep.mubr.f32.mxu0 %v6231_v0  ;;  %1214 = vmatpush1.msra.mxu1 %v1075_v62 }
  0x95   : > { %1215 = vmatprep.subr.mxu1 %v1074_v63 }
  0x96   : > { %1216 = vmatpush1.msra.mxu1 %v1073_v1 }
  0x97   : > { %3626 = vmatmul.mubr.msk.f32.gmra.mxu0 %vm458_vm0, %v413_v21 }
  0x98   : > { %647 = vmatprep.mubr.f32.mxu0 %v6231_v0 }
  0x9b   : > { %3627 = vmatmul.mubr.msk.f32.gmra.mxu0 %vm458_vm0, %v414_v22 }
  0x9c   : > { %653 = vmatprep.mubr.f32.mxu0 %v6231_v0 }
  0x9f   : > { %3628 = vmatmul.mubr.msk.f32.gmra.mxu0 %vm458_vm0, %v415_v23 }
  0xa0   : > { %659 = vmatprep.mubr.f32.mxu0 %v6231_v0 }
  0xa3   : > { %3629 = vmatmul.mubr.msk.f32.gmra.mxu0 %vm458_vm0, %v416_v24 }
  0xa4   : > { %665 = vmatprep.mubr.f32.mxu0 %v6231_v0 }
  0xa7   : > { %3630 = vmatmul.mubr.msk.f32.gmra.mxu0 %vm458_vm0, %v417_v25 }
  0xa8   : > { %671 = vmatprep.mubr.f32.mxu0 %v6231_v0 }
  0xab   : > { %3631 = vmatmul.mubr.msk.f32.gmra.mxu0 %vm458_vm0, %v418_v26 }
  0xac   : > { %677 = vmatprep.mubr.f32.mxu0 %v6231_v0 }
  0xaf   : > { %3632 = vmatmul.mubr.msk.f32.gmra.mxu0 %vm458_vm0, %v419_v27 }
  0xb0   : > { %683 = vmatprep.mubr.f32.mxu0 %v6231_v0 }
  0xb3   : > { %3633 = vmatmul.mubr.msk.f32.gmra.mxu0 %vm458_vm0, %v420_v28 }
  0xb4   : > { %689 = vmatprep.mubr.f32.mxu0 %v6231_v0 }
  0xb7   : > { %3634 = vmatmul.mubr.msk.f32.gmra.mxu0 %vm458_vm0, %v421_v29 }
  0xb8   : > { %695 = vmatprep.mubr.f32.mxu0 %v6231_v0 }
  0xbb   : > { %3635 = vmatmul.mubr.msk.f32.gmra.mxu0 %vm458_vm0, %v422_v30 }
  0xbc   : > { %701 = vmatprep.mubr.f32.mxu0 %v6231_v0 }
  0xbf   : > { %3636 = vmatmul.mubr.msk.f32.gmra.mxu0 %vm458_vm0, %v423_v31 }
  0xc0   : > { %707 = vmatprep.mubr.f32.mxu0 %v6231_v0 }
  0xc3   : > { %3637 = vmatmul.mubr.msk.f32.gmra.mxu0 %vm458_vm0, %v424_v32 }
  0xc4   : > { %713 = vmatprep.mubr.f32.mxu0 %v6231_v0 }
  0xc7   : > { %3638 = vmatmul.mubr.msk.f32.gmra.mxu0 %vm458_vm0, %v425_v33 }
  0xc8   : > { %719 = vmatprep.mubr.f32.mxu0 %v6231_v0 }
  0xcb   : > { %3639 = vmatmul.mubr.msk.f32.gmra.mxu0 %vm458_vm0, %v426_v34 }
  0xcc   : > { %725 = vmatprep.mubr.f32.mxu0 %v6231_v0 }
  0xcf   : > { %3640 = vmatmul.mubr.msk.f32.gmra.mxu0 %vm458_vm0, %v427_v35 }
  0xd0   : > { %731 = vmatprep.mubr.f32.mxu0 %v6231_v0 }
  0xd3   : > { %3641 = vmatmul.mubr.msk.f32.gmra.mxu0 %vm458_vm0, %v428_v36 }
  0xd4   : > { %737 = vmatprep.mubr.f32.mxu0 %v6231_v0 }
  0xd7   : > { %3642 = vmatmul.mubr.msk.f32.gmra.mxu0 %vm458_vm0, %v429_v37 }
  0xd8   : > { %743 = vmatprep.mubr.f32.mxu0 %v6231_v0 }
  0xdb   : > { %3643 = vmatmul.mubr.msk.f32.gmra.mxu0 %vm458_vm0, %v430_v38 }
  0xdc   : > { %749 = vmatprep.mubr.f32.mxu0 %v6231_v0 }
  0xdf   : > { %3644 = vmatmul.mubr.msk.f32.gmra.mxu0 %vm458_vm0, %v431_v39 }
  0xe0   : > { %755 = vmatprep.mubr.f32.mxu0 %v6231_v0 }
  0xe3   : > { %3645 = vmatmul.mubr.msk.f32.gmra.mxu0 %vm458_vm0, %v432_v40 }
  0xe4   : > { %761 = vmatprep.mubr.f32.mxu0 %v6231_v0 }
  0xe7   : > { %3646 = vmatmul.mubr.msk.f32.gmra.mxu0 %vm458_vm0, %v433_v41 }
  0xe8   : > { %767 = vmatprep.mubr.f32.mxu0 %v6231_v0 }
  0xeb   : > { %3647 = vmatmul.mubr.msk.f32.gmra.mxu0 %vm458_vm0, %v434_v42 }
  0xec   : > { %773 = vmatprep.mubr.f32.mxu0 %v6231_v0 }
  0xef   : > { %3648 = vmatmul.mubr.msk.f32.gmra.mxu0 %vm458_vm0, %v435_v43 }
  0xf0   : > { %779 = vmatprep.mubr.f32.mxu0 %v6231_v0 }
  0xf3   : > { %3649 = vmatmul.mubr.msk.f32.gmra.mxu0 %vm458_vm0, %v436_v44 }
  0xf4   : > { %785 = vmatprep.mubr.f32.mxu0 %v6231_v0 }
  0xf7   : > { %3650 = vmatmul.mubr.msk.f32.gmra.mxu0 %vm458_vm0, %v437_v45 }
  0xf8   : > { %791 = vmatprep.mubr.f32.mxu0 %v6231_v0 }
  0xfb   : > { %3651 = vmatmul.mubr.msk.f32.gmra.mxu0 %vm458_vm0, %v438_v46 }
  0xfc   : > { %797 = vmatprep.mubr.f32.mxu0 %v6231_v0 }
  0xff   : > { %3652 = vmatmul.mubr.msk.f32.gmra.mxu0 %vm458_vm0, %v439_v47 }
 0x100   : > { %803 = vmatprep.mubr.f32.mxu0 %v6231_v0 }
 0x103   : > { %3653 = vmatmul.mubr.msk.f32.gmra.mxu0 %vm458_vm0, %v440_v48 }
 0x104   : > { %2107 = vmatprep.mubr.f32.mxu0 %v6231_v0 }
 0x147   : > { %v4431_v2 = vpop.f32.mrf.mxu0 }
 0x148   : > { %842 = vrot.lane.b32.xlu0 %v4431_v2, %s4104_s15 }
 0x149   : > { %v623_v3 = vpop.f32.mrf.mxu0 }
 0x14b   : > { %v4435_v4 = vpop.f32.mrf.mxu0 }
 0x14c   : > { %844 = vrot.lane.b32.xlu0 %v4435_v4, %s4104_s15 }
 0x14d   : > { %v628_v5 = vpop.f32.mrf.mxu0 }
 0x14f   : > { %v4439_v6 = vpop.f32.mrf.mxu0 }
 0x150   : > { %846 = vrot.lane.b32.xlu1 %v4439_v6, %s4104_s15 }
 0x151   : > { %v4443_v7 = vpop.f32.mrf.mxu0 }
 0x153   : > { %v4445_v8 = vpop.f32.mrf.mxu0 }
 0x154   : > { %848 = vrot.lane.b32.xlu1 %v4445_v8, %s4104_s15 }
 0x155   : > { %v4449_v9 = vpop.f32.mrf.mxu0 }
 0x157   : > { %v4451_v10 = vpop.f32.mrf.mxu0 }
 0x158   : > { %850 = vrot.lane.b32.xlu0 %v4451_v10, %s4104_s15 }
 0x159   : > { %v4455_v11 = vpop.f32.mrf.mxu0 }
 0x15b   : > { %v4457_v12 = vpop.f32.mrf.mxu0 }
 0x15c   : > { %852 = vrot.lane.b32.xlu1 %v4457_v12, %s4104_s15 }
 0x15d   : > { %v4461_v13 = vpop.f32.mrf.mxu0 }
 0x15f   : > { %v4463_v14 = vpop.f32.mrf.mxu0 }
 0x160   : > { %854 = vrot.lane.b32.xlu0 %v4463_v14, %s4104_s15 }
 0x161   : > { %v4467_v15 = vpop.f32.mrf.mxu0 }
 0x163   : > { %v4469_v16 = vpop.f32.mrf.mxu0 }
 0x164   : > { %856 = vrot.lane.b32.xlu1 %v4469_v16, %s4104_s15 }
 0x165   : > { %v4473_v17 = vpop.f32.mrf.mxu0 }
 0x167   : > { %v4475_v18 = vpop.f32.mrf.mxu0 }
 0x168   : > { %858 = vrot.lane.b32.xlu0 %v4475_v18, %s4104_s15 }
 0x169   : > { %v4479_v19 = vpop.f32.mrf.mxu0 }
 0x16b   : > { %v4481_v20 = vpop.f32.mrf.mxu0 }
 0x16c   : > { %860 = vrot.lane.b32.xlu1 %v4481_v20, %s4104_s15 }
 0x16d   : > { %v4485_v21 = vpop.f32.mrf.mxu0 }
 0x16f   : > { %v4487_v22 = vpop.f32.mrf.mxu0 }
 0x170   : > { %862 = vrot.lane.b32.xlu0 %v4487_v22, %s4104_s15 }
 0x171   : > { %v4491_v23 = vpop.f32.mrf.mxu0 }
 0x173   : > { %v4493_v24 = vpop.f32.mrf.mxu0 }
 0x174   : > { %864 = vrot.lane.b32.xlu1 %v4493_v24, %s4104_s15 }
 0x175   : > { %v4497_v25 = vpop.f32.mrf.mxu0 }
 0x177   : > { %v4499_v26 = vpop.f32.mrf.mxu0 }
 0x178   : > { %866 = vrot.lane.b32.xlu0 %v4499_v26, %s4104_s15 }
 0x179   : > { %v4503_v27 = vpop.f32.mrf.mxu0 }
 0x17b   : > { %v4505_v28 = vpop.f32.mrf.mxu0 }
 0x17c   : > { %868 = vrot.lane.b32.xlu1 %v4505_v28, %s4104_s15 }
 0x17d   : > { %v4509_v29 = vpop.f32.mrf.mxu0 }
 0x17f   : > { %v4511_v30 = vpop.f32.mrf.mxu0 }
 0x180   : > { %870 = vrot.lane.b32.xlu0 %v4511_v30, %s4104_s15 }
 0x181   : > { %v4515_v31 = vpop.f32.mrf.mxu0 }
 0x183   : > { %v4517_v32 = vpop.f32.mrf.mxu0 }
 0x184   : > { %872 = vrot.lane.b32.xlu1 %v4517_v32, %s4104_s15 }
 0x185   : > { %v4521_v33 = vpop.f32.mrf.mxu0 }
 0x187   : > { %v4523_v34 = vpop.f32.mrf.mxu0 }
 0x188   : > { %874 = vrot.lane.b32.xlu0 %v4523_v34, %s4104_s15 }
 0x189   : > { %v4527_v35 = vpop.f32.mrf.mxu0 }
 0x18b   : > { %v4529_v36 = vpop.f32.mrf.mxu0 }
 0x18c   : > { %876 = vrot.lane.b32.xlu1 %v4529_v36, %s4104_s15 }
 0x18d   : > { %v4533_v37 = vpop.f32.mrf.mxu0 }
 0x18f   : > { %v4535_v38 = vpop.f32.mrf.mxu0 }
 0x190   : > { %878 = vrot.lane.b32.xlu0 %v4535_v38, %s4104_s15 }
 0x191   : > { %v4539_v39 = vpop.f32.mrf.mxu0 }
 0x193   : > { %v4541_v40 = vpop.f32.mrf.mxu0 }
 0x194   : > { %880 = vrot.lane.b32.xlu1 %v4541_v40, %s4104_s15 }
 0x195   : > { %v4545_v41 = vpop.f32.mrf.mxu0 }
 0x197   : > { %v4547_v42 = vpop.f32.mrf.mxu0 }
 0x198   : > { %882 = vrot.lane.b32.xlu0 %v4547_v42, %s4104_s15 }
 0x199   : > { %v4551_v43 = vpop.f32.mrf.mxu0 }
 0x19b   : > { %v4553_v44 = vpop.f32.mrf.mxu0 }
 0x19c   : > { %884 = vrot.lane.b32.xlu1 %v4553_v44, %s4104_s15 }
 0x19d   : > { %v4557_v45 = vpop.f32.mrf.mxu0 }
 0x19f   : > { %v4559_v46 = vpop.f32.mrf.mxu0 }
 0x1a0   : > { %886 = vrot.lane.b32.xlu0 %v4559_v46, %s4104_s15 }
 0x1a1   : > { %v4563_v47 = vpop.f32.mrf.mxu0 }
 0x1a3   : > { %v4565_v48 = vpop.f32.mrf.mxu0 }
 0x1a4   : > { %888 = vrot.lane.b32.xlu1 %v4565_v48, %s4104_s15 }
 0x1a5   : > { %v4569_v49 = vpop.f32.mrf.mxu0 }
 0x1a7   : > { %v4571_v50 = vpop.f32.mrf.mxu0 }
 0x1a8   : > { %890 = vrot.lane.b32.xlu0 %v4571_v50, %s4104_s15 }
 0x1a9   : > { %v4575_v51 = vpop.f32.mrf.mxu0 }
 0x1ab   : > { %v4577_v52 = vpop.f32.mrf.mxu0 }
 0x1ac   : > { %6323 = vst [vmem:[#allocation16_spill] sm:$0xff] %v4577_v52  ;;  %892 = vrot.lane.b32.xlu1 %v4577_v52, %s4104_s15  ;;  %v1945_v52 = vld [vmem:[#allocation8 + $0x70] sm:$0xff] }
 0x1ad   : > { %v4581_v53 = vpop.f32.mrf.mxu0 }
 0x1af   : > { %v4583_v54 = vpop.f32.mrf.mxu0 }
 0x1b0   : > { %6324 = vst [vmem:[#allocation17_spill] sm:$0xff] %v4583_v54  ;;  %894 = vrot.lane.b32.xlu0 %v4583_v54, %s4104_s15  ;;  %v1946_v54 = vld [vmem:[#allocation8 + $0x78] sm:$0xff] }
 0x1b1   : > { %v4587_v55 = vpop.f32.mrf.mxu0  ;;  %2059 = vmatprep.subr.mxu0 %v1946_v54 }
 0x1b2   : > { %2060 = vmatpush1.msra.mxu0 %v1945_v52 }
 0x1b3   : > { %v4589_v56 = vpop.f32.mrf.mxu0 }
 0x1b4   : > { %6325 = vst [vmem:[#allocation18_spill] sm:$0xff] %v4589_v56  ;;  %896 = vrot.lane.b32.xlu1 %v4589_v56, %s4104_s15 }
 0x1b5   : > { %v4593_v57 = vpop.f32.mrf.mxu0 }
 0x1b7   : > { %v4595_v58 = vpop.f32.mrf.mxu0 }
 0x1b8   : > { %6326 = vst [vmem:[#allocation19_spill] sm:$0xff] %v4595_v58  ;;  %898 = vrot.lane.b32.xlu0 %v4595_v58, %s4104_s15 }
 0x1b9   : > { %v4599_v59 = vpop.f32.mrf.mxu0 }
 0x1ba   : > { %v843_v61 = vpop.permute.xlu0 %842 }
 0x1bb   : > { %v970_v62 = vadd.f32 %v843_v61, %v4443_v7  ;;  %v4607_v63 = vpop.f32.mrf.mxu0 }
 0x1bc   : > { %6327 = vst [vmem:[#allocation20_spill] sm:$0xff] %v4607_v63  ;;  %900 = vrot.lane.b32.xlu1 %v4607_v63, %s4104_s15  ;;  %v6329_v63 = vmov 0.0  }
 0x1bd   : > { %v1008_v1 = vadd.f32 %v4604_v60, %v970_v62  ;;  %v4612_v3 = vpop.f32.mrf.mxu0 }
 0x1be   : > { %6328 = vst [vmem:[#allocation21_spill] sm:$0xff] %v4612_v3  ;;  %v845_v5 = vpop.permute.xlu0 %844 }
 0x1bf   : > { %v1040_v0 = vmax.f32 %v1008_v1, 0.0  ;;  %v971_v58 = vadd.f32 %v845_v5, %v4449_v9  ;;  %v799_v56 = vpop.f32.mrf.mxu0 }
 0x1c0   : > { %902 = vrot.lane.b32.xlu0 %v799_v56, %s4104_s15 }
 0x1c1   : > { %v1009_v7 = vadd.f32 %v4604_v60, %v971_v58  ;;  %v4617_v61 = vpop.f32.mrf.mxu0  ;;  %3655 = vmatmul.mubr.msk.f32.vlgmr.msra.gmra.mxu1 %vm458_vm0, %v1040_v0 }
 0x1c2   : > { %v847_v62 = vpop.permute.xlu1 %846  ;;  %1255 = vmatprep.mubr.f32.mxu1 %v6329_v63 }
 0x1c3   : > { %v1041_v3 = vmax.f32 %v1009_v7, 0.0  ;;  %v940_v1 = vadd.f32 %v847_v62, %v4431_v2  ;;  %v805_v9 = vpop.f32.mrf.mxu0 }
 0x1c4   : > { %904 = vrot.lane.b32.xlu1 %v805_v9, %s4104_s15 }
 0x1c5   : > { %v972_v5 = vadd.f32 %v940_v1, %v4455_v11  ;;  %3656 = vmatmul.mubr.msk.f32.gmra.mxu1 %vm458_vm0, %v1041_v3 }
 0x1c6   : > { %v849_v54 = vpop.permute.xlu1 %848  ;;  %1261 = vmatprep.mubr.f32.mxu1 %v6329_v63 }
 0x1c7   : > { %v1010_v56 = vadd.f32 %v4604_v60, %v972_v5  ;;  %v941_v0 = vadd.f32 %v849_v54, %v4435_v4 }
 0x1c9   : > { %v1042_v52 = vmax.f32 %v1010_v56, 0.0  ;;  %v973_v58 = vadd.f32 %v941_v0, %v4461_v13 }
 0x1ca   : > { %v851_v7 = vpop.permute.xlu0 %850 }
 0x1cb   : > { %v1011_v2 = vadd.f32 %v4604_v60, %v973_v58  ;;  %v942_v62 = vadd.f32 %v851_v7, %v4439_v6  ;;  %3657 = vmatmul.mubr.msk.f32.gmra.mxu1 %vm458_vm0, %v1042_v52 }
 0x1cc   : > { %1267 = vmatprep.mubr.f32.mxu1 %v6329_v63 }
 0x1cd   : > { %v1043_v11 = vmax.f32 %v1011_v2, 0.0  ;;  %v974_v3 = vadd.f32 %v942_v62, %v4467_v15 }
 0x1ce   : > { %v853_v1 = vpop.permute.xlu1 %852 }
 0x1cf   : > { %v1012_v9 = vadd.f32 %v4604_v60, %v974_v3  ;;  %v943_v4 = vadd.f32 %v853_v1, %v4445_v8  ;;  %3658 = vmatmul.mubr.msk.f32.gmra.mxu1 %vm458_vm0, %v1043_v11 }
 0x1d0   : > { %1273 = vmatprep.mubr.f32.mxu1 %v6329_v63 }
 0x1d1   : > { %v1044_v13 = vmax.f32 %v1012_v9, 0.0  ;;  %v975_v5 = vadd.f32 %v943_v4, %v4473_v17 }
 0x1d2   : > { %v855_v6 = vpop.permute.xlu0 %854 }
 0x1d3   : > { %v1013_v54 = vadd.f32 %v4604_v60, %v975_v5  ;;  %v944_v56 = vadd.f32 %v855_v6, %v4451_v10  ;;  %3659 = vmatmul.mubr.msk.f32.gmra.mxu1 %vm458_vm0, %v1044_v13 }
 0x1d4   : > { %1279 = vmatprep.mubr.f32.mxu1 %v6329_v63 }
 0x1d5   : > { %v1045_v15 = vmax.f32 %v1013_v54, 0.0  ;;  %v976_v0 = vadd.f32 %v944_v56, %v4479_v19 }
 0x1d6   : > { %v857_v8 = vpop.permute.xlu1 %856 }
 0x1d7   : > { %v1014_v52 = vadd.f32 %v4604_v60, %v976_v0  ;;  %v945_v58 = vadd.f32 %v857_v8, %v4457_v12  ;;  %3660 = vmatmul.mubr.msk.f32.gmra.mxu1 %vm458_vm0, %v1045_v15 }
 0x1d8   : > { %1285 = vmatprep.mubr.f32.mxu1 %v6329_v63 }
 0x1d9   : > { %v1046_v17 = vmax.f32 %v1014_v52, 0.0  ;;  %v977_v7 = vadd.f32 %v945_v58, %v4485_v21 }
 0x1da   : > { %v859_v10 = vpop.permute.xlu0 %858 }
 0x1db   : > { %v1015_v2 = vadd.f32 %v4604_v60, %v977_v7  ;;  %v946_v62 = vadd.f32 %v859_v10, %v4463_v14  ;;  %3661 = vmatmul.mubr.msk.f32.gmra.mxu1 %vm458_vm0, %v1046_v17 }
 0x1dc   : > { %1291 = vmatprep.mubr.f32.mxu1 %v6329_v63 }
 0x1dd   : > { %v1047_v19 = vmax.f32 %v1015_v2, 0.0  ;;  %v978_v11 = vadd.f32 %v946_v62, %v4491_v23 }
 0x1de   : > { %v861_v12 = vpop.permute.xlu1 %860 }
 0x1df   : > { %v1016_v3 = vadd.f32 %v4604_v60, %v978_v11  ;;  %v947_v1 = vadd.f32 %v861_v12, %v4469_v16  ;;  %3662 = vmatmul.mubr.msk.f32.gmra.mxu1 %vm458_vm0, %v1047_v19 }
 0x1e0   : > { %1297 = vmatprep.mubr.f32.mxu1 %v6329_v63 }
 0x1e1   : > { %v1048_v21 = vmax.f32 %v1016_v3, 0.0  ;;  %v979_v9 = vadd.f32 %v947_v1, %v4497_v25 }
 0x1e2   : > { %v863_v14 = vpop.permute.xlu0 %862 }
 0x1e3   : > { %v1017_v4 = vadd.f32 %v4604_v60, %v979_v9  ;;  %v948_v13 = vadd.f32 %v863_v14, %v4475_v18  ;;  %3663 = vmatmul.mubr.msk.f32.gmra.mxu1 %vm458_vm0, %v1048_v21 }
 0x1e4   : > { %1303 = vmatprep.mubr.f32.mxu1 %v6329_v63 }
 0x1e5   : > { %v1049_v23 = vmax.f32 %v1017_v4, 0.0  ;;  %v980_v5 = vadd.f32 %v948_v13, %v4503_v27 }
 0x1e6   : > { %v865_v16 = vpop.permute.xlu1 %864 }
 0x1e7   : > { %v1018_v6 = vadd.f32 %v4604_v60, %v980_v5  ;;  %v949_v54 = vadd.f32 %v865_v16, %v4481_v20  ;;  %3664 = vmatmul.mubr.msk.f32.gmra.mxu1 %vm458_vm0, %v1049_v23 }
 0x1e8   : > { %1309 = vmatprep.mubr.f32.mxu1 %v6329_v63 }
 0x1e9   : > { %v1050_v25 = vmax.f32 %v1018_v6, 0.0  ;;  %v981_v56 = vadd.f32 %v949_v54, %v4509_v29 }
 0x1ea   : > { %v867_v18 = vpop.permute.xlu0 %866 }
 0x1eb   : > { %v1019_v15 = vadd.f32 %v4604_v60, %v981_v56  ;;  %v950_v0 = vadd.f32 %v867_v18, %v4487_v22  ;;  %3665 = vmatmul.mubr.msk.f32.gmra.mxu1 %vm458_vm0, %v1050_v25  ;;  %v1944_v18 = vld [vmem:[#allocation8 + $0x68] sm:$0xff] }
 0x1ec   : > { %1315 = vmatprep.mubr.f32.mxu1 %v6329_v63  ;;  %2061 = vmatprep.subr.mxu0 %v1944_v18  ;;  %v6335_v18 = vld [vmem:[#allocation20_spill] sm:$0xff] }
 0x1ed   : > { %v1051_v27 = vmax.f32 %v1019_v15, 0.0  ;;  %v982_v8 = vadd.f32 %v950_v0, %v4515_v31 }
 0x1ee   : > { %v869_v20 = vpop.permute.xlu1 %868 }
 0x1ef   : > { %v1020_v52 = vadd.f32 %v4604_v60, %v982_v8  ;;  %v951_v58 = vadd.f32 %v869_v20, %v4493_v24  ;;  %3666 = vmatmul.mubr.msk.f32.gmra.mxu1 %vm458_vm0, %v1051_v27 }
 0x1f0   : > { %1321 = vmatprep.mubr.f32.mxu1 %v6329_v63 }
 0x1f1   : > { %v1052_v29 = vmax.f32 %v1020_v52, 0.0  ;;  %v983_v17 = vadd.f32 %v951_v58, %v4521_v33 }
 0x1f2   : > { %v871_v22 = vpop.permute.xlu0 %870 }
 0x1f3   : > { %v1021_v7 = vadd.f32 %v4604_v60, %v983_v17  ;;  %v952_v10 = vadd.f32 %v871_v22, %v4499_v26  ;;  %3667 = vmatmul.mubr.msk.f32.gmra.mxu1 %vm458_vm0, %v1052_v29 }
 0x1f4   : > { %1327 = vmatprep.mubr.f32.mxu1 %v6329_v63 }
 0x1f5   : > { %v1053_v31 = vmax.f32 %v1021_v7, 0.0  ;;  %v984_v2 = vadd.f32 %v952_v10, %v4527_v35 }
 0x1f6   : > { %v873_v24 = vpop.permute.xlu1 %872 }
 0x1f7   : > { %v1022_v62 = vadd.f32 %v4604_v60, %v984_v2  ;;  %v953_v19 = vadd.f32 %v873_v24, %v4505_v28  ;;  %3668 = vmatmul.mubr.msk.f32.gmra.mxu1 %vm458_vm0, %v1053_v31  ;;  %v1942_v2 = vld [vmem:[#allocation8 + $0x58] sm:$0xff] }
 0x1f8   : > { %1333 = vmatprep.mubr.f32.mxu1 %v6329_v63 }
 0x1f9   : > { %v1054_v33 = vmax.f32 %v1022_v62, 0.0  ;;  %v985_v11 = vadd.f32 %v953_v19, %v4533_v37 }
 0x1fa   : > { %v875_v26 = vpop.permute.xlu0 %874 }
 0x1fb   : > { %v1023_v12 = vadd.f32 %v4604_v60, %v985_v11  ;;  %v954_v3 = vadd.f32 %v875_v26, %v4511_v30  ;;  %3669 = vmatmul.mubr.msk.f32.gmra.mxu1 %vm458_vm0, %v1054_v33 }
 0x1fc   : > { %1339 = vmatprep.mubr.f32.mxu1 %v6329_v63 }
 0x1fd   : > { %v1055_v35 = vmax.f32 %v1023_v12, 0.0  ;;  %v986_v1 = vadd.f32 %v954_v3, %v4539_v39 }
 0x1fe   : > { %v877_v28 = vpop.permute.xlu1 %876 }
 0x1ff   : > { %v1024_v21 = vadd.f32 %v4604_v60, %v986_v1  ;;  %v955_v9 = vadd.f32 %v877_v28, %v4517_v32  ;;  %3670 = vmatmul.mubr.msk.f32.gmra.mxu1 %vm458_vm0, %v1055_v35  ;;  %v6330_v35 = vld [vmem:[#allocation16_spill] sm:$0xff]  ;;  %v6331_v28 = vld [vmem:[#allocation21_spill] sm:$0xff] }
 0x200   : > { %1345 = vmatprep.mubr.f32.mxu1 %v6329_v63 }
 0x201   : > { %v1056_v37 = vmax.f32 %v1024_v21, 0.0  ;;  %v987_v14 = vadd.f32 %v955_v9, %v4545_v41 }
 0x202   : > { %v879_v30 = vpop.permute.xlu0 %878 }
 0x203   : > { %v1025_v4 = vadd.f32 %v4604_v60, %v987_v14  ;;  %v956_v13 = vadd.f32 %v879_v30, %v4523_v34  ;;  %3671 = vmatmul.mubr.msk.f32.gmra.mxu1 %vm458_vm0, %v1056_v37  ;;  %v6332_v37 = vld [vmem:[#allocation17_spill] sm:$0xff] }
 0x204   : > { %1351 = vmatprep.mubr.f32.mxu1 %v6329_v63 }
 0x205   : > { %v1057_v39 = vmax.f32 %v1025_v4, 0.0  ;;  %v988_v23 = vadd.f32 %v956_v13, %v4551_v43  ;;  %v1940_v13 = vld [vmem:[#allocation8 + $0x48] sm:$0xff] }
 0x206   : > { %v881_v32 = vpop.permute.xlu1 %880 }
 0x207   : > { %v1026_v5 = vadd.f32 %v4604_v60, %v988_v23  ;;  %v957_v16 = vadd.f32 %v881_v32, %v4529_v36  ;;  %3672 = vmatmul.mubr.msk.f32.gmra.mxu1 %vm458_vm0, %v1057_v39  ;;  %v6333_v23 = vld [vmem:[#allocation18_spill] sm:$0xff] }
 0x208   : > { %1357 = vmatprep.mubr.f32.mxu1 %v6329_v63 }
 0x209   : > { %v1058_v41 = vmax.f32 %v1026_v5, 0.0  ;;  %v989_v6 = vadd.f32 %v957_v16, %v4557_v45  ;;  %v1943_v45 = vld [vmem:[#allocation8 + $0x60] sm:$0xff]  ;;  %v807_v5 = vpop.f32.mrf.mxu0 }
 0x20a   : > { %v883_v34 = vpop.permute.xlu0 %882  ;;  %2062 = vmatpush1.msra.mxu0 %v1943_v45  ;;  %v1939_v16 = vld [vmem:[#allocation8 + $0x40] sm:$0xff] }
 0x20b   : > { %v1027_v54 = vadd.f32 %v4604_v60, %v989_v6  ;;  %v958_v25 = vadd.f32 %v883_v34, %v4535_v38  ;;  %3673 = vmatmul.mubr.msk.f32.gmra.mxu1 %vm458_vm0, %v1058_v41  ;;  %2063 = vmatprep.subr.mxu0 %v1942_v2 }
 0x20c   : > { %1363 = vmatprep.mubr.f32.mxu1 %v6329_v63 }
 0x20d   : > { %v1059_v43 = vmax.f32 %v1027_v54, 0.0  ;;  %v990_v56 = vadd.f32 %v958_v25, %v4563_v47 }
 0x20e   : > { %v885_v36 = vpop.permute.xlu1 %884 }
 0x20f   : > { %v1028_v15 = vadd.f32 %v4604_v60, %v990_v56  ;;  %v959_v0 = vadd.f32 %v885_v36, %v4541_v40  ;;  %3674 = vmatmul.mubr.msk.f32.gmra.mxu1 %vm458_vm0, %v1059_v43 }
 0x210   : > { %1369 = vmatprep.mubr.f32.mxu1 %v6329_v63 }
 0x211   : > { %v1060_v38 = vmax.f32 %v1028_v15, 0.0  ;;  %v991_v27 = vadd.f32 %v959_v0, %v4569_v49 }
 0x212   : > { %v887_v8 = vpop.permute.xlu0 %886 }
 0x213   : > { %v1029_v20 = vadd.f32 %v4604_v60, %v991_v27  ;;  %v960_v47 = vadd.f32 %v887_v8, %v4547_v42  ;;  %3675 = vmatmul.mubr.msk.f32.gmra.mxu1 %vm458_vm0, %v1060_v38  ;;  %v1938_v27 = vld [vmem:[#allocation8 + $0x38] sm:$0xff]  ;;  %v1937_v8 = vld [vmem:[#allocation8 + $0x30] sm:$0xff] }
 0x214   : > { %1375 = vmatprep.mubr.f32.mxu1 %v6329_v63 }
 0x215   : > { %v1061_v40 = vmax.f32 %v1029_v20, 0.0  ;;  %v992_v52 = vadd.f32 %v960_v47, %v4575_v51  ;;  %v1936_v20 = vld [vmem:[#allocation8 + $0x28] sm:$0xff]  ;;  %v1935_v47 = vld [vmem:[#allocation8 + $0x20] sm:$0xff] }
 0x216   : > { %v889_v58 = vpop.permute.xlu1 %888 }
 0x217   : > { %v1030_v29 = vadd.f32 %v4604_v60, %v992_v52  ;;  %v961_v17 = vadd.f32 %v889_v58, %v4553_v44  ;;  %3676 = vmatmul.mubr.msk.f32.gmra.mxu1 %vm458_vm0, %v1061_v40  ;;  %v1934_v40 = vld [vmem:[#allocation8 + $0x18] sm:$0xff]  ;;  %v1932_v52 = vld [vmem:[#allocation8 + $0x8] sm:$0xff]  ;;  %v1931_v58 = vld [vmem:[#allocation8] sm:$0xff] }
 0x218   : > { %1381 = vmatprep.mubr.f32.mxu1 %v6329_v63 }
 0x219   : > { %v1062_v49 = vmax.f32 %v1030_v29, 0.0  ;;  %v993_v22 = vadd.f32 %v961_v17, %v4581_v53  ;;  %v1941_v53 = vld [vmem:[#allocation8 + $0x50] sm:$0xff] }
 0x21a   : > { %v891_v42 = vpop.permute.xlu0 %890  ;;  %2064 = vmatpush1.msra.mxu0 %v1941_v53 }
 0x21b   : > { %v1031_v7 = vadd.f32 %v4604_v60, %v993_v22  ;;  %v962_v10 = vadd.f32 %v891_v42, %v4559_v46  ;;  %3677 = vmatmul.mubr.msk.f32.gmra.mxu1 %vm458_vm0, %v1062_v49  ;;  %2065 = vmatprep.subr.mxu0 %v1940_v13 }
 0x21c   : > { %1387 = vmatprep.mubr.f32.mxu1 %v6329_v63  ;;  %2066 = vmatpush1.msra.mxu0 %v1939_v16 }
 0x21d   : > { %v1063_v51 = vmax.f32 %v1031_v7, 0.0  ;;  %v994_v31 = vadd.f32 %v962_v10, %v4587_v55  ;;  %2067 = vmatprep.subr.mxu0 %v1938_v27 }
 0x21e   : > { %v893_v44 = vpop.permute.xlu1 %892  ;;  %2068 = vmatpush1.msra.mxu0 %v1937_v8 }
 0x21f   : > { %v1032_v24 = vadd.f32 %v4604_v60, %v994_v31  ;;  %v963_v62 = vadd.f32 %v893_v44, %v4565_v48  ;;  %3678 = vmatmul.mubr.msk.f32.gmra.mxu1 %vm458_vm0, %v1063_v51  ;;  %2069 = vmatprep.subr.mxu0 %v1936_v20 }
 0x220   : > { %1393 = vmatprep.mubr.f32.mxu1 %v6329_v63  ;;  %2070 = vmatpush1.msra.mxu0 %v1935_v47 }
 0x221   : > { %v1064_v46 = vmax.f32 %v1032_v24, 0.0  ;;  %v995_v19 = vadd.f32 %v963_v62, %v4593_v57  ;;  %2071 = vmatprep.subr.mxu0 %v1934_v40 }
 0x222   : > { %v895_v33 = vpop.permute.xlu0 %894 }
 0x223   : > { %v1033_v11 = vadd.f32 %v4604_v60, %v995_v19  ;;  %v964_v55 = vadd.f32 %v895_v33, %v4571_v50  ;;  %3679 = vmatmul.mubr.msk.f32.gmra.mxu1 %vm458_vm0, %v1064_v46 }
 0x224   : > { %1399 = vmatprep.mubr.f32.mxu1 %v6329_v63 }
 0x225   : > { %v1065_v48 = vmax.f32 %v1033_v11, 0.0  ;;  %v996_v26 = vadd.f32 %v964_v55, %v4599_v59 }
 0x226   : > { %v897_v12 = vpop.permute.xlu1 %896 }
 0x227   : > { %v1034_v3 = vadd.f32 %v4604_v60, %v996_v26  ;;  %v965_v1 = vadd.f32 %v897_v12, %v6330_v35  ;;  %3680 = vmatmul.mubr.msk.f32.gmra.mxu1 %vm458_vm0, %v1065_v48 }
 0x228   : > { %1405 = vmatprep.mubr.f32.mxu1 %v6329_v63 }
 0x229   : > { %v1066_v57 = vmax.f32 %v1034_v3, 0.0  ;;  %v997_v21 = vadd.f32 %v965_v1, %v6331_v28 }
 0x22a   : > { %v899_v50 = vpop.permute.xlu0 %898 }
 0x22b   : > { %v1035_v9 = vadd.f32 %v4604_v60, %v997_v21  ;;  %v966_v14 = vadd.f32 %v899_v50, %v6332_v37  ;;  %3681 = vmatmul.mubr.msk.f32.gmra.mxu1 %vm458_vm0, %v1066_v57 }
 0x22c   : > { %1411 = vmatprep.mubr.f32.mxu1 %v6329_v63 }
 0x22d   : > { %v1067_v59 = vmax.f32 %v1035_v9, 0.0  ;;  %v998_v30 = vadd.f32 %v966_v14, %v4617_v61  ;;  %v6334_v61 = vld [vmem:[#allocation19_spill] sm:$0xff] }
 0x22e   : > { %v901_v4 = vpop.permute.xlu1 %900 }
 0x22f   : > { %v1036_v39 = vadd.f32 %v4604_v60, %v998_v30  ;;  %v967_v32 = vadd.f32 %v901_v4, %v6333_v23  ;;  %3682 = vmatmul.mubr.msk.f32.gmra.mxu1 %vm458_vm0, %v1067_v59 }
 0x230   : > { %1417 = vmatprep.mubr.f32.mxu1 %v6329_v63 }
 0x231   : > { %v1068_v41 = vmax.f32 %v1036_v39, 0.0  ;;  %v999_v6 = vadd.f32 %v967_v32, %v807_v5 }
 0x232   : > { %v903_v34 = vpop.permute.xlu0 %902 }
 0x233   : > { %v1037_v54 = vadd.f32 %v4604_v60, %v999_v6  ;;  %v968_v25 = vadd.f32 %v903_v34, %v6334_v61  ;;  %3683 = vmatmul.mubr.msk.f32.gmra.mxu1 %vm458_vm0, %v1068_v41 }
 0x234   : > { %1423 = vmatprep.mubr.f32.mxu1 %v6329_v63 }
 0x235   : > { %v1069_v43 = vmax.f32 %v1037_v54, 0.0  ;;  %v1038_v56 = vadd.f32 %v4604_v60, %v968_v25 }
 0x236   : > { %v905_v36 = vpop.permute.xlu1 %904 }
 0x237   : > { %v969_v15 = vadd.f32 %v905_v36, %v6335_v18  ;;  %3684 = vmatmul.mubr.msk.f32.gmra.mxu1 %vm458_vm0, %v1069_v43  ;;  %v1070_v0 = vmax.f32 %v1038_v56, 0.0 }
 0x238   : > { %1429 = vmatprep.mubr.f32.mxu1 %v6329_v63 }
 0x239   : > { %v1039_v45 = vadd.f32 %v4604_v60, %v969_v15  ;;  %v1933_v60 = vld [vmem:[#allocation8 + $0x10] sm:$0xff] }
 0x23a   : > { %2072 = vmatpush1.msra.mxu0 %v1933_v60 }
 0x23b   : > { %3685 = vmatmul.mubr.msk.f32.gmra.mxu1 %vm458_vm0, %v1070_v0  ;;  %v1071_v38 = vmax.f32 %v1039_v45, 0.0  ;;  %2073 = vmatprep.subr.mxu0 %v1932_v52 }
 0x23c   : > { %1435 = vmatprep.mubr.f32.mxu1 %v6329_v63  ;;  %2074 = vmatpush1.msra.mxu0 %v1931_v58 }
 0x23f   : > { %3686 = vmatmul.mubr.msk.f32.gmra.mxu1 %vm458_vm0, %v1071_v38 }
 0x240   : > { %2735 = vmatprep.mubr.f32.mxu1 %v6329_v63 }
 0x281   : > { %v4771_v29 = vpop.f32.mrf.mxu1 }
 0x282   : > { %1571 = vrot.lane.b32.xlu0 %v4771_v29, %s4104_s15  ;;  %v6258_v22 = vrot.slane %v4771_v29, 7 }
 0x283   : > { %v4775_v17 = vpop.f32.mrf.mxu1 }
 0x285   : > { %v1257_v49 = vpop.f32.mrf.mxu1 }
 0x286   : > { %v1476_v42 = vrot.slane %v1257_v49, 7  ;;  %1573 = vrot.lane.b32.xlu1 %v1257_v49, %s4104_s15 }
 0x287   : > { %v4784_v10 = vpop.f32.mrf.mxu1 }
 0x288   : > { %v4782_v7 = vsel %vm1474_vm1, %v6258_v22, %v1476_v42 }
 0x28b   : > { %v4786_v51 = vpop.f32.mrf.mxu1 }
 0x28c   : > { %1575 = vrot.lane.b32.xlu0 %v4786_v51, %s4104_s15  ;;  %v6256_v2 = vrot.slane %v4786_v51, 7 }
 0x28d   : > { %v4790_v31 = vpop.f32.mrf.mxu1 }
 0x28f   : > { %v1269_v44 = vpop.f32.mrf.mxu1 }
 0x290   : > { %v1479_v24 = vrot.slane %v1269_v44, 7  ;;  %1577 = vrot.lane.b32.xlu1 %v1269_v44, %s4104_s15 }
 0x291   : > { %v4794_v62 = vpop.f32.mrf.mxu1 }
 0x292   : > { %v4799_v53 = vsel %vm1474_vm1, %v6256_v2, %v1479_v24 }
 0x293   : > { %v4801_v46 = vpop.f32.mrf.mxu1 }
 0x294   : > { %1579 = vrot.lane.b32.xlu0 %v4801_v46, %s4104_s15  ;;  %v6255_v11 = vrot.slane %v4801_v46, 7 }
 0x295   : > { %v4805_v19 = vpop.f32.mrf.mxu1 }
 0x297   : > { %v1281_v33 = vpop.f32.mrf.mxu1 }
 0x298   : > { %v1482_v55 = vrot.slane %v1281_v33, 7  ;;  %1581 = vrot.lane.b32.xlu1 %v1281_v33, %s4104_s15 }
 0x299   : > { %v4809_v48 = vpop.f32.mrf.mxu1 }
 0x29a   : > { %v4814_v26 = vsel %vm1474_vm1, %v6255_v11, %v1482_v55 }
 0x29b   : > { %v4816_v12 = vpop.f32.mrf.mxu1 }
 0x29c   : > { %1583 = vrot.lane.b32.xlu0 %v4816_v12, %s4104_s15  ;;  %v6253_v1 = vrot.slane %v4816_v12, 7 }
 0x29d   : > { %v4820_v3 = vpop.f32.mrf.mxu1 }
 0x29f   : > { %v1293_v35 = vpop.f32.mrf.mxu1 }
 0x2a0   : > { %v1485_v57 = vrot.slane %v1293_v35, 7  ;;  %1585 = vrot.lane.b32.xlu1 %v1293_v35, %s4104_s15 }
 0x2a1   : > { %v4824_v28 = vpop.f32.mrf.mxu1 }
 0x2a2   : > { %v4829_v21 = vsel %vm1474_vm1, %v6253_v1, %v1485_v57 }
 0x2a3   : > { %v4831_v50 = vpop.f32.mrf.mxu1 }
 0x2a4   : > { %1587 = vrot.lane.b32.xlu0 %v4831_v50, %s4104_s15  ;;  %v6252_v14 = vrot.slane %v4831_v50, 7 }
 0x2a5   : > { %v1301_v9 = vpop.f32.mrf.mxu1 }
 0x2a6   : > { %v1744_v4 = vrot.slane %v1301_v9, 1 }
 0x2a7   : > { %v1305_v37 = vpop.f32.mrf.mxu1 }
 0x2a8   : > { %v1488_v59 = vrot.slane %v1305_v37, 7  ;;  %1589 = vrot.lane.b32.xlu1 %v1305_v37, %s4104_s15 }
 0x2a9   : > { %v4837_v30 = vpop.f32.mrf.mxu1 }
 0x2aa   : > { %v6250_v13 = vrot.slane %v4837_v30, 1  ;;  %v4843_v39 = vsel %vm1474_vm1, %v6252_v14, %v1488_v59 }
 0x2ab   : > { %v4845_v23 = vpop.f32.mrf.mxu1 }
 0x2ac   : > { %1591 = vrot.lane.b32.xlu0 %v4845_v23, %s4104_s15  ;;  %v4852_v32 = vsel %vm1731_vm2, %v1744_v4, %v6250_v13  ;;  %v6249_v41 = vrot.slane %v4845_v23, 7 }
 0x2ad   : > { %v1313_v5 = vpop.f32.mrf.mxu1 }
 0x2ae   : > { %v1747_v54 = vrot.slane %v1313_v5, 1 }
 0x2af   : > { %v1317_v16 = vpop.f32.mrf.mxu1 }
 0x2b0   : > { %v1491_v6 = vrot.slane %v1317_v16, 7  ;;  %1593 = vrot.lane.b32.xlu1 %v1317_v16, %s4104_s15 }
 0x2b1   : > { %v4856_v34 = vpop.f32.mrf.mxu1 }
 0x2b2   : > { %v6247_v61 = vrot.slane %v4856_v34, 1  ;;  %v4862_v25 = vsel %vm1474_vm1, %v6249_v41, %v1491_v6 }
 0x2b3   : > { %v4864_v43 = vpop.f32.mrf.mxu1 }
 0x2b4   : > { %1595 = vrot.lane.b32.xlu0 %v4864_v43, %s4104_s15  ;;  %v4871_v56 = vsel %vm1731_vm2, %v1747_v54, %v6247_v61  ;;  %v6246_v15 = vrot.slane %v4864_v43, 7 }
 0x2b5   : > { %v1325_v36 = vpop.f32.mrf.mxu1 }
 0x2b6   : > { %v1750_v38 = vrot.slane %v1325_v36, 1 }
 0x2b7   : > { %v1329_v18 = vpop.f32.mrf.mxu1 }
 0x2b8   : > { %v1494_v0 = vrot.slane %v1329_v18, 7  ;;  %1597 = vrot.lane.b32.xlu1 %v1329_v18, %s4104_s15 }
 0x2b9   : > { %v4875_v45 = vpop.f32.mrf.mxu1 }
 0x2ba   : > { %v6244_v27 = vrot.slane %v4875_v45, 1  ;;  %v4881_v8 = vsel %vm1474_vm1, %v6246_v15, %v1494_v0 }
 0x2bb   : > { %v4883_v20 = vpop.f32.mrf.mxu1 }
 0x2bc   : > { %1599 = vrot.lane.b32.xlu0 %v4883_v20, %s4104_s15  ;;  %v4890_v47 = vsel %vm1731_vm2, %v1750_v38, %v6244_v27  ;;  %v6243_v52 = vrot.slane %v4883_v20, 7 }
 0x2bd   : > { %v1337_v40 = vpop.f32.mrf.mxu1 }
 0x2be   : > { %v1753_v42 = vrot.slane %v1337_v40, 1 }
 0x2bf   : > { %v1341_v60 = vpop.f32.mrf.mxu1 }
 0x2c0   : > { %v1497_v58 = vrot.slane %v1341_v60, 7  ;;  %1601 = vrot.lane.b32.xlu1 %v1341_v60, %s4104_s15 }
 0x2c1   : > { %v4894_v49 = vpop.f32.mrf.mxu1 }
 0x2c2   : > { %v6241_v44 = vrot.slane %v4894_v49, 1  ;;  %v4900_v24 = vsel %vm1474_vm1, %v6243_v52, %v1497_v58 }
 0x2c3   : > { %v4902_v33 = vpop.f32.mrf.mxu1 }
 0x2c4   : > { %1603 = vrot.lane.b32.xlu0 %v4902_v33, %s4104_s15  ;;  %v4909_v55 = vsel %vm1731_vm2, %v1753_v42, %v6241_v44  ;;  %v6240_v9 = vrot.slane %v4902_v33, 7 }
 0x2c5   : > { %v1349_v35 = vpop.f32.mrf.mxu1 }
 0x2c6   : > { %v1756_v4 = vrot.slane %v1349_v35, 1 }
 0x2c7   : > { %v1353_v57 = vpop.f32.mrf.mxu1 }
 0x2c8   : > { %v1500_v37 = vrot.slane %v1353_v57, 7  ;;  %1605 = vrot.lane.b32.xlu1 %v1353_v57, %s4104_s15 }
 0x2c9   : > { %v4913_v59 = vpop.f32.mrf.mxu1 }
 0x2ca   : > { %v6238_v5 = vrot.slane %v4913_v59, 1  ;;  %v4919_v16 = vsel %vm1474_vm1, %v6240_v9, %v1500_v37 }
 0x2cb   : > { %v4921_v6 = vpop.f32.mrf.mxu1 }
 0x2cc   : > { %1607 = vrot.lane.b32.xlu0 %v4921_v6, %s4104_s15  ;;  %v4928_v54 = vsel %vm1731_vm2, %v1756_v4, %v6238_v5  ;;  %v6239_v0 = vrot.slane %v4921_v6, 7 }
 0x2cd   : > { %v1361_v36 = vpop.f32.mrf.mxu1 }
 0x2ce   : > { %v1759_v60 = vrot.slane %v1361_v36, 1 }
 0x2cf   : > { %v1365_v18 = vpop.f32.mrf.mxu1 }
 0x2d0   : > { %v1503_v38 = vrot.slane %v1365_v18, 7  ;;  %1609 = vrot.lane.b32.xlu1 %v1365_v18, %s4104_s15 }
 0x2d1   : > { %v4932_v40 = vpop.f32.mrf.mxu1 }
 0x2d2   : > { %v6242_v58 = vrot.slane %v4932_v40, 1  ;;  %v4938_v42 = vsel %vm1474_vm1, %v6239_v0, %v1503_v38 }
 0x2d3   : > { %v4940_v35 = vpop.f32.mrf.mxu1 }
 0x2d4   : > { %1611 = vrot.lane.b32.xlu0 %v4940_v35, %s4104_s15  ;;  %v4947_v57 = vsel %vm1731_vm2, %v1759_v60, %v6242_v58  ;;  %v6245_v36 = vrot.slane %v4940_v35, 7 }
 0x2d5   : > { %v1373_v37 = vpop.f32.mrf.mxu1 }
 0x2d6   : > { %v1762_v38 = vrot.slane %v1373_v37, 1 }
 0x2d7   : > { %v1377_v4 = vpop.f32.mrf.mxu1 }
 0x2d8   : > { %v1506_v18 = vrot.slane %v1377_v4, 7  ;;  %1613 = vrot.lane.b32.xlu1 %v1377_v4, %s4104_s15 }
 0x2d9   : > { %v4951_v5 = vpop.f32.mrf.mxu1 }
 0x2da   : > { %v6248_v0 = vrot.slane %v4951_v5, 1  ;;  %v4957_v9 = vsel %vm1474_vm1, %v6245_v36, %v1506_v18 }
 0x2db   : > { %v4959_v44 = vpop.f32.mrf.mxu1 }
 0x2dc   : > { %1615 = vrot.lane.b32.xlu0 %v4959_v44, %s4104_s15  ;;  %v4966_v60 = vsel %vm1731_vm2, %v1762_v38, %v6248_v0  ;;  %v6251_v37 = vrot.slane %v4959_v44, 7 }
 0x2dd   : > { %v1385_v4 = vpop.f32.mrf.mxu1 }
 0x2de   : > { %v1765_v18 = vrot.slane %v1385_v4, 1 }
 0x2df   : > { %v1389_v58 = vpop.f32.mrf.mxu1 }
 0x2e0   : > { %v1509_v52 = vrot.slane %v1389_v58, 7  ;;  %1617 = vrot.lane.b32.xlu1 %v1389_v58, %s4104_s15 }
 0x2e1   : > { %v4970_v27 = vpop.f32.mrf.mxu1 }
 0x2e2   : > { %6336 = vst [vmem:[#allocation16_spill] sm:$0xff] %v4970_v27  ;;  %v6254_v36 = vrot.slane %v4970_v27, 1  ;;  %v4976_v15 = vsel %vm1474_vm1, %v6251_v37, %v1509_v52 }
 0x2e3   : > { %v4978_v61 = vpop.f32.mrf.mxu1 }
 0x2e4   : > { %6337 = vst [vmem:[#allocation21_spill] sm:$0xff] %v4978_v61  ;;  %1619 = vrot.lane.b32.xlu0 %v4978_v61, %s4104_s15  ;;  %v4985_v38 = vsel %vm1731_vm2, %v1765_v18, %v6254_v36  ;;  %v6257_v4 = vrot.slane %v4978_v61, 7 }
 0x2e5   : > { %v1397_v58 = vpop.f32.mrf.mxu1 }
 0x2e6   : > { %v1768_v52 = vrot.slane %v1397_v58, 1 }
 0x2e7   : > { %v1401_v0 = vpop.f32.mrf.mxu1 }
 0x2e8   : > { %v1512_v41 = vrot.slane %v1401_v0, 7  ;;  %1621 = vrot.lane.b32.xlu1 %v1401_v0, %s4104_s15 }
 0x2e9   : > { %v4989_v13 = vpop.f32.mrf.mxu1 }
 0x2ea   : > { %6338 = vst [vmem:[#allocation17_spill] sm:$0xff] %v4989_v13  ;;  %v6260_v37 = vrot.slane %v4989_v13, 1  ;;  %v4995_v14 = vsel %vm1474_vm1, %v6257_v4, %v1512_v41  ;;  %v1733_v41 = vrot.slane %v4784_v10, 1 }
 0x2eb   : > { %6339 = vst [vmem:[#allocation18_spill] sm:$0xff] %v4995_v14  ;;  %v4997_v1 = vpop.f32.mrf.mxu1  ;;  %v6344_v14 = vrot.slane %v4771_v29, 7 }
 0x2ec   : > { %6340 = vst [vmem:[#allocation19_spill] sm:$0xff] %v4997_v1  ;;  %1623 = vrot.lane.b32.xlu0 %v4997_v1, %s4104_s15  ;;  %v5004_v18 = vsel %vm1731_vm2, %v1768_v52, %v6260_v37  ;;  %v6261_v58 = vrot.slane %v4997_v1, 7  ;;  %v1732_v37 = vrot.slane %v4775_v17, 1 }
 0x2ed   : > { %6341 = vst [vmem:[#allocation20_spill] sm:$0xff] %v5004_v18  ;;  %v1409_v0 = vpop.f32.mrf.mxu1 }
 0x2ee   : > { %v1771_v4 = vrot.slane %v1409_v0, 1  ;;  %v1734_v29 = vsel %vm1731_vm2, %v1732_v37, %v1733_v41 }
 0x2ef   : > { %v1413_v36 = vpop.f32.mrf.mxu1 }
 0x2f0   : > { %v1515_v11 = vrot.slane %v1413_v36, 7  ;;  %1625 = vrot.lane.b32.xlu1 %v1413_v36, %s4104_s15  ;;  %v1555_v36 = vsel %vm1474_vm1, 0.0, %v6344_v14 }
 0x2f1   : > { %v5008_v2 = vpop.f32.mrf.mxu1 }
 0x2f2   : > { %6342 = vst [vmem:[#allocation22_spill] sm:$0xff] %v5008_v2  ;;  %v6264_v22 = vrot.slane %v5008_v2, 1  ;;  %v5015_v13 = vsel %vm1474_vm1, %v6261_v58, %v1515_v11  ;;  %v5033_v58 = vld [vmem:[%s6221_s4] ss:$0 sm:$0xff]  ;;  %v1812_v2 = vsel %vm1731_vm2, %v1733_v41, 0.0 }
 0x2f3   : > { %6343 = vst [vmem:[#allocation23_spill] sm:$0xff] %v5015_v13  ;;  %v5017_v52 = vpop.f32.mrf.mxu1 }
 0x2f4   : > { %v1572_v18 = vpop.permute.xlu0 %1571  ;;  %1627 = vrot.lane.b32.xlu0 %v5017_v52, %s4104_s15  ;;  %v5028_v10 = vsel %vm1731_vm2, %v1771_v4, %v6264_v22  ;;  %v6268_v13 = vrot.slane %v5017_v52, 7 }
 0x2f5   : > { %6345 = vst [vmem:[#allocation24_spill] sm:$0xff] %v5028_v10  ;;  %v1667_v0 = vadd.f32 %v1572_v18, %v1555_v36  ;;  %v1421_v11 = vpop.f32.mrf.mxu1 }
 0x2f6   : > { %v1774_v22 = vrot.slane %v1421_v11, 1 }
 0x2f7   : > { %v1828_v17 = vadd.f32 %v1734_v29, %v1667_v0  ;;  %v1425_v14 = vpop.f32.mrf.mxu1 }
 0x2f8   : > { %v1518_v1 = vrot.slane %v1425_v14, 7  ;;  %v1574_v61 = vpop.permute.xlu1 %1573  ;;  %1629 = vrot.lane.b32.xlu1 %v1425_v14, %s4104_s15  ;;  %v2574_v14 = vld [vmem:[#allocation10 + $0x78] sm:$0xff] }
 0x2f9   : > { %v1866_v4 = vadd.f32 %v5033_v58, %v1828_v17  ;;  %v1668_v18 = vadd.f32 %v1574_v61, %v4782_v7  ;;  %v5040_v36 = vpop.f32.mrf.mxu1  ;;  %v2573_v17 = vld [vmem:[#allocation10 + $0x70] sm:$0xff]  ;;  %v1736_v7 = vrot.slane %v4794_v62, 1  ;;  %2687 = vmatprep.subr.mxu1 %v2574_v14  ;;  %v6346_v62 = vrot.slane %v4786_v51, 7 }
 0x2fa   : > { %v6267_v10 = vrot.slane %v5040_v36, 1  ;;  %v5047_v37 = vsel %vm1474_vm1, %v6268_v13, %v1518_v1  ;;  %2688 = vmatpush1.msra.mxu1 %v2573_v17 }
 0x2fb   : > { %v1898_v0 = vmax.f32 %v1866_v4, 0.0  ;;  %v1829_v29 = vadd.f32 %v1812_v2, %v1668_v18  ;;  %v5049_v27 = vpop.f32.mrf.mxu1  ;;  %v1735_v2 = vrot.slane %v4790_v31, 1  ;;  %v1556_v11 = vsel %vm1474_vm1, 0.0, %v6346_v62 }
 0x2fc   : > { %1631 = vrot.lane.b32.xlu0 %v5049_v27, %s4104_s15  ;;  %v5057_v61 = vsel %vm1731_vm2, %v1774_v22, %v6267_v10  ;;  %v6269_v14 = vrot.slane %v5049_v27, 7  ;;  %v1813_v62 = vsel %vm1731_vm2, %v1736_v7, 0.0 }
 0x2fd   : > { %v1867_v1 = vadd.f32 %v5033_v58, %v1829_v29  ;;  %v5060_v41 = vpop.f32.mrf.mxu1  ;;  %3688 = vmatmul.mubr.msk.f32.vlgmr.msra.gmra.mxu0 %vm458_vm0, %v1898_v0  ;;  %v1737_v29 = vsel %vm1731_vm2, %v1735_v2, %v1736_v7  ;;  %v1739_v2 = vrot.slane %v4809_v48, 1 }
 0x2fe   : > { %v1576_v4 = vpop.permute.xlu0 %1575  ;;  %2112 = vmatprep.mubr.f32.mxu0 %v6329_v63 }
 0x2ff   : > { %v1899_v18 = vmax.f32 %v1867_v1, 0.0  ;;  %v1669_v22 = vadd.f32 %v1576_v4, %v1556_v11  ;;  %v1437_v10 = vpop.f32.mrf.mxu1  ;;  %v1738_v4 = vrot.slane %v4805_v19, 1 }
 0x300   : > { %v1521_v13 = vrot.slane %v1437_v10, 7  ;;  %1633 = vrot.lane.b32.xlu1 %v1437_v10, %s4104_s15 }
 0x301   : > { %v1830_v0 = vadd.f32 %v1737_v29, %v1669_v22  ;;  %3689 = vmatmul.mubr.msk.f32.gmra.mxu0 %vm458_vm0, %v1899_v18  ;;  %v6347_v18 = vrot.slane %v4801_v46, 7  ;;  %v1742_v46 = vrot.slane %v4824_v28, 1 }
 0x302   : > { %v1578_v31 = vpop.permute.xlu1 %1577  ;;  %2117 = vmatprep.mubr.f32.mxu0 %v6329_v63  ;;  %v5076_v51 = vsel %vm1474_vm1, %v6269_v14, %v1521_v13 }
 0x303   : > { %v1868_v17 = vadd.f32 %v5033_v58, %v1830_v0  ;;  %v1670_v1 = vadd.f32 %v1578_v31, %v4799_v53  ;;  %v1557_v22 = vsel %vm1474_vm1, 0.0, %v6347_v18  ;;  %v1740_v53 = vsel %vm1731_vm2, %v1738_v4, %v1739_v2 }
 0x305   : > { %v1900_v10 = vmax.f32 %v1868_v17, 0.0  ;;  %v1831_v11 = vadd.f32 %v1813_v62, %v1670_v1  ;;  %v1814_v17 = vsel %vm1731_vm2, %v1739_v2, 0.0 }
 0x306   : > { %v1580_v29 = vpop.permute.xlu0 %1579 }
 0x307   : > { %v1869_v13 = vadd.f32 %v5033_v58, %v1831_v11  ;;  %v1671_v14 = vadd.f32 %v1580_v29, %v1557_v22  ;;  %3690 = vmatmul.mubr.msk.f32.gmra.mxu0 %vm458_vm0, %v1900_v10  ;;  %v1741_v10 = vrot.slane %v4820_v3, 1  ;;  %v6348_v11 = vrot.slane %v4816_v12, 7 }
 0x308   : > { %2122 = vmatprep.mubr.f32.mxu0 %v6329_v63  ;;  %v1815_v12 = vsel %vm1731_vm2, %v1742_v46, 0.0 }
 0x309   : > { %v1901_v48 = vmax.f32 %v1869_v13, 0.0  ;;  %v1832_v7 = vadd.f32 %v1740_v53, %v1671_v14  ;;  %v1558_v14 = vsel %vm1474_vm1, 0.0, %v6348_v11  ;;  %v1743_v28 = vsel %vm1731_vm2, %v1741_v10, %v1742_v46 }
 0x30a   : > { %v1582_v0 = vpop.permute.xlu1 %1581 }
 0x30b   : > { %v1870_v31 = vadd.f32 %v5033_v58, %v1832_v7  ;;  %v1672_v19 = vadd.f32 %v1582_v0, %v4814_v26  ;;  %3691 = vmatmul.mubr.msk.f32.gmra.mxu0 %vm458_vm0, %v1901_v48  ;;  %v6349_v7 = vrot.slane %v4831_v50, 7  ;;  %v6350_v50 = vrot.slane %v4837_v30, 1 }
 0x30c   : > { %2127 = vmatprep.mubr.f32.mxu0 %v6329_v63 }
 0x30d   : > { %v1902_v1 = vmax.f32 %v1870_v31, 0.0  ;;  %v1833_v62 = vadd.f32 %v1814_v17, %v1672_v19  ;;  %v1559_v0 = vsel %vm1474_vm1, 0.0, %v6349_v7  ;;  %v1816_v11 = vsel %vm1731_vm2, %v6350_v50, 0.0 }
 0x30e   : > { %v1584_v4 = vpop.permute.xlu0 %1583 }
 0x30f   : > { %v1871_v18 = vadd.f32 %v5033_v58, %v1833_v62  ;;  %v1673_v26 = vadd.f32 %v1584_v4, %v1558_v14  ;;  %3692 = vmatmul.mubr.msk.f32.gmra.mxu0 %vm458_vm0, %v1902_v1 }
 0x310   : > { %2133 = vmatprep.mubr.f32.mxu0 %v6329_v63 }
 0x311   : > { %v1903_v2 = vmax.f32 %v1871_v18, 0.0  ;;  %v1834_v22 = vadd.f32 %v1743_v28, %v1673_v26  ;;  %v6351_v18 = vrot.slane %v4845_v23, 7  ;;  %v6352_v23 = vrot.slane %v4856_v34, 1 }
 0x312   : > { %v1586_v29 = vpop.permute.xlu1 %1585 }
 0x313   : > { %v1872_v13 = vadd.f32 %v5033_v58, %v1834_v22  ;;  %v1674_v3 = vadd.f32 %v1586_v29, %v4829_v21  ;;  %3693 = vmatmul.mubr.msk.f32.gmra.mxu0 %vm458_vm0, %v1903_v2  ;;  %v1560_v26 = vsel %vm1474_vm1, 0.0, %v6351_v18 }
 0x314   : > { %2139 = vmatprep.mubr.f32.mxu0 %v6329_v63 }
 0x315   : > { %v1904_v53 = vmax.f32 %v1872_v13, 0.0  ;;  %v1835_v48 = vadd.f32 %v1815_v12, %v1674_v3  ;;  %v1817_v3 = vsel %vm1731_vm2, %v6352_v23, 0.0 }
 0x316   : > { %v1588_v31 = vpop.permute.xlu0 %1587 }
 0x317   : > { %v1873_v19 = vadd.f32 %v5033_v58, %v1835_v48  ;;  %v1675_v17 = vadd.f32 %v1588_v31, %v1559_v0  ;;  %3694 = vmatmul.mubr.msk.f32.gmra.mxu0 %vm458_vm0, %v1904_v53  ;;  %v6353_v48 = vrot.slane %v4864_v43, 7  ;;  %v6354_v43 = vrot.slane %v4875_v45, 1 }
 0x318   : > { %2145 = vmatprep.mubr.f32.mxu0 %v6329_v63 }
 0x319   : > { %v1905_v21 = vmax.f32 %v1873_v19, 0.0  ;;  %v1836_v1 = vadd.f32 %v4852_v32, %v1675_v17  ;;  %v1561_v7 = vsel %vm1474_vm1, 0.0, %v6353_v48 }
 0x31a   : > { %v1590_v46 = vpop.permute.xlu1 %1589 }
 0x31b   : > { %v1874_v62 = vadd.f32 %v5033_v58, %v1836_v1  ;;  %v1676_v10 = vadd.f32 %v1590_v46, %v4843_v39  ;;  %3695 = vmatmul.mubr.msk.f32.gmra.mxu0 %vm458_vm0, %v1905_v21  ;;  %v1818_v1 = vsel %vm1731_vm2, %v6354_v43, 0.0 }
 0x31c   : > { %2151 = vmatprep.mubr.f32.mxu0 %v6329_v63 }
 0x31d   : > { %v1906_v14 = vmax.f32 %v1874_v62, 0.0  ;;  %v1837_v4 = vadd.f32 %v1816_v11, %v1676_v10  ;;  %v6355_v10 = vrot.slane %v4883_v20, 7  ;;  %v6356_v20 = vrot.slane %v4894_v49, 1 }
 0x31e   : > { %v1592_v32 = vpop.permute.xlu0 %1591 }
 0x31f   : > { %v1875_v28 = vadd.f32 %v5033_v58, %v1837_v4  ;;  %v1677_v2 = vadd.f32 %v1592_v32, %v1560_v26  ;;  %3696 = vmatmul.mubr.msk.f32.gmra.mxu0 %vm458_vm0, %v1906_v14  ;;  %v1562_v50 = vsel %vm1474_vm1, 0.0, %v6355_v10  ;;  %v1819_v32 = vsel %vm1731_vm2, %v6356_v20, 0.0 }
 0x320   : > { %2157 = vmatprep.mubr.f32.mxu0 %v6329_v63 }
 0x321   : > { %v1907_v39 = vmax.f32 %v1875_v28, 0.0  ;;  %v1838_v30 = vadd.f32 %v4871_v56, %v1677_v2 }
 0x322   : > { %v1594_v22 = vpop.permute.xlu1 %1593 }
 0x323   : > { %v1876_v29 = vadd.f32 %v5033_v58, %v1838_v30  ;;  %v1678_v13 = vadd.f32 %v1594_v22, %v4862_v25  ;;  %3697 = vmatmul.mubr.msk.f32.gmra.mxu0 %vm458_vm0, %v1907_v39  ;;  %v6357_v39 = vrot.slane %v4902_v33, 7  ;;  %v6358_v33 = vrot.slane %v4913_v59, 1 }
 0x324   : > { %2163 = vmatprep.mubr.f32.mxu0 %v6329_v63 }
 0x325   : > { %v1908_v12 = vmax.f32 %v1876_v29, 0.0  ;;  %v1839_v53 = vadd.f32 %v1817_v3, %v1678_v13  ;;  %v1563_v30 = vsel %vm1474_vm1, 0.0, %v6357_v39 }
 0x326   : > { %v1596_v56 = vpop.permute.xlu0 %1595 }
 0x327   : > { %v1877_v0 = vadd.f32 %v5033_v58, %v1839_v53  ;;  %v1679_v31 = vadd.f32 %v1596_v56, %v1561_v7  ;;  %3698 = vmatmul.mubr.msk.f32.gmra.mxu0 %vm458_vm0, %v1908_v12  ;;  %v1820_v12 = vsel %vm1731_vm2, %v6358_v33, 0.0  ;;  %v6359_v7 = vrot.slane %v4921_v6, 7 }
 0x328   : > { %2169 = vmatprep.mubr.f32.mxu0 %v6329_v63  ;;  %v6360_v6 = vrot.slane %v4932_v40, 1 }
 0x329   : > { %v1909_v25 = vmax.f32 %v1877_v0, 0.0  ;;  %v1840_v34 = vadd.f32 %v4890_v47, %v1679_v31  ;;  %v1564_v56 = vsel %vm1474_vm1, 0.0, %v6359_v7 }
 0x32a   : > { %v1598_v19 = vpop.permute.xlu1 %1597 }
 0x32b   : > { %v1878_v17 = vadd.f32 %v5033_v58, %v1840_v34  ;;  %v1680_v21 = vadd.f32 %v1598_v19, %v4881_v8  ;;  %3699 = vmatmul.mubr.msk.f32.gmra.mxu0 %vm458_vm0, %v1909_v25 }
 0x32c   : > { %2175 = vmatprep.mubr.f32.mxu0 %v6329_v63 }
 0x32d   : > { %v1910_v46 = vmax.f32 %v1878_v17, 0.0  ;;  %v1841_v62 = vadd.f32 %v1818_v1, %v1680_v21  ;;  %v1821_v17 = vsel %vm1731_vm2, %v6360_v6, 0.0  ;;  %v6361_v1 = vrot.slane %v4940_v35, 7  ;;  %v6372_v6 = vld [vmem:[#allocation19_spill] sm:$0xff] }
 0x32e   : > { %v1600_v47 = vpop.permute.xlu0 %1599 }
 0x32f   : > { %v1879_v11 = vadd.f32 %v5033_v58, %v1841_v62  ;;  %v1681_v14 = vadd.f32 %v1600_v47, %v1562_v50  ;;  %3700 = vmatmul.mubr.msk.f32.gmra.mxu0 %vm458_vm0, %v1910_v46  ;;  %v1565_v46 = vsel %vm1474_vm1, 0.0, %v6361_v1  ;;  %v2572_v50 = vld [vmem:[#allocation10 + $0x68] sm:$0xff] }
 0x330   : > { %2181 = vmatprep.mubr.f32.mxu0 %v6329_v63  ;;  %2689 = vmatprep.subr.mxu1 %v2572_v50  ;;  %v6375_v50 = vld [vmem:[#allocation23_spill] sm:$0xff] }
 0x331   : > { %v1911_v8 = vmax.f32 %v1879_v11, 0.0  ;;  %v1842_v45 = vadd.f32 %v4909_v55, %v1681_v14  ;;  %v2571_v14 = vld [vmem:[#allocation10 + $0x60] sm:$0xff] }
 0x332   : > { %v1602_v4 = vpop.permute.xlu1 %1601  ;;  %2690 = vmatpush1.msra.mxu1 %v2571_v14 }
 0x333   : > { %v1880_v18 = vadd.f32 %v5033_v58, %v1842_v45  ;;  %v1682_v26 = vadd.f32 %v1602_v4, %v4900_v24  ;;  %3701 = vmatmul.mubr.msk.f32.gmra.mxu0 %vm458_vm0, %v1911_v8  ;;  %v6362_v8 = vrot.slane %v4951_v5, 1 }
 0x334   : > { %2187 = vmatprep.mubr.f32.mxu0 %v6329_v63 }
 0x335   : > { %v1912_v28 = vmax.f32 %v1880_v18, 0.0  ;;  %v1843_v2 = vadd.f32 %v1819_v32, %v1682_v26  ;;  %v1822_v45 = vsel %vm1731_vm2, %v6362_v8, 0.0 }
 0x336   : > { %v1604_v55 = vpop.permute.xlu0 %1603 }
 0x337   : > { %v1881_v22 = vadd.f32 %v5033_v58, %v1843_v2  ;;  %v1683_v29 = vadd.f32 %v1604_v55, %v1563_v30  ;;  %3702 = vmatmul.mubr.msk.f32.gmra.mxu0 %vm458_vm0, %v1912_v28 }
 0x338   : > { %2193 = vmatprep.mubr.f32.mxu0 %v6329_v63 }
 0x339   : > { %v1913_v24 = vmax.f32 %v1881_v22, 0.0  ;;  %v1844_v49 = vadd.f32 %v4928_v54, %v1683_v29 }
 0x33a   : > { %v1606_v13 = vpop.permute.xlu1 %1605 }
 0x33b   : > { %v1882_v23 = vadd.f32 %v5033_v58, %v1844_v49  ;;  %v1684_v3 = vadd.f32 %v1606_v13, %v4919_v16  ;;  %3703 = vmatmul.mubr.msk.f32.gmra.mxu0 %vm458_vm0, %v1913_v24  ;;  %v6366_v49 = vld [vmem:[#allocation21_spill] sm:$0xff] }
 0x33c   : > { %2199 = vmatprep.mubr.f32.mxu0 %v6329_v63  ;;  %v6367_v13 = vrot.slane %v6366_v49, 7 }
 0x33d   : > { %v1914_v53 = vmax.f32 %v1882_v23, 0.0  ;;  %v1845_v48 = vadd.f32 %v1820_v12, %v1684_v3  ;;  %v6368_v12 = vld [vmem:[#allocation20_spill] sm:$0xff] }
 0x33e   : > { %v1608_v54 = vpop.permute.xlu0 %1607  ;;  %v1567_v23 = vsel %vm1474_vm1, 0.0, %v6367_v13  ;;  %v6380_v13 = vrot.slane %v5049_v27, 7 }
 0x33f   : > { %v1883_v0 = vadd.f32 %v5033_v58, %v1845_v48  ;;  %v1685_v31 = vadd.f32 %v1608_v54, %v1564_v56  ;;  %3704 = vmatmul.mubr.msk.f32.gmra.mxu0 %vm458_vm0, %v1914_v53  ;;  %v2570_v48 = vld [vmem:[#allocation10 + $0x58] sm:$0xff]  ;;  %v6369_v54 = vld [vmem:[#allocation18_spill] sm:$0xff] }
 0x340   : > { %2205 = vmatprep.mubr.f32.mxu0 %v6329_v63  ;;  %2691 = vmatprep.subr.mxu1 %v2570_v48 }
 0x341   : > { %v1915_v16 = vmax.f32 %v1883_v0, 0.0  ;;  %v1846_v59 = vadd.f32 %v4947_v57, %v1685_v31  ;;  %v2569_v31 = vld [vmem:[#allocation10 + $0x50] sm:$0xff] }
 0x342   : > { %v1610_v25 = vpop.permute.xlu1 %1609  ;;  %2692 = vmatpush1.msra.mxu1 %v2569_v31  ;;  %v2563_v31 = vld [vmem:[#allocation10 + $0x20] sm:$0xff] }
 0x343   : > { %v1884_v34 = vadd.f32 %v5033_v58, %v1846_v59  ;;  %v1686_v19 = vadd.f32 %v1610_v25, %v4938_v42  ;;  %3705 = vmatmul.mubr.msk.f32.gmra.mxu0 %vm458_vm0, %v1915_v16  ;;  %v6370_v16 = vld [vmem:[#allocation17_spill] sm:$0xff] }
 0x344   : > { %2211 = vmatprep.mubr.f32.mxu0 %v6329_v63  ;;  %v6371_v59 = vrot.slane %v6370_v16, 1  ;;  %v2562_v16 = vld [vmem:[#allocation10 + $0x18] sm:$0xff] }
 0x345   : > { %v1916_v21 = vmax.f32 %v1884_v34, 0.0  ;;  %v1847_v43 = vadd.f32 %v1821_v17, %v1686_v19  ;;  %v6373_v17 = vrot.slane %v6372_v6, 7 }
 0x346   : > { %v1612_v57 = vpop.permute.xlu0 %1611  ;;  %v1824_v25 = vsel %vm1731_vm2, %v6371_v59, 0.0  ;;  %v2561_v59 = vld [vmem:[#allocation10 + $0x10] sm:$0xff] }
 0x347   : > { %v1885_v62 = vadd.f32 %v5033_v58, %v1847_v43  ;;  %v1687_v10 = vadd.f32 %v1612_v57, %v1565_v46  ;;  %3706 = vmatmul.mubr.msk.f32.gmra.mxu0 %vm458_vm0, %v1916_v21  ;;  %v1568_v21 = vsel %vm1474_vm1, 0.0, %v6373_v17 }
 0x348   : > { %2217 = vmatprep.mubr.f32.mxu0 %v6329_v63 }
 0x349   : > { %v1917_v42 = vmax.f32 %v1885_v62, 0.0  ;;  %v1848_v40 = vadd.f32 %v4966_v60, %v1687_v10  ;;  %v6363_v60 = vrot.slane %v4959_v44, 7  ;;  %v6364_v44 = vld [vmem:[#allocation16_spill] sm:$0xff] }
 0x34a   : > { %v1614_v47 = vpop.permute.xlu1 %1613  ;;  %v6365_v55 = vrot.slane %v6364_v44, 1  ;;  %v6374_v62 = vld [vmem:[#allocation24_spill] sm:$0xff]  ;;  %v6379_v44 = vrot.slane %v5040_v36, 1 }
 0x34b   : > { %v1886_v11 = vadd.f32 %v5033_v58, %v1848_v40  ;;  %v1688_v35 = vadd.f32 %v1614_v47, %v4957_v9  ;;  %3707 = vmatmul.mubr.msk.f32.gmra.mxu0 %vm458_vm0, %v1917_v42  ;;  %v1566_v26 = vsel %vm1474_vm1, 0.0, %v6363_v60 }
 0x34c   : > { %2223 = vmatprep.mubr.f32.mxu0 %v6329_v63  ;;  %v1823_v22 = vsel %vm1731_vm2, %v6365_v55, 0.0  ;;  %v1826_v55 = vsel %vm1731_vm2, %v6379_v44, 0.0 }
 0x34d   : > { %v1918_v4 = vmax.f32 %v1886_v11, 0.0  ;;  %v1849_v18 = vadd.f32 %v1822_v45, %v1688_v35  ;;  %v6376_v11 = vld [vmem:[#allocation22_spill] sm:$0xff] }
 0x34e   : > { %v1616_v20 = vpop.permute.xlu0 %1615  ;;  %v6377_v35 = vrot.slane %v6376_v11, 1 }
 0x34f   : > { %v1887_v32 = vadd.f32 %v5033_v58, %v1849_v18  ;;  %v1689_v9 = vadd.f32 %v1616_v20, %v1566_v26  ;;  %3708 = vmatmul.mubr.msk.f32.gmra.mxu0 %vm458_vm0, %v1918_v4  ;;  %v6378_v18 = vrot.slane %v5017_v52, 7 }
 0x350   : > { %2229 = vmatprep.mubr.f32.mxu0 %v6329_v63  ;;  %v1825_v14 = vsel %vm1731_vm2, %v6377_v35, 0.0 }
 0x351   : > { %v1919_v5 = vmax.f32 %v1887_v32, 0.0  ;;  %v1850_v28 = vadd.f32 %v4985_v38, %v1689_v9  ;;  %v1569_v60 = vsel %vm1474_vm1, 0.0, %v6378_v18  ;;  %v1439_v32 = vpop.f32.mrf.mxu1 }
 0x352   : > { %v1618_v2 = vpop.permute.xlu1 %1617 }
 0x353   : > { %v1888_v39 = vadd.f32 %v5033_v58, %v1850_v28  ;;  %v1690_v30 = vadd.f32 %v1618_v2, %v4976_v15  ;;  %3709 = vmatmul.mubr.msk.f32.gmra.mxu0 %vm458_vm0, %v1919_v5  ;;  %v2568_v28 = vld [vmem:[#allocation10 + $0x48] sm:$0xff] }
 0x354   : > { %2235 = vmatprep.mubr.f32.mxu0 %v6329_v63  ;;  %2693 = vmatprep.subr.mxu1 %v2568_v28 }
 0x355   : > { %v1920_v29 = vmax.f32 %v1888_v39, 0.0  ;;  %v1851_v24 = vadd.f32 %v1823_v22, %v1690_v30  ;;  %v2567_v30 = vld [vmem:[#allocation10 + $0x40] sm:$0xff]  ;;  %v1778_v22 = vrot.slane %v1439_v32, 1 }
 0x356   : > { %v1620_v38 = vpop.permute.xlu0 %1619  ;;  %2694 = vmatpush1.msra.mxu1 %v2567_v30 }
 0x357   : > { %v1889_v3 = vadd.f32 %v5033_v58, %v1851_v24  ;;  %v1691_v33 = vadd.f32 %v1620_v38, %v1567_v23  ;;  %3710 = vmatmul.mubr.msk.f32.gmra.mxu0 %vm458_vm0, %v1920_v29  ;;  %v1777_v24 = vrot.slane %v5060_v41, 1  ;;  %v1827_v27 = vsel %vm1731_vm2, %v1778_v22, 0.0 }
 0x358   : > { %2241 = vmatprep.mubr.f32.mxu0 %v6329_v63 }
 0x359   : > { %v1921_v15 = vmax.f32 %v1889_v3, 0.0  ;;  %v1852_v53 = vadd.f32 %v6368_v12, %v1691_v33  ;;  %v1779_v36 = vsel %vm1731_vm2, %v1777_v24, %v1778_v22 }
 0x35a   : > { %v1622_v7 = vpop.permute.xlu1 %1621 }
 0x35b   : > { %v1890_v56 = vadd.f32 %v5033_v58, %v1852_v53  ;;  %v1692_v0 = vadd.f32 %v1622_v7, %v6369_v54  ;;  %3711 = vmatmul.mubr.msk.f32.gmra.mxu0 %vm458_vm0, %v1921_v15  ;;  %v2566_v54 = vld [vmem:[#allocation10 + $0x38] sm:$0xff] }
 0x35c   : > { %2247 = vmatprep.mubr.f32.mxu0 %v6329_v63  ;;  %2695 = vmatprep.subr.mxu1 %v2566_v54 }
 0x35d   : > { %v1922_v34 = vmax.f32 %v1890_v56, 0.0  ;;  %v1853_v19 = vadd.f32 %v1824_v25, %v1692_v0  ;;  %v2564_v0 = vld [vmem:[#allocation10 + $0x28] sm:$0xff]  ;;  %v2559_v25 = vld [vmem:[#allocation10] sm:$0xff] }
 0x35e   : > { %v1624_v43 = vpop.permute.xlu0 %1623 }
 0x35f   : > { %v1891_v1 = vadd.f32 %v5033_v58, %v1853_v19  ;;  %v1693_v46 = vadd.f32 %v1624_v43, %v1568_v21  ;;  %3712 = vmatmul.mubr.msk.f32.gmra.mxu0 %vm458_vm0, %v1922_v34 }
 0x360   : > { %2253 = vmatprep.mubr.f32.mxu0 %v6329_v63 }
 0x361   : > { %v1923_v57 = vmax.f32 %v1891_v1, 0.0  ;;  %v1854_v10 = vadd.f32 %v6374_v62, %v1693_v46 }
 0x362   : > { %v1626_v42 = vpop.permute.xlu1 %1625 }
 0x363   : > { %v1892_v40 = vadd.f32 %v5033_v58, %v1854_v10  ;;  %v1694_v47 = vadd.f32 %v1626_v42, %v6375_v50  ;;  %3713 = vmatmul.mubr.msk.f32.gmra.mxu0 %vm458_vm0, %v1923_v57 }
 0x364   : > { %2259 = vmatprep.mubr.f32.mxu0 %v6329_v63 }
 0x365   : > { %v1924_v8 = vmax.f32 %v1892_v40, 0.0  ;;  %v1855_v45 = vadd.f32 %v1825_v14, %v1694_v47 }
 0x366   : > { %v1628_v4 = vpop.permute.xlu0 %1627 }
 0x367   : > { %v1893_v26 = vadd.f32 %v5033_v58, %v1855_v45  ;;  %v1695_v20 = vadd.f32 %v1628_v4, %v1569_v60  ;;  %3714 = vmatmul.mubr.msk.f32.gmra.mxu0 %vm458_vm0, %v1924_v8 }
 0x368   : > { %2265 = vmatprep.mubr.f32.mxu0 %v6329_v63 }
 0x369   : > { %v1925_v9 = vmax.f32 %v1893_v26, 0.0  ;;  %v1856_v5 = vadd.f32 %v5057_v61, %v1695_v20 }
 0x36a   : > { %v1630_v2 = vpop.permute.xlu1 %1629 }
 0x36b   : > { %v1894_v39 = vadd.f32 %v5033_v58, %v1856_v5  ;;  %v1696_v52 = vadd.f32 %v1630_v2, %v5047_v37  ;;  %3715 = vmatmul.mubr.msk.f32.gmra.mxu0 %vm458_vm0, %v1925_v9  ;;  %v1570_v37 = vsel %vm1474_vm1, 0.0, %v6380_v13 }
 0x36c   : > { %2271 = vmatprep.mubr.f32.mxu0 %v6329_v63 }
 0x36d   : > { %v1926_v29 = vmax.f32 %v1894_v39, 0.0  ;;  %v1857_v61 = vadd.f32 %v1826_v55, %v1696_v52 }
 0x36e   : > { %v1632_v49 = vpop.permute.xlu0 %1631 }
 0x36f   : > { %v1895_v23 = vadd.f32 %v5033_v58, %v1857_v61  ;;  %v1697_v38 = vadd.f32 %v1632_v49, %v1570_v37  ;;  %3716 = vmatmul.mubr.msk.f32.gmra.mxu0 %vm458_vm0, %v1926_v29 }
 0x370   : > { %2277 = vmatprep.mubr.f32.mxu0 %v6329_v63 }
 0x371   : > { %v1927_v3 = vmax.f32 %v1895_v23, 0.0  ;;  %v1858_v33 = vadd.f32 %v1779_v36, %v1697_v38 }
 0x372   : > { %v1634_v15 = vpop.permute.xlu1 %1633 }
 0x373   : > { %v1896_v12 = vadd.f32 %v5033_v58, %v1858_v33  ;;  %v1698_v41 = vadd.f32 %v1634_v15, %v5076_v51  ;;  %3717 = vmatmul.mubr.msk.f32.gmra.mxu0 %vm458_vm0, %v1927_v3  ;;  %v2565_v51 = vld [vmem:[#allocation10 + $0x30] sm:$0xff] }
 0x374   : > { %2283 = vmatprep.mubr.f32.mxu0 %v6329_v63  ;;  %2696 = vmatpush1.msra.mxu1 %v2565_v51 }
 0x375   : > { %v1928_v53 = vmax.f32 %v1896_v12, 0.0  ;;  %v1859_v48 = vadd.f32 %v1827_v27, %v1698_v41  ;;  %2697 = vmatprep.subr.mxu1 %v2564_v0  ;;  %v5444_v0 = vld [vmem:[%s6223_s6] ss:$0 sm:$0xff] }
 0x376   : > { %2698 = vmatpush1.msra.mxu1 %v2563_v31 }
 0x377   : > { %v1897_v7 = vadd.f32 %v5033_v58, %v1859_v48  ;;  %3718 = vmatmul.mubr.msk.f32.gmra.mxu0 %vm458_vm0, %v1928_v53  ;;  %2699 = vmatprep.subr.mxu1 %v2562_v16  ;;  %v2560_v58 = vld [vmem:[#allocation10 + $0x8] sm:$0xff] }
 0x378   : > { %2289 = vmatprep.mubr.f32.mxu0 %v6329_v63  ;;  %2700 = vmatpush1.msra.mxu1 %v2561_v59 }
 0x379   : > { %v1929_v56 = vmax.f32 %v1897_v7, 0.0  ;;  %2701 = vmatprep.subr.mxu1 %v2560_v58 }
 0x37a   : > { %2702 = vmatpush1.msra.mxu1 %v2559_v25 }
 0x37b   : > { %3719 = vmatmul.mubr.msk.f32.gmra.mxu0 %vm458_vm0, %v1929_v56 }
 0x3bd   : > { %v5280_v34 = vpop.f32.mrf.mxu0 }
 0x3be   : > { %2328 = vrot.lane.b32.xlu0 %v5280_v34, %s4104_s15 }
 0x3bf   : > { %v2111_v19 = vpop.f32.mrf.mxu0 }
 0x3c1   : > { %v5284_v6 = vpop.f32.mrf.mxu0 }
 0x3c2   : > { %2330 = vrot.lane.b32.xlu1 %v5284_v6, %s4104_s15 }
 0x3c3   : > { %v2116_v17 = vpop.f32.mrf.mxu0 }
 0x3c7   : > { %v5288_v21 = vpop.f32.mrf.mxu0 }
 0x3c8   : > { %2332 = vrot.lane.b32.xlu0 %v5288_v21, %s4104_s15 }
 0x3c9   : > { %v2121_v43 = vpop.f32.mrf.mxu0 }
 0x3cb   : > { %v5292_v1 = vpop.f32.mrf.mxu0 }
 0x3cc   : > { %2334 = vrot.lane.b32.xlu1 %v5292_v1, %s4104_s15 }
 0x3cd   : > { %v2126_v46 = vpop.f32.mrf.mxu0 }
 0x3cf   : > { %v5296_v57 = vpop.f32.mrf.mxu0 }
 0x3d0   : > { %2336 = vrot.lane.b32.xlu0 %v5296_v57, %s4104_s15 }
 0x3d1   : > { %v5300_v62 = vpop.f32.mrf.mxu0 }
 0x3d3   : > { %v5302_v10 = vpop.f32.mrf.mxu0 }
 0x3d4   : > { %2338 = vrot.lane.b32.xlu1 %v5302_v10, %s4104_s15 }
 0x3d5   : > { %v5306_v42 = vpop.f32.mrf.mxu0 }
 0x3d7   : > { %v5308_v40 = vpop.f32.mrf.mxu0 }
 0x3d8   : > { %2340 = vrot.lane.b32.xlu0 %v5308_v40, %s4104_s15 }
 0x3d9   : > { %v5312_v50 = vpop.f32.mrf.mxu0 }
 0x3db   : > { %v5314_v47 = vpop.f32.mrf.mxu0 }
 0x3dc   : > { %2342 = vrot.lane.b32.xlu1 %v5314_v47, %s4104_s15 }
 0x3dd   : > { %v5318_v11 = vpop.f32.mrf.mxu0 }
 0x3df   : > { %v5320_v35 = vpop.f32.mrf.mxu0 }
 0x3e0   : > { %2344 = vrot.lane.b32.xlu0 %v5320_v35, %s4104_s15 }
 0x3e1   : > { %v5324_v14 = vpop.f32.mrf.mxu0 }
 0x3e3   : > { %v5326_v8 = vpop.f32.mrf.mxu0 }
 0x3e4   : > { %2346 = vrot.lane.b32.xlu1 %v5326_v8, %s4104_s15 }
 0x3e5   : > { %v5330_v45 = vpop.f32.mrf.mxu0 }
 0x3e7   : > { %v5332_v4 = vpop.f32.mrf.mxu0 }
 0x3e8   : > { %2348 = vrot.lane.b32.xlu0 %v5332_v4, %s4104_s15 }
 0x3e9   : > { %v5336_v18 = vpop.f32.mrf.mxu0 }
 0x3eb   : > { %v5338_v60 = vpop.f32.mrf.mxu0 }
 0x3ec   : > { %2350 = vrot.lane.b32.xlu1 %v5338_v60, %s4104_s15 }
 0x3ed   : > { %v5342_v26 = vpop.f32.mrf.mxu0 }
 0x3ef   : > { %v5344_v20 = vpop.f32.mrf.mxu0 }
 0x3f0   : > { %2352 = vrot.lane.b32.xlu0 %v5344_v20, %s4104_s15 }
 0x3f1   : > { %v5348_v32 = vpop.f32.mrf.mxu0 }
 0x3f3   : > { %v5350_v9 = vpop.f32.mrf.mxu0 }
 0x3f4   : > { %2354 = vrot.lane.b32.xlu1 %v5350_v9, %s4104_s15 }
 0x3f5   : > { %v5354_v5 = vpop.f32.mrf.mxu0 }
 0x3f7   : > { %v5356_v28 = vpop.f32.mrf.mxu0 }
 0x3f8   : > { %2356 = vrot.lane.b32.xlu0 %v5356_v28, %s4104_s15 }
 0x3f9   : > { %v5360_v2 = vpop.f32.mrf.mxu0 }
 0x3fb   : > { %v5362_v39 = vpop.f32.mrf.mxu0 }
 0x3fc   : > { %2358 = vrot.lane.b32.xlu1 %v5362_v39, %s4104_s15 }
 0x3fd   : > { %v5366_v52 = vpop.f32.mrf.mxu0 }
 0x3ff   : > { %v5368_v30 = vpop.f32.mrf.mxu0 }
 0x400   : > { %2360 = vrot.lane.b32.xlu0 %v5368_v30, %s4104_s15 }
 0x401   : > { %v5372_v44 = vpop.f32.mrf.mxu0 }
 0x403   : > { %v5374_v55 = vpop.f32.mrf.mxu0 }
 0x404   : > { %2362 = vrot.lane.b32.xlu1 %v5374_v55, %s4104_s15 }
 0x405   : > { %v5378_v22 = vpop.f32.mrf.mxu0 }
 0x407   : > { %v5380_v29 = vpop.f32.mrf.mxu0 }
 0x408   : > { %2364 = vrot.lane.b32.xlu0 %v5380_v29, %s4104_s15 }
 0x409   : > { %v5384_v61 = vpop.f32.mrf.mxu0 }
 0x40b   : > { %v5386_v24 = vpop.f32.mrf.mxu0 }
 0x40c   : > { %2366 = vrot.lane.b32.xlu1 %v5386_v24, %s4104_s15 }
 0x40d   : > { %v5390_v49 = vpop.f32.mrf.mxu0 }
 0x40f   : > { %v5392_v13 = vpop.f32.mrf.mxu0 }
 0x410   : > { %2368 = vrot.lane.b32.xlu0 %v5392_v13, %s4104_s15 }
 0x411   : > { %v5396_v37 = vpop.f32.mrf.mxu0 }
 0x413   : > { %v5398_v23 = vpop.f32.mrf.mxu0 }
 0x414   : > { %2370 = vrot.lane.b32.xlu1 %v5398_v23, %s4104_s15 }
 0x415   : > { %v5402_v38 = vpop.f32.mrf.mxu0 }
 0x417   : > { %v5404_v36 = vpop.f32.mrf.mxu0 }
 0x418   : > { %2372 = vrot.lane.b32.xlu0 %v5404_v36, %s4104_s15 }
 0x419   : > { %v5408_v3 = vpop.f32.mrf.mxu0 }
 0x41b   : > { %v5410_v33 = vpop.f32.mrf.mxu0 }
 0x41c   : > { %2374 = vrot.lane.b32.xlu1 %v5410_v33, %s4104_s15 }
 0x41d   : > { %v5414_v15 = vpop.f32.mrf.mxu0 }
 0x41f   : > { %v5416_v12 = vpop.f32.mrf.mxu0 }
 0x420   : > { %2376 = vrot.lane.b32.xlu0 %v5416_v12, %s4104_s15 }
 0x421   : > { %v5420_v41 = vpop.f32.mrf.mxu0 }
 0x423   : > { %v5422_v27 = vpop.f32.mrf.mxu0 }
 0x424   : > { %2378 = vrot.lane.b32.xlu1 %v5422_v27, %s4104_s15 }
 0x425   : > { %v5426_v53 = vpop.f32.mrf.mxu0 }
 0x427   : > { %v5428_v48 = vpop.f32.mrf.mxu0 }
 0x428   : > { %2380 = vrot.lane.b32.xlu0 %v5428_v48, %s4104_s15 }
 0x429   : > { %v5432_v7 = vpop.f32.mrf.mxu0 }
 0x42b   : > { %v5434_v56 = vpop.f32.mrf.mxu0 }
 0x42c   : > { %6381 = vst [vmem:[#allocation16_spill] sm:$0xff] %v5434_v56  ;;  %2382 = vrot.lane.b32.xlu1 %v5434_v56, %s4104_s15 }
 0x42d   : > { %v5438_v54 = vpop.f32.mrf.mxu0 }
 0x42f   : > { %v2273_v51 = vpop.f32.mrf.mxu0 }
 0x430   : > { %2384 = vrot.lane.b32.xlu0 %v2273_v51, %s4104_s15  ;;  %v2329_v31 = vpop.permute.xlu0 %2328 }
 0x431   : > { %v2456_v16 = vadd.f32 %v2329_v31, %v5300_v62  ;;  %v5447_v59 = vpop.f32.mrf.mxu0 }
 0x433   : > { %v2494_v58 = vadd.f32 %v5444_v0, %v2456_v16  ;;  %v2279_v25 = vpop.f32.mrf.mxu0 }
 0x434   : > { %2386 = vrot.lane.b32.xlu1 %v2279_v25, %s4104_s15  ;;  %v2331_v19 = vpop.permute.xlu1 %2330 }
 0x435   : > { %v2526_v17 = vmax.f32 %v2494_v58, 0.0  ;;  %v2457_v43 = vadd.f32 %v2331_v19, %v5306_v42  ;;  %v5452_v46 = vpop.f32.mrf.mxu0 }
 0x437   : > { %v2495_v51 = vadd.f32 %v5444_v0, %v2457_v43  ;;  %v2285_v56 = vpop.f32.mrf.mxu0  ;;  %3721 = vmatmul.mubr.msk.f32.vlgmr.msra.gmra.mxu1 %vm458_vm0, %v2526_v17 }
 0x438   : > { %2388 = vrot.lane.b32.xlu0 %v2285_v56, %s4104_s15  ;;  %2741 = vmatprep.mubr.f32.mxu1 %v6329_v63 }
 0x439   : > { %v2527_v62 = vmax.f32 %v2495_v51, 0.0  ;;  %v5458_v31 = vpop.f32.mrf.mxu0 }
 0x43a   : > { %v2333_v16 = vpop.permute.xlu0 %2332 }
 0x43b   : > { %v2458_v25 = vadd.f32 %v2333_v16, %v5312_v50  ;;  %v2291_v58 = vpop.f32.mrf.mxu0  ;;  %3722 = vmatmul.mubr.msk.f32.gmra.mxu1 %vm458_vm0, %v2527_v62 }
 0x43c   : > { %2390 = vrot.lane.b32.xlu1 %v2291_v58, %s4104_s15  ;;  %2747 = vmatprep.mubr.f32.mxu1 %v6329_v63 }
 0x43d   : > { %v2496_v42 = vadd.f32 %v5444_v0, %v2458_v25 }
 0x43e   : > { %v2335_v19 = vpop.permute.xlu1 %2334 }
 0x43f   : > { %v2528_v17 = vmax.f32 %v2496_v42, 0.0  ;;  %v2459_v56 = vadd.f32 %v2335_v19, %v5318_v11 }
 0x441   : > { %v2497_v43 = vadd.f32 %v5444_v0, %v2459_v56  ;;  %3723 = vmatmul.mubr.msk.f32.gmra.mxu1 %vm458_vm0, %v2528_v17 }
 0x442   : > { %v2337_v51 = vpop.permute.xlu0 %2336  ;;  %2753 = vmatprep.mubr.f32.mxu1 %v6329_v63 }
 0x443   : > { %v2529_v50 = vmax.f32 %v2497_v43, 0.0  ;;  %v2428_v62 = vadd.f32 %v2337_v51, %v5280_v34 }
 0x445   : > { %v2460_v16 = vadd.f32 %v2428_v62, %v5324_v14  ;;  %3724 = vmatmul.mubr.msk.f32.gmra.mxu1 %vm458_vm0, %v2529_v50 }
 0x446   : > { %v2339_v58 = vpop.permute.xlu1 %2338  ;;  %2759 = vmatprep.mubr.f32.mxu1 %v6329_v63 }
 0x447   : > { %v2498_v25 = vadd.f32 %v5444_v0, %v2460_v16  ;;  %v2429_v11 = vadd.f32 %v2339_v58, %v5284_v6 }
 0x449   : > { %v2530_v42 = vmax.f32 %v2498_v25, 0.0  ;;  %v2461_v19 = vadd.f32 %v2429_v11, %v5330_v45 }
 0x44a   : > { %v2341_v17 = vpop.permute.xlu0 %2340 }
 0x44b   : > { %v2499_v56 = vadd.f32 %v5444_v0, %v2461_v19  ;;  %v2430_v43 = vadd.f32 %v2341_v17, %v5288_v21  ;;  %3725 = vmatmul.mubr.msk.f32.gmra.mxu1 %vm458_vm0, %v2530_v42 }
 0x44c   : > { %2765 = vmatprep.mubr.f32.mxu1 %v6329_v63 }
 0x44d   : > { %v2531_v34 = vmax.f32 %v2499_v56, 0.0  ;;  %v2462_v14 = vadd.f32 %v2430_v43, %v5336_v18 }
 0x44e   : > { %v2343_v51 = vpop.permute.xlu1 %2342 }
 0x44f   : > { %v2500_v50 = vadd.f32 %v5444_v0, %v2462_v14  ;;  %v2431_v6 = vadd.f32 %v2343_v51, %v5292_v1  ;;  %3726 = vmatmul.mubr.msk.f32.gmra.mxu1 %vm458_vm0, %v2531_v34 }
 0x450   : > { %2771 = vmatprep.mubr.f32.mxu1 %v6329_v63 }
 0x451   : > { %v2532_v45 = vmax.f32 %v2500_v50, 0.0  ;;  %v2463_v62 = vadd.f32 %v2431_v6, %v5342_v26 }
 0x452   : > { %v2345_v21 = vpop.permute.xlu0 %2344 }
 0x453   : > { %v2501_v16 = vadd.f32 %v5444_v0, %v2463_v62  ;;  %v2432_v58 = vadd.f32 %v2345_v21, %v5296_v57  ;;  %3727 = vmatmul.mubr.msk.f32.gmra.mxu1 %vm458_vm0, %v2532_v45 }
 0x454   : > { %2777 = vmatprep.mubr.f32.mxu1 %v6329_v63 }
 0x455   : > { %v2533_v18 = vmax.f32 %v2501_v16, 0.0  ;;  %v2464_v25 = vadd.f32 %v2432_v58, %v5348_v32 }
 0x456   : > { %v2347_v1 = vpop.permute.xlu1 %2346 }
 0x457   : > { %v2502_v11 = vadd.f32 %v5444_v0, %v2464_v25  ;;  %v2433_v42 = vadd.f32 %v2347_v1, %v5302_v10  ;;  %3728 = vmatmul.mubr.msk.f32.gmra.mxu1 %vm458_vm0, %v2533_v18 }
 0x458   : > { %2783 = vmatprep.mubr.f32.mxu1 %v6329_v63 }
 0x459   : > { %v2534_v26 = vmax.f32 %v2502_v11, 0.0  ;;  %v2465_v19 = vadd.f32 %v2433_v42, %v5354_v5 }
 0x45a   : > { %v2349_v57 = vpop.permute.xlu0 %2348 }
 0x45b   : > { %v2503_v17 = vadd.f32 %v5444_v0, %v2465_v19  ;;  %v2434_v56 = vadd.f32 %v2349_v57, %v5308_v40  ;;  %3729 = vmatmul.mubr.msk.f32.gmra.mxu1 %vm458_vm0, %v2534_v26 }
 0x45c   : > { %2789 = vmatprep.mubr.f32.mxu1 %v6329_v63 }
 0x45d   : > { %v2535_v32 = vmax.f32 %v2503_v17, 0.0  ;;  %v2466_v43 = vadd.f32 %v2434_v56, %v5360_v2 }
 0x45e   : > { %v2351_v10 = vpop.permute.xlu1 %2350 }
 0x45f   : > { %v2504_v34 = vadd.f32 %v5444_v0, %v2466_v43  ;;  %v2435_v14 = vadd.f32 %v2351_v10, %v5314_v47  ;;  %3730 = vmatmul.mubr.msk.f32.gmra.mxu1 %vm458_vm0, %v2535_v32 }
 0x460   : > { %2795 = vmatprep.mubr.f32.mxu1 %v6329_v63 }
 0x461   : > { %v2536_v5 = vmax.f32 %v2504_v34, 0.0  ;;  %v2467_v51 = vadd.f32 %v2435_v14, %v5366_v52 }
 0x462   : > { %v2353_v40 = vpop.permute.xlu0 %2352 }
 0x463   : > { %v2505_v50 = vadd.f32 %v5444_v0, %v2467_v51  ;;  %v2436_v6 = vadd.f32 %v2353_v40, %v5320_v35  ;;  %3731 = vmatmul.mubr.msk.f32.gmra.mxu1 %vm458_vm0, %v2536_v5 }
 0x464   : > { %2801 = vmatprep.mubr.f32.mxu1 %v6329_v63 }
 0x465   : > { %v2537_v2 = vmax.f32 %v2505_v50, 0.0  ;;  %v2468_v45 = vadd.f32 %v2436_v6, %v5372_v44 }
 0x466   : > { %v2355_v47 = vpop.permute.xlu1 %2354 }
 0x467   : > { %v2506_v62 = vadd.f32 %v5444_v0, %v2468_v45  ;;  %v2437_v21 = vadd.f32 %v2355_v47, %v5326_v8  ;;  %3732 = vmatmul.mubr.msk.f32.gmra.mxu1 %vm458_vm0, %v2537_v2 }
 0x468   : > { %2807 = vmatprep.mubr.f32.mxu1 %v6329_v63 }
 0x469   : > { %v2538_v52 = vmax.f32 %v2506_v62, 0.0  ;;  %v2469_v16 = vadd.f32 %v2437_v21, %v5378_v22 }
 0x46a   : > { %v2357_v35 = vpop.permute.xlu0 %2356 }
 0x46b   : > { %v2507_v58 = vadd.f32 %v5444_v0, %v2469_v16  ;;  %v2438_v18 = vadd.f32 %v2357_v35, %v5332_v4  ;;  %3733 = vmatmul.mubr.msk.f32.gmra.mxu1 %vm458_vm0, %v2538_v52 }
 0x46c   : > { %2813 = vmatprep.mubr.f32.mxu1 %v6329_v63 }
 0x46d   : > { %v2539_v44 = vmax.f32 %v2507_v58, 0.0  ;;  %v2470_v25 = vadd.f32 %v2438_v18, %v5384_v61 }
 0x46e   : > { %v2359_v8 = vpop.permute.xlu1 %2358 }
 0x46f   : > { %v2508_v1 = vadd.f32 %v5444_v0, %v2470_v25  ;;  %v2439_v11 = vadd.f32 %v2359_v8, %v5338_v60  ;;  %3734 = vmatmul.mubr.msk.f32.gmra.mxu1 %vm458_vm0, %v2539_v44 }
 0x470   : > { %2819 = vmatprep.mubr.f32.mxu1 %v6329_v63 }
 0x471   : > { %v2540_v22 = vmax.f32 %v2508_v1, 0.0  ;;  %v2471_v42 = vadd.f32 %v2439_v11, %v5390_v49 }
 0x472   : > { %v2361_v4 = vpop.permute.xlu0 %2360 }
 0x473   : > { %v2509_v26 = vadd.f32 %v5444_v0, %v2471_v42  ;;  %v2440_v19 = vadd.f32 %v2361_v4, %v5344_v20  ;;  %3735 = vmatmul.mubr.msk.f32.gmra.mxu1 %vm458_vm0, %v2540_v22 }
 0x474   : > { %2825 = vmatprep.mubr.f32.mxu1 %v6329_v63 }
 0x475   : > { %v2541_v61 = vmax.f32 %v2509_v26, 0.0  ;;  %v2472_v57 = vadd.f32 %v2440_v19, %v5396_v37 }
 0x476   : > { %v2363_v60 = vpop.permute.xlu1 %2362 }
 0x477   : > { %v2510_v17 = vadd.f32 %v5444_v0, %v2472_v57  ;;  %v2441_v56 = vadd.f32 %v2363_v60, %v5350_v9  ;;  %3736 = vmatmul.mubr.msk.f32.gmra.mxu1 %vm458_vm0, %v2541_v61 }
 0x478   : > { %2831 = vmatprep.mubr.f32.mxu1 %v6329_v63 }
 0x479   : > { %v2542_v49 = vmax.f32 %v2510_v17, 0.0  ;;  %v2473_v32 = vadd.f32 %v2441_v56, %v5402_v38 }
 0x47a   : > { %v2365_v20 = vpop.permute.xlu0 %2364 }
 0x47b   : > { %v2511_v43 = vadd.f32 %v5444_v0, %v2473_v32  ;;  %v2442_v10 = vadd.f32 %v2365_v20, %v5356_v28  ;;  %3737 = vmatmul.mubr.msk.f32.gmra.mxu1 %vm458_vm0, %v2542_v49 }
 0x47c   : > { %2837 = vmatprep.mubr.f32.mxu1 %v6329_v63 }
 0x47d   : > { %v2543_v37 = vmax.f32 %v2511_v43, 0.0  ;;  %v2474_v34 = vadd.f32 %v2442_v10, %v5408_v3 }
 0x47e   : > { %v2367_v9 = vpop.permute.xlu1 %2366 }
 0x47f   : > { %v2512_v14 = vadd.f32 %v5444_v0, %v2474_v34  ;;  %v2443_v5 = vadd.f32 %v2367_v9, %v5362_v39  ;;  %3738 = vmatmul.mubr.msk.f32.gmra.mxu1 %vm458_vm0, %v2543_v37  ;;  %v6382_v9 = vld [vmem:[#allocation16_spill] sm:$0xff] }
 0x480   : > { %2843 = vmatprep.mubr.f32.mxu1 %v6329_v63 }
 0x481   : > { %v2544_v38 = vmax.f32 %v2512_v14, 0.0  ;;  %v2475_v51 = vadd.f32 %v2443_v5, %v5414_v15 }
 0x482   : > { %v2369_v28 = vpop.permute.xlu0 %2368 }
 0x483   : > { %v2513_v40 = vadd.f32 %v5444_v0, %v2475_v51  ;;  %v2444_v50 = vadd.f32 %v2369_v28, %v5368_v30  ;;  %3739 = vmatmul.mubr.msk.f32.gmra.mxu1 %vm458_vm0, %v2544_v38 }
 0x484   : > { %2849 = vmatprep.mubr.f32.mxu1 %v6329_v63 }
 0x485   : > { %v2545_v3 = vmax.f32 %v2513_v40, 0.0  ;;  %v2476_v6 = vadd.f32 %v2444_v50, %v5420_v41 }
 0x486   : > { %v2371_v39 = vpop.permute.xlu1 %2370 }
 0x487   : > { %v2514_v2 = vadd.f32 %v5444_v0, %v2476_v6  ;;  %v2445_v45 = vadd.f32 %v2371_v39, %v5374_v55  ;;  %3740 = vmatmul.mubr.msk.f32.gmra.mxu1 %vm458_vm0, %v2545_v3 }
 0x488   : > { %2855 = vmatprep.mubr.f32.mxu1 %v6329_v63 }
 0x489   : > { %v2546_v15 = vmax.f32 %v2514_v2, 0.0  ;;  %v2477_v47 = vadd.f32 %v2445_v45, %v5426_v53 }
 0x48a   : > { %v2373_v30 = vpop.permute.xlu0 %2372 }
 0x48b   : > { %v2515_v62 = vadd.f32 %v5444_v0, %v2477_v47  ;;  %v2446_v21 = vadd.f32 %v2373_v30, %v5380_v29  ;;  %3741 = vmatmul.mubr.msk.f32.gmra.mxu1 %vm458_vm0, %v2546_v15 }
 0x48c   : > { %2861 = vmatprep.mubr.f32.mxu1 %v6329_v63 }
 0x48d   : > { %v2547_v41 = vmax.f32 %v2515_v62, 0.0  ;;  %v2478_v52 = vadd.f32 %v2446_v21, %v5432_v7 }
 0x48e   : > { %v2375_v55 = vpop.permute.xlu1 %2374 }
 0x48f   : > { %v2516_v16 = vadd.f32 %v5444_v0, %v2478_v52  ;;  %v2447_v35 = vadd.f32 %v2375_v55, %v5386_v24  ;;  %3742 = vmatmul.mubr.msk.f32.gmra.mxu1 %vm458_vm0, %v2547_v41 }
 0x490   : > { %2867 = vmatprep.mubr.f32.mxu1 %v6329_v63 }
 0x491   : > { %v2548_v53 = vmax.f32 %v2516_v16, 0.0  ;;  %v2479_v58 = vadd.f32 %v2447_v35, %v5438_v54 }
 0x492   : > { %v2377_v29 = vpop.permute.xlu0 %2376 }
 0x493   : > { %v2517_v18 = vadd.f32 %v5444_v0, %v2479_v58  ;;  %v2448_v44 = vadd.f32 %v2377_v29, %v5392_v13  ;;  %3743 = vmatmul.mubr.msk.f32.gmra.mxu1 %vm458_vm0, %v2548_v53 }
 0x494   : > { %2873 = vmatprep.mubr.f32.mxu1 %v6329_v63 }
 0x495   : > { %v2549_v7 = vmax.f32 %v2517_v18, 0.0  ;;  %v2480_v25 = vadd.f32 %v2448_v44, %v5447_v59 }
 0x496   : > { %v2379_v24 = vpop.permute.xlu1 %2378 }
 0x497   : > { %v2518_v8 = vadd.f32 %v5444_v0, %v2480_v25  ;;  %v2449_v1 = vadd.f32 %v2379_v24, %v5398_v23  ;;  %3744 = vmatmul.mubr.msk.f32.gmra.mxu1 %vm458_vm0, %v2549_v7 }
 0x498   : > { %2879 = vmatprep.mubr.f32.mxu1 %v6329_v63 }
 0x499   : > { %v2550_v54 = vmax.f32 %v2518_v8, 0.0  ;;  %v2481_v11 = vadd.f32 %v2449_v1, %v5452_v46  ;;  %v2293_v46 = vpop.f32.mrf.mxu0 }
 0x49a   : > { %v2381_v13 = vpop.permute.xlu0 %2380 }
 0x49b   : > { %v2519_v22 = vadd.f32 %v5444_v0, %v2481_v11  ;;  %v2450_v42 = vadd.f32 %v2381_v13, %v5404_v36  ;;  %3745 = vmatmul.mubr.msk.f32.gmra.mxu1 %vm458_vm0, %v2550_v54 }
 0x49c   : > { %2885 = vmatprep.mubr.f32.mxu1 %v6329_v63 }
 0x49d   : > { %v2551_v59 = vmax.f32 %v2519_v22, 0.0  ;;  %v2482_v4 = vadd.f32 %v2450_v42, %v5458_v31 }
 0x49e   : > { %v2383_v23 = vpop.permute.xlu1 %2382 }
 0x49f   : > { %v2520_v26 = vadd.f32 %v5444_v0, %v2482_v4  ;;  %v2451_v19 = vadd.f32 %v2383_v23, %v5410_v33  ;;  %3746 = vmatmul.mubr.msk.f32.gmra.mxu1 %vm458_vm0, %v2551_v59 }
 0x4a0   : > { %2891 = vmatprep.mubr.f32.mxu1 %v6329_v63 }
 0x4a1   : > { %v2552_v61 = vmax.f32 %v2520_v26, 0.0  ;;  %v2483_v57 = vadd.f32 %v2451_v19, %v2293_v46 }
 0x4a2   : > { %v2385_v36 = vpop.permute.xlu0 %2384 }
 0x4a3   : > { %v2521_v60 = vadd.f32 %v5444_v0, %v2483_v57  ;;  %v2452_v17 = vadd.f32 %v2385_v36, %v5416_v12  ;;  %3747 = vmatmul.mubr.msk.f32.gmra.mxu1 %vm458_vm0, %v2552_v61 }
 0x4a4   : > { %2897 = vmatprep.mubr.f32.mxu1 %v6329_v63 }
 0x4a5   : > { %v2553_v31 = vmax.f32 %v2521_v60, 0.0  ;;  %v2522_v56 = vadd.f32 %v5444_v0, %v2452_v17 }
 0x4a6   : > { %v2387_v33 = vpop.permute.xlu1 %2386 }
 0x4a7   : > { %v2453_v49 = vadd.f32 %v2387_v33, %v5422_v27  ;;  %3748 = vmatmul.mubr.msk.f32.gmra.mxu1 %vm458_vm0, %v2553_v31  ;;  %v2554_v32 = vmax.f32 %v2522_v56, 0.0 }
 0x4a8   : > { %2903 = vmatprep.mubr.f32.mxu1 %v6329_v63 }
 0x4a9   : > { %v2523_v20 = vadd.f32 %v5444_v0, %v2453_v49 }
 0x4aa   : > { %v2389_v43 = vpop.permute.xlu0 %2388 }
 0x4ab   : > { %v2454_v12 = vadd.f32 %v2389_v43, %v5428_v48  ;;  %3749 = vmatmul.mubr.msk.f32.gmra.mxu1 %vm458_vm0, %v2554_v32  ;;  %v2555_v10 = vmax.f32 %v2523_v20, 0.0 }
 0x4ac   : > { %2909 = vmatprep.mubr.f32.mxu1 %v6329_v63 }
 0x4ad   : > { %v2524_v37 = vadd.f32 %v5444_v0, %v2454_v12 }
 0x4ae   : > { %v2391_v34 = vpop.permute.xlu1 %2390 }
 0x4af   : > { %v2455_v27 = vadd.f32 %v2391_v34, %v6382_v9  ;;  %3750 = vmatmul.mubr.msk.f32.gmra.mxu1 %vm458_vm0, %v2555_v10  ;;  %v2556_v14 = vmax.f32 %v2524_v37, 0.0 }
 0x4b0   : > { %2915 = vmatprep.mubr.f32.mxu1 %v6329_v63 }
 0x4b1   : > { %v2525_v5 = vadd.f32 %v5444_v0, %v2455_v27 }
 0x4b3   : > { %3751 = vmatmul.mubr.msk.f32.gmra.mxu1 %vm458_vm0, %v2556_v14  ;;  %v2557_v48 = vmax.f32 %v2525_v5, 0.0 }
 0x4b4   : > { %2921 = vmatprep.mubr.f32.mxu1 %v6329_v63 }
 0x4b7   : > { %3752 = vmatmul.mubr.msk.f32.gmra.mxu1 %vm458_vm0, %v2557_v48 }
 0x4f7   : > { %v5605_v38 = vpop.f32.mrf.mxu1 }
 0x4f8   : > { %3057 = vrot.lane.b32.xlu0 %v5605_v38, %s4104_s15  ;;  %v2961_v40 = vrot.slane %v5605_v38, 6 }
 0x4f9   : > { %v2739_v51 = vpop.f32.mrf.mxu1 }
 0x4fa   : > { %v3218_v63 = vrot.slane %v2739_v51, 2 }
 0x4fb   : > { %v2743_v28 = vpop.f32.mrf.mxu1 }
 0x4fc   : > { %v2962_v50 = vrot.slane %v2743_v28, 6  ;;  %3059 = vrot.lane.b32.xlu1 %v2743_v28, %s4104_s15 }
 0x4fd   : > { %v5611_v0 = vpop.f32.mrf.mxu1 }
 0x4fe   : > { %v6294_v3 = vrot.slane %v5611_v0, 2  ;;  %v5617_v6 = vsel %vm2960_vm4, %v2961_v40, %v2962_v50 }
 0x500   : > { %v5622_v39 = vsel %vm3217_vm3, %v3218_v63, %v6294_v3  ;;  %v3041_v3 = vsel %vm2960_vm4, 0.0, %v2961_v40 }
 0x501   : > { %v5624_v2 = vpop.f32.mrf.mxu1 }
 0x502   : > { %3061 = vrot.lane.b32.xlu0 %v5624_v2, %s4104_s15  ;;  %v6292_v47 = vrot.slane %v5624_v2, 6 }
 0x503   : > { %v2751_v45 = vpop.f32.mrf.mxu1 }
 0x504   : > { %v3221_v21 = vrot.slane %v2751_v45, 2 }
 0x505   : > { %v2755_v15 = vpop.f32.mrf.mxu1 }
 0x506   : > { %v2965_v30 = vrot.slane %v2755_v15, 6  ;;  %3063 = vrot.lane.b32.xlu1 %v2755_v15, %s4104_s15 }
 0x507   : > { %v5630_v62 = vpop.f32.mrf.mxu1 }
 0x508   : > { %v6291_v41 = vrot.slane %v5630_v62, 2  ;;  %v5636_v52 = vsel %vm2960_vm4, %v6292_v47, %v2965_v30 }
 0x50a   : > { %v5641_v55 = vsel %vm3217_vm3, %v3221_v21, %v6291_v41 }
 0x50b   : > { %v5643_v16 = vpop.f32.mrf.mxu1 }
 0x50c   : > { %3065 = vrot.lane.b32.xlu0 %v5643_v16, %s4104_s15  ;;  %v6289_v58 = vrot.slane %v5643_v16, 6 }
 0x50d   : > { %v2763_v35 = vpop.f32.mrf.mxu1 }
 0x50e   : > { %v3224_v44 = vrot.slane %v2763_v35, 2 }
 0x50f   : > { %v2767_v53 = vpop.f32.mrf.mxu1 }
 0x510   : > { %v2968_v29 = vrot.slane %v2767_v53, 6  ;;  %3067 = vrot.lane.b32.xlu1 %v2767_v53, %s4104_s15 }
 0x511   : > { %v5649_v18 = vpop.f32.mrf.mxu1 }
 0x512   : > { %v6288_v7 = vrot.slane %v5649_v18, 2  ;;  %v5655_v25 = vsel %vm2960_vm4, %v6289_v58, %v2968_v29 }
 0x513   : > { %v5657_v24 = vpop.f32.mrf.mxu1 }
 0x514   : > { %3069 = vrot.lane.b32.xlu0 %v5657_v24, %s4104_s15  ;;  %v5664_v8 = vsel %vm3217_vm3, %v3224_v44, %v6288_v7  ;;  %v6286_v11 = vrot.slane %v5657_v24, 6 }
 0x515   : > { %v2775_v1 = vpop.f32.mrf.mxu1 }
 0x516   : > { %v3227_v42 = vrot.slane %v2775_v1, 2 }
 0x517   : > { %v2779_v54 = vpop.f32.mrf.mxu1 }
 0x518   : > { %v2971_v13 = vrot.slane %v2779_v54, 6  ;;  %3071 = vrot.lane.b32.xlu1 %v2779_v54, %s4104_s15 }
 0x519   : > { %v5668_v22 = vpop.f32.mrf.mxu1 }
 0x51a   : > { %v6285_v59 = vrot.slane %v5668_v22, 2  ;;  %v5674_v4 = vsel %vm2960_vm4, %v6286_v11, %v2971_v13 }
 0x51b   : > { %v5676_v23 = vpop.f32.mrf.mxu1 }
 0x51c   : > { %3073 = vrot.lane.b32.xlu0 %v5676_v23, %s4104_s15  ;;  %v5683_v26 = vsel %vm3217_vm3, %v3227_v42, %v6285_v59  ;;  %v6283_v61 = vrot.slane %v5676_v23, 6 }
 0x51d   : > { %v2787_v19 = vpop.f32.mrf.mxu1 }
 0x51e   : > { %v3230_v60 = vrot.slane %v2787_v19, 2 }
 0x51f   : > { %v2791_v46 = vpop.f32.mrf.mxu1 }
 0x520   : > { %v2974_v57 = vrot.slane %v2791_v46, 6  ;;  %3075 = vrot.lane.b32.xlu1 %v2791_v46, %s4104_s15 }
 0x521   : > { %v5687_v36 = vpop.f32.mrf.mxu1 }
 0x522   : > { %v6282_v17 = vrot.slane %v5687_v36, 2  ;;  %v5693_v31 = vsel %vm2960_vm4, %v6283_v61, %v2974_v57 }
 0x523   : > { %v5695_v56 = vpop.f32.mrf.mxu1 }
 0x524   : > { %3077 = vrot.lane.b32.xlu0 %v5695_v56, %s4104_s15  ;;  %v5702_v33 = vsel %vm3217_vm3, %v3230_v60, %v6282_v17  ;;  %v6280_v20 = vrot.slane %v5695_v56, 6 }
 0x525   : > { %v2799_v49 = vpop.f32.mrf.mxu1 }
 0x526   : > { %v3233_v10 = vrot.slane %v2799_v49, 2 }
 0x527   : > { %v2803_v32 = vpop.f32.mrf.mxu1 }
 0x528   : > { %v2977_v43 = vrot.slane %v2803_v32, 6  ;;  %3079 = vrot.lane.b32.xlu1 %v2803_v32, %s4104_s15 }
 0x529   : > { %v5706_v12 = vpop.f32.mrf.mxu1 }
 0x52a   : > { %v6279_v37 = vrot.slane %v5706_v12, 2  ;;  %v5712_v34 = vsel %vm2960_vm4, %v6280_v20, %v2977_v43 }
 0x52b   : > { %v5714_v9 = vpop.f32.mrf.mxu1 }
 0x52c   : > { %3081 = vrot.lane.b32.xlu0 %v5714_v9, %s4104_s15  ;;  %v5721_v27 = vsel %vm3217_vm3, %v3233_v10, %v6279_v37  ;;  %v6277_v48 = vrot.slane %v5714_v9, 6 }
 0x52d   : > { %v2811_v14 = vpop.f32.mrf.mxu1 }
 0x52e   : > { %v3236_v50 = vrot.slane %v2811_v14, 2 }
 0x52f   : > { %v2815_v5 = vpop.f32.mrf.mxu1 }
 0x530   : > { %v2980_v51 = vrot.slane %v2815_v5, 6  ;;  %3083 = vrot.lane.b32.xlu1 %v2815_v5, %s4104_s15 }
 0x531   : > { %v5725_v28 = vpop.f32.mrf.mxu1 }
 0x532   : > { %v6276_v63 = vrot.slane %v5725_v28, 2  ;;  %v5731_v45 = vsel %vm2960_vm4, %v6277_v48, %v2980_v51 }
 0x533   : > { %v5733_v15 = vpop.f32.mrf.mxu1 }
 0x534   : > { %3085 = vrot.lane.b32.xlu0 %v5733_v15, %s4104_s15  ;;  %v5740_v30 = vsel %vm3217_vm3, %v3236_v50, %v6276_v63  ;;  %v6274_v53 = vrot.slane %v5733_v15, 6 }
 0x535   : > { %v2823_v21 = vpop.f32.mrf.mxu1 }
 0x536   : > { %v3239_v1 = vrot.slane %v2823_v21, 2 }
 0x537   : > { %v2827_v35 = vpop.f32.mrf.mxu1 }
 0x538   : > { %v2983_v29 = vrot.slane %v2827_v35, 6  ;;  %3087 = vrot.lane.b32.xlu1 %v2827_v35, %s4104_s15 }
 0x539   : > { %v5744_v44 = vpop.f32.mrf.mxu1 }
 0x53a   : > { %v6273_v54 = vrot.slane %v5744_v44, 2  ;;  %v5750_v13 = vsel %vm2960_vm4, %v6274_v53, %v2983_v29 }
 0x53b   : > { %v5752_v42 = vpop.f32.mrf.mxu1 }
 0x53c   : > { %3089 = vrot.lane.b32.xlu0 %v5752_v42, %s4104_s15  ;;  %v5759_v19 = vsel %vm3217_vm3, %v3239_v1, %v6273_v54  ;;  %v6271_v60 = vrot.slane %v5752_v42, 6 }
 0x53d   : > { %v2835_v46 = vpop.f32.mrf.mxu1 }
 0x53e   : > { %v3242_v43 = vrot.slane %v2835_v46, 2 }
 0x53f   : > { %v2839_v57 = vpop.f32.mrf.mxu1 }
 0x540   : > { %v2986_v49 = vrot.slane %v2839_v57, 6  ;;  %3091 = vrot.lane.b32.xlu1 %v2839_v57, %s4104_s15 }
 0x541   : > { %v5763_v32 = vpop.f32.mrf.mxu1 }
 0x542   : > { %v6272_v10 = vrot.slane %v5763_v32, 2  ;;  %v5769_v14 = vsel %vm2960_vm4, %v6271_v60, %v2986_v49 }
 0x543   : > { %v5771_v5 = vpop.f32.mrf.mxu1 }
 0x544   : > { %3093 = vrot.lane.b32.xlu0 %v5771_v5, %s4104_s15  ;;  %v5778_v51 = vsel %vm3217_vm3, %v3242_v43, %v6272_v10  ;;  %v6275_v35 = vrot.slane %v5771_v5, 6 }
 0x545   : > { %v2847_v50 = vpop.f32.mrf.mxu1 }
 0x546   : > { %v3245_v46 = vrot.slane %v2847_v50, 2 }
 0x547   : > { %v2851_v21 = vpop.f32.mrf.mxu1 }
 0x548   : > { %v2989_v29 = vrot.slane %v2851_v21, 6  ;;  %3095 = vrot.lane.b32.xlu1 %v2851_v21, %s4104_s15 }
 0x549   : > { %v5782_v1 = vpop.f32.mrf.mxu1 }
 0x54a   : > { %v6278_v57 = vrot.slane %v5782_v1, 2  ;;  %v5788_v49 = vsel %vm2960_vm4, %v6275_v35, %v2989_v29 }
 0x54b   : > { %v5790_v60 = vpop.f32.mrf.mxu1 }
 0x54c   : > { %3097 = vrot.lane.b32.xlu0 %v5790_v60, %s4104_s15  ;;  %v5797_v43 = vsel %vm3217_vm3, %v3245_v46, %v6278_v57  ;;  %v6281_v50 = vrot.slane %v5790_v60, 6 }
 0x54d   : > { %v2859_v21 = vpop.f32.mrf.mxu1 }
 0x54e   : > { %v3248_v29 = vrot.slane %v2859_v21, 2 }
 0x54f   : > { %v2863_v10 = vpop.f32.mrf.mxu1 }
 0x550   : > { %v2992_v54 = vrot.slane %v2863_v10, 6  ;;  %3099 = vrot.lane.b32.xlu1 %v2863_v10, %s4104_s15 }
 0x551   : > { %v5801_v53 = vpop.f32.mrf.mxu1 }
 0x552   : > { %v6284_v35 = vrot.slane %v5801_v53, 2  ;;  %v5807_v63 = vsel %vm2960_vm4, %v6281_v50, %v2992_v54 }
 0x553   : > { %v5809_v48 = vpop.f32.mrf.mxu1 }
 0x554   : > { %3101 = vrot.lane.b32.xlu0 %v5809_v48, %s4104_s15  ;;  %v5816_v46 = vsel %vm3217_vm3, %v3248_v29, %v6284_v35  ;;  %v6287_v21 = vrot.slane %v5809_v48, 6 }
 0x555   : > { %v2871_v10 = vpop.f32.mrf.mxu1 }
 0x556   : > { %v3251_v54 = vrot.slane %v2871_v10, 2 }
 0x557   : > { %v2875_v57 = vpop.f32.mrf.mxu1 }
 0x558   : > { %v2995_v37 = vrot.slane %v2875_v57, 6  ;;  %3103 = vrot.lane.b32.xlu1 %v2875_v57, %s4104_s15 }
 0x559   : > { %v5820_v20 = vpop.f32.mrf.mxu1 }
 0x55a   : > { %v6290_v50 = vrot.slane %v5820_v20, 2  ;;  %v5826_v17 = vsel %vm2960_vm4, %v6287_v21, %v2995_v37 }
 0x55b   : > { %v5828_v61 = vpop.f32.mrf.mxu1 }
 0x55c   : > { %6383 = vst [vmem:[#allocation21_spill] sm:$0xff] %v5828_v61  ;;  %3105 = vrot.lane.b32.xlu0 %v5828_v61, %s4104_s15  ;;  %v5835_v29 = vsel %vm3217_vm3, %v3251_v54, %v6290_v50  ;;  %v6293_v10 = vrot.slane %v5828_v61, 6 }
 0x55d   : > { %v2883_v57 = vpop.f32.mrf.mxu1 }
 0x55e   : > { %v3254_v37 = vrot.slane %v2883_v57, 2 }
 0x55f   : > { %v2887_v35 = vpop.f32.mrf.mxu1 }
 0x560   : > { %v2998_v59 = vrot.slane %v2887_v35, 6  ;;  %3107 = vrot.lane.b32.xlu1 %v2887_v35, %s4104_s15 }
 0x561   : > { %v5839_v11 = vpop.f32.mrf.mxu1 }
 0x562   : > { %6384 = vst [vmem:[#allocation20_spill] sm:$0xff] %v5839_v11  ;;  %v6296_v21 = vrot.slane %v5839_v11, 2  ;;  %v5845_v7 = vsel %vm2960_vm4, %v6293_v10, %v2998_v59 }
 0x563   : > { %6385 = vst [vmem:[#allocation18_spill] sm:$0xff] %v5845_v7  ;;  %v5847_v58 = vpop.f32.mrf.mxu1 }
 0x564   : > { %6386 = vst [vmem:[#allocation17_spill] sm:$0xff] %v5847_v58  ;;  %3109 = vrot.lane.b32.xlu0 %v5847_v58, %s4104_s15  ;;  %v5854_v54 = vsel %vm3217_vm3, %v3254_v37, %v6296_v21  ;;  %v6297_v57 = vrot.slane %v5847_v58, 6 }
 0x565   : > { %6387 = vst [vmem:[#allocation19_spill] sm:$0xff] %v5854_v54  ;;  %v2895_v35 = vpop.f32.mrf.mxu1 }
 0x566   : > { %v3257_v59 = vrot.slane %v2895_v35, 2 }
 0x567   : > { %v2899_v50 = vpop.f32.mrf.mxu1 }
 0x568   : > { %v3001_v41 = vrot.slane %v2899_v50, 6  ;;  %3111 = vrot.lane.b32.xlu1 %v2899_v50, %s4104_s15  ;;  %v5874_v50 = vld [vmem:[%s6225_s8] ss:$0 sm:$0xff] }
 0x569   : > { %v5858_v47 = vpop.f32.mrf.mxu1 }
 0x56a   : > { %6388 = vst [vmem:[#allocation24_spill] sm:$0xff] %v5858_v47  ;;  %v6300_v10 = vrot.slane %v5858_v47, 2  ;;  %v3058_v11 = vpop.permute.xlu0 %3057  ;;  %v5867_v37 = vsel %vm2960_vm4, %v6297_v57, %v3001_v41 }
 0x56b   : > { %6389 = vst [vmem:[#allocation23_spill] sm:$0xff] %v5867_v37  ;;  %v3153_v21 = vadd.f32 %v3058_v11, %v3041_v3  ;;  %v5869_v7 = vpop.f32.mrf.mxu1  ;;  %v6390_v37 = vrot.slane %v5611_v0, 2 }
 0x56c   : > { %3113 = vrot.lane.b32.xlu0 %v5869_v7, %s4104_s15  ;;  %v5881_v38 = vsel %vm3217_vm3, %v3257_v59, %v6300_v10  ;;  %v6303_v54 = vrot.slane %v5869_v7, 6  ;;  %v3856_v59 = vld [vmem:[%s4319_s28] sm:$0xff] }
 0x56d   : > { %v3314_v40 = vadd.f32 %v5622_v39, %v3153_v21  ;;  %v2907_v41 = vpop.f32.mrf.mxu1  ;;  %v3298_v58 = vsel %vm3217_vm3, %v6390_v37, 0.0 }
 0x56e   : > { %v3060_v35 = vpop.permute.xlu1 %3059 }
 0x56f   : > { %v3352_v3 = vadd.f32 %v5874_v50, %v3314_v40  ;;  %v3154_v11 = vadd.f32 %v3060_v35, %v5617_v6  ;;  %v2911_v57 = vpop.f32.mrf.mxu1  ;;  %v3260_v40 = vrot.slane %v2907_v41, 2 }
 0x570   : > { %v3004_v61 = vrot.slane %v2911_v57, 6  ;;  %3115 = vrot.lane.b32.xlu1 %v2911_v57, %s4104_s15  ;;  %v6392_v57 = vrot.slane %v5624_v2, 6 }
 0x571   : > { %v3384_v39 = vadd.f32 %v3856_v59, %v3352_v3  ;;  %v3315_v21 = vadd.f32 %v3298_v58, %v3154_v11  ;;  %v5892_v10 = vpop.f32.mrf.mxu1 }
 0x572   : > { %v6302_v6 = vrot.slane %v5892_v10, 2  ;;  %v5898_v0 = vsel %vm2960_vm4, %v6303_v54, %v3004_v61  ;;  %v3042_v3 = vsel %vm2960_vm4, 0.0, %v6392_v57  ;;  %v3857_v61 = vld [vmem:[%s4319_s28 + $0x8] sm:$0xff] }
 0x573   : > { %v3416_v37 = vmax.f32 %v3384_v39, 0.0  ;;  %v3353_v35 = vadd.f32 %v5874_v50, %v3315_v21  ;;  %v5901_v47 = vpop.f32.mrf.mxu1 }
 0x574   : > { %6391 = vst [vmem:[#allocation22_spill] sm:$0xff] %v5901_v47  ;;  %v3062_v58 = vpop.permute.xlu0 %3061  ;;  %3117 = vrot.lane.b32.xlu0 %v5901_v47, %s4104_s15  ;;  %v5911_v41 = vsel %vm3217_vm3, %v3260_v40, %v6302_v6  ;;  %v3006_v40 = vrot.slane %v5901_v47, 6 }
 0x575   : > { %3448 = vst.msk [vmem:[%s5915_s1] sm:$0xff] %vm458_vm0, %v3416_v37  ;;  %v3385_v2 = vadd.f32 %v3857_v61, %v3353_v35  ;;  %v3155_v11 = vadd.f32 %v3062_v58, %v3042_v3  ;;  %v5920_v59 = vpop.f32.mrf.mxu1  ;;  %v6393_v3 = vrot.slane %v5630_v62, 2  ;;  %v3858_v61 = vld [vmem:[%s4319_s28 + $0x10] sm:$0xff] }
 0x577   : > { %v3417_v39 = vmax.f32 %v3385_v2, 0.0  ;;  %v3316_v21 = vadd.f32 %v5641_v55, %v3155_v11  ;;  %v2923_v57 = vpop.f32.mrf.mxu1  ;;  %v3299_v58 = vsel %vm3217_vm3, %v6393_v3, 0.0 }
 0x578   : > { %v3007_v6 = vrot.slane %v2923_v57, 6  ;;  %v3064_v54 = vpop.permute.xlu1 %3063  ;;  %3119 = vrot.lane.b32.xlu1 %v2923_v57, %s4104_s15 }
 0x579   : > { %3449 = vst.msk [vmem:[%s5915_s1 + $0x8] sm:$0xff] %vm458_vm0, %v3417_v39  ;;  %v3354_v37 = vadd.f32 %v5874_v50, %v3316_v21  ;;  %v3156_v35 = vadd.f32 %v3064_v54, %v5636_v52  ;;  %v6394_v21 = vrot.slane %v5643_v16, 6  ;;  %v3859_v54 = vld [vmem:[%s4319_s28 + $0x18] sm:$0xff] }
 0x57a   : > { %v5935_v55 = vsel %vm2960_vm4, %v3006_v40, %v3007_v6 }
 0x57b   : > { %v3386_v2 = vadd.f32 %v3858_v61, %v3354_v37  ;;  %v3317_v11 = vadd.f32 %v3299_v58, %v3156_v35  ;;  %v3043_v52 = vsel %vm2960_vm4, 0.0, %v6394_v21  ;;  %v6395_v61 = vrot.slane %v5649_v18, 2 }
 0x57c   : > { %v6396_v21 = vrot.slane %v5657_v24, 6 }
 0x57d   : > { %v3418_v57 = vmax.f32 %v3386_v2, 0.0  ;;  %v3355_v39 = vadd.f32 %v5874_v50, %v3317_v11  ;;  %v3300_v2 = vsel %vm3217_vm3, %v6395_v61, 0.0  ;;  %v3860_v11 = vld [vmem:[%s4319_s28 + $0x20] sm:$0xff]  ;;  %v3862_v61 = vld [vmem:[%s4319_s28 + $0x30] sm:$0xff] }
 0x57e   : > { %v3066_v62 = vpop.permute.xlu0 %3065 }
 0x57f   : > { %3450 = vst.msk [vmem:[%s5915_s1 + $0x10] sm:$0xff] %vm458_vm0, %v3418_v57  ;;  %v3387_v3 = vadd.f32 %v3859_v54, %v3355_v39  ;;  %v3157_v47 = vadd.f32 %v3066_v62, %v3043_v52 }
 0x581   : > { %v3419_v6 = vmax.f32 %v3387_v3, 0.0  ;;  %v3318_v37 = vadd.f32 %v5664_v8, %v3157_v47  ;;  %v3044_v47 = vsel %vm2960_vm4, 0.0, %v6396_v21 }
 0x582   : > { %v3068_v35 = vpop.permute.xlu1 %3067 }
 0x583   : > { %3451 = vst.msk [vmem:[%s5915_s1 + $0x18] sm:$0xff] %vm458_vm0, %v3419_v6  ;;  %v3356_v58 = vadd.f32 %v5874_v50, %v3318_v37  ;;  %v3158_v16 = vadd.f32 %v3068_v35, %v5655_v25  ;;  %v3861_v25 = vld [vmem:[%s4319_s28 + $0x28] sm:$0xff] }
 0x585   : > { %v3388_v57 = vadd.f32 %v3860_v11, %v3356_v58  ;;  %v3319_v39 = vadd.f32 %v3300_v2, %v3158_v16  ;;  %v6397_v58 = vrot.slane %v5668_v22, 2  ;;  %v3863_v22 = vld [vmem:[%s4319_s28 + $0x38] sm:$0xff] }
 0x586   : > { %v3070_v8 = vpop.permute.xlu0 %3069 }
 0x587   : > { %v3420_v52 = vmax.f32 %v3388_v57, 0.0  ;;  %v3357_v62 = vadd.f32 %v5874_v50, %v3319_v39  ;;  %v3159_v54 = vadd.f32 %v3070_v8, %v3044_v47  ;;  %v3301_v16 = vsel %vm3217_vm3, %v6397_v58, 0.0 }
 0x588   : > { %v6398_v57 = vrot.slane %v5676_v23, 6 }
 0x589   : > { %3452 = vst.msk [vmem:[%s5915_s1 + $0x20] sm:$0xff] %vm458_vm0, %v3420_v52  ;;  %v3389_v18 = vadd.f32 %v3861_v25, %v3357_v62  ;;  %v3320_v3 = vadd.f32 %v5683_v26, %v3159_v54 }
 0x58a   : > { %v3072_v6 = vpop.permute.xlu1 %3071  ;;  %v3045_v26 = vsel %vm2960_vm4, 0.0, %v6398_v57 }
 0x58b   : > { %v3421_v37 = vmax.f32 %v3389_v18, 0.0  ;;  %v3358_v24 = vadd.f32 %v5874_v50, %v3320_v3  ;;  %v3160_v35 = vadd.f32 %v3072_v6, %v5674_v4  ;;  %v6399_v18 = vrot.slane %v5687_v36, 2  ;;  %v3864_v6 = vld [vmem:[%s4319_s28 + $0x40] sm:$0xff]  ;;  %v3865_v36 = vld [vmem:[%s4319_s28 + $0x48] sm:$0xff] }
 0x58d   : > { %3453 = vst.msk [vmem:[%s5915_s1 + $0x28] sm:$0xff] %vm458_vm0, %v3421_v37  ;;  %v3390_v2 = vadd.f32 %v3862_v61, %v3358_v24  ;;  %v3321_v11 = vadd.f32 %v3301_v16, %v3160_v35  ;;  %v3302_v3 = vsel %vm3217_vm3, %v6399_v18, 0.0  ;;  %v6400_v35 = vrot.slane %v5695_v56, 6 }
 0x58e   : > { %v3074_v39 = vpop.permute.xlu0 %3073 }
 0x58f   : > { %v3422_v21 = vmax.f32 %v3390_v2, 0.0  ;;  %v3359_v47 = vadd.f32 %v5874_v50, %v3321_v11  ;;  %v3161_v4 = vadd.f32 %v3074_v39, %v3045_v26 }
 0x591   : > { %3454 = vst.msk [vmem:[%s5915_s1 + $0x30] sm:$0xff] %vm458_vm0, %v3422_v21  ;;  %v3391_v8 = vadd.f32 %v3863_v22, %v3359_v47  ;;  %v3322_v52 = vadd.f32 %v5702_v33, %v3161_v4  ;;  %v3046_v33 = vsel %vm2960_vm4, 0.0, %v6400_v35  ;;  %v6401_v21 = vrot.slane %v5706_v12, 2  ;;  %v3866_v4 = vld [vmem:[%s4319_s28 + $0x50] sm:$0xff]  ;;  %v3867_v12 = vld [vmem:[%s4319_s28 + $0x58] sm:$0xff] }
 0x592   : > { %v3076_v62 = vpop.permute.xlu1 %3075 }
 0x593   : > { %v3423_v54 = vmax.f32 %v3391_v8, 0.0  ;;  %v3360_v23 = vadd.f32 %v5874_v50, %v3322_v52  ;;  %v3162_v25 = vadd.f32 %v3076_v62, %v5693_v31  ;;  %v3303_v47 = vsel %vm3217_vm3, %v6401_v21, 0.0 }
 0x594   : > { %v6402_v52 = vrot.slane %v5714_v9, 6  ;;  %v6405_v21 = vrot.slane %v5744_v44, 2  ;;  %v3871_v44 = vld [vmem:[%s4319_s28 + $0x78] sm:$0xff] }
 0x595   : > { %3455 = vst.msk [vmem:[%s5915_s1 + $0x38] sm:$0xff] %vm458_vm0, %v3423_v54  ;;  %v3392_v37 = vadd.f32 %v3864_v6, %v3360_v23  ;;  %v3323_v24 = vadd.f32 %v3302_v3, %v3162_v25 }
 0x596   : > { %v3078_v58 = vpop.permute.xlu0 %3077 }
 0x597   : > { %v3424_v16 = vmax.f32 %v3392_v37, 0.0  ;;  %v3361_v61 = vadd.f32 %v5874_v50, %v3323_v24  ;;  %v3163_v31 = vadd.f32 %v3078_v58, %v3046_v33  ;;  %v6403_v24 = vrot.slane %v5725_v28, 2  ;;  %v3868_v33 = vld [vmem:[%s4319_s28 + $0x60] sm:$0xff]  ;;  %v3869_v28 = vld [vmem:[%s4319_s28 + $0x68] sm:$0xff] }
 0x599   : > { %3456 = vst.msk [vmem:[%s5915_s1 + $0x40] sm:$0xff] %vm458_vm0, %v3424_v16  ;;  %v3393_v2 = vadd.f32 %v3865_v36, %v3361_v61  ;;  %v3324_v11 = vadd.f32 %v5721_v27, %v3163_v31  ;;  %v3047_v27 = vsel %vm2960_vm4, 0.0, %v6402_v52  ;;  %v3304_v35 = vsel %vm3217_vm3, %v6403_v24, 0.0 }
 0x59a   : > { %v3080_v57 = vpop.permute.xlu1 %3079  ;;  %v6404_v61 = vrot.slane %v5733_v15, 6  ;;  %v6406_v52 = vrot.slane %v5752_v42, 6 }
 0x59b   : > { %v3425_v26 = vmax.f32 %v3393_v2, 0.0  ;;  %v3362_v56 = vadd.f32 %v5874_v50, %v3324_v11  ;;  %v3164_v39 = vadd.f32 %v3080_v57, %v5712_v34 }
 0x59d   : > { %3457 = vst.msk [vmem:[%s5915_s1 + $0x48] sm:$0xff] %vm458_vm0, %v3425_v26  ;;  %v3394_v22 = vadd.f32 %v3866_v4, %v3362_v56  ;;  %v3325_v8 = vadd.f32 %v3303_v47, %v3164_v39  ;;  %v3305_v47 = vsel %vm3217_vm3, %v6405_v21, 0.0  ;;  %v3870_v4 = vld [vmem:[%s4319_s28 + $0x70] sm:$0xff] }
 0x59e   : > { %v3082_v62 = vpop.permute.xlu0 %3081 }
 0x59f   : > { %v3426_v54 = vmax.f32 %v3394_v22, 0.0  ;;  %v3363_v23 = vadd.f32 %v5874_v50, %v3325_v8  ;;  %v3165_v34 = vadd.f32 %v3082_v62, %v3047_v27 }
 0x5a1   : > { %3458 = vst.msk [vmem:[%s5915_s1 + $0x50] sm:$0xff] %vm458_vm0, %v3426_v54  ;;  %v3395_v25 = vadd.f32 %v3867_v12, %v3363_v23  ;;  %v3326_v18 = vadd.f32 %v5740_v30, %v3165_v34  ;;  %v3048_v30 = vsel %vm2960_vm4, 0.0, %v6404_v61 }
 0x5a2   : > { %v3084_v3 = vpop.permute.xlu1 %3083 }
 0x5a3   : > { %v3427_v6 = vmax.f32 %v3395_v25, 0.0  ;;  %v3364_v9 = vadd.f32 %v5874_v50, %v3326_v18  ;;  %v3166_v37 = vadd.f32 %v3084_v3, %v5731_v45  ;;  %v6407_v3 = vrot.slane %v5763_v32, 2  ;;  %v3873_v32 = vld [vmem:[%s4319_s28 + $0x88] sm:$0xff] }
 0x5a5   : > { %3459 = vst.msk [vmem:[%s5915_s1 + $0x58] sm:$0xff] %vm458_vm0, %v3427_v6  ;;  %v3396_v58 = vadd.f32 %v3868_v33, %v3364_v9  ;;  %v3327_v16 = vadd.f32 %v3304_v35, %v3166_v37  ;;  %v3306_v6 = vsel %vm3217_vm3, %v6407_v3, 0.0  ;;  %v3872_v9 = vld [vmem:[%s4319_s28 + $0x80] sm:$0xff]  ;;  %v6408_v35 = vrot.slane %v5771_v5, 6 }
 0x5a6   : > { %v3086_v31 = vpop.permute.xlu0 %3085 }
 0x5a7   : > { %v3428_v36 = vmax.f32 %v3396_v58, 0.0  ;;  %v3365_v2 = vadd.f32 %v5874_v50, %v3327_v16  ;;  %v3167_v45 = vadd.f32 %v3086_v31, %v3048_v30 }
 0x5a9   : > { %3460 = vst.msk [vmem:[%s5915_s1 + $0x60] sm:$0xff] %vm458_vm0, %v3428_v36  ;;  %v3397_v11 = vadd.f32 %v3869_v28, %v3365_v2  ;;  %v3328_v57 = vadd.f32 %v5759_v19, %v3167_v45  ;;  %v3049_v19 = vsel %vm2960_vm4, 0.0, %v6406_v52  ;;  %v6409_v45 = vrot.slane %v5782_v1, 2  ;;  %v3875_v1 = vld [vmem:[%s4319_s28 + $0x98] sm:$0xff] }
 0x5aa   : > { %v3088_v26 = vpop.permute.xlu1 %3087 }
 0x5ab   : > { %v3429_v56 = vmax.f32 %v3397_v11, 0.0  ;;  %v3366_v15 = vadd.f32 %v5874_v50, %v3328_v57  ;;  %v3168_v39 = vadd.f32 %v3088_v26, %v5750_v13  ;;  %v3307_v28 = vsel %vm3217_vm3, %v6409_v45, 0.0  ;;  %v3874_v11 = vld [vmem:[%s4319_s28 + $0x90] sm:$0xff] }
 0x5ac   : > { %v6417_v45 = vld [vmem:[#allocation18_spill] sm:$0xff] }
 0x5ad   : > { %3461 = vst.msk [vmem:[%s5915_s1 + $0x68] sm:$0xff] %vm458_vm0, %v3429_v56  ;;  %v3398_v22 = vadd.f32 %v3870_v4, %v3366_v15  ;;  %v3329_v8 = vadd.f32 %v3305_v47, %v3168_v39  ;;  %v6410_v56 = vrot.slane %v5790_v60, 6 }
 0x5ae   : > { %v3090_v27 = vpop.permute.xlu0 %3089 }
 0x5af   : > { %v3430_v62 = vmax.f32 %v3398_v22, 0.0  ;;  %v3367_v54 = vadd.f32 %v5874_v50, %v3329_v8  ;;  %v3169_v13 = vadd.f32 %v3090_v27, %v3049_v19  ;;  %v6411_v19 = vrot.slane %v5801_v53, 2  ;;  %v3877_v53 = vld [vmem:[%s4319_s28 + $0xa8] sm:$0xff] }
 0x5b1   : > { %3462 = vst.msk [vmem:[%s5915_s1 + $0x70] sm:$0xff] %vm458_vm0, %v3430_v62  ;;  %v3399_v23 = vadd.f32 %v3871_v44, %v3367_v54  ;;  %v3330_v34 = vadd.f32 %v5778_v51, %v3169_v13  ;;  %v3050_v51 = vsel %vm2960_vm4, 0.0, %v6408_v35  ;;  %v3308_v27 = vsel %vm3217_vm3, %v6411_v19, 0.0  ;;  %v3876_v62 = vld [vmem:[%s4319_s28 + $0xa0] sm:$0xff] }
 0x5b2   : > { %v3092_v12 = vpop.permute.xlu1 %3091  ;;  %v6412_v44 = vrot.slane %v5809_v48, 6 }
 0x5b3   : > { %v3431_v25 = vmax.f32 %v3399_v23, 0.0  ;;  %v3368_v42 = vadd.f32 %v5874_v50, %v3330_v34  ;;  %v3170_v18 = vadd.f32 %v3092_v12, %v5769_v14 }
 0x5b5   : > { %3463 = vst.msk [vmem:[%s5915_s1 + $0x78] sm:$0xff] %vm458_vm0, %v3431_v25  ;;  %v3400_v37 = vadd.f32 %v3872_v9, %v3368_v42  ;;  %v3331_v24 = vadd.f32 %v3306_v6, %v3170_v18  ;;  %v6413_v9 = vrot.slane %v5820_v20, 2  ;;  %v3879_v20 = vld [vmem:[%s4319_s28 + $0xb8] sm:$0xff] }
 0x5b6   : > { %v3094_v33 = vpop.permute.xlu0 %3093 }
 0x5b7   : > { %v3432_v58 = vmax.f32 %v3400_v37, 0.0  ;;  %v3369_v16 = vadd.f32 %v5874_v50, %v3331_v24  ;;  %v3171_v14 = vadd.f32 %v3094_v33, %v3050_v51  ;;  %v3309_v37 = vsel %vm3217_vm3, %v6413_v9, 0.0  ;;  %v3878_v24 = vld [vmem:[%s4319_s28 + $0xb0] sm:$0xff]  ;;  %v6414_v33 = vld [vmem:[#allocation21_spill] sm:$0xff] }
 0x5b9   : > { %3464 = vst.msk [vmem:[%s5915_s1 + $0x80] sm:$0xff] %vm458_vm0, %v3432_v58  ;;  %v3401_v61 = vadd.f32 %v3873_v32, %v3369_v16  ;;  %v3332_v30 = vadd.f32 %v5797_v43, %v3171_v14  ;;  %v3051_v43 = vsel %vm2960_vm4, 0.0, %v6410_v56  ;;  %v6415_v58 = vrot.slane %v6414_v33, 6  ;;  %v3880_v56 = vld [vmem:[%s4319_s28 + $0xc0] sm:$0xff] }
 0x5ba   : > { %v3096_v31 = vpop.permute.xlu1 %3095  ;;  %v6426_v33 = vrot.slane %v5892_v10, 2 }
 0x5bb   : > { %v3433_v36 = vmax.f32 %v3401_v61, 0.0  ;;  %v3370_v5 = vadd.f32 %v5874_v50, %v3332_v30  ;;  %v3172_v2 = vadd.f32 %v3096_v31, %v5788_v49  ;;  %v6416_v30 = vld [vmem:[#allocation19_spill] sm:$0xff] }
 0x5bd   : > { %3465 = vst.msk [vmem:[%s5915_s1 + $0x88] sm:$0xff] %vm458_vm0, %v3433_v36  ;;  %v3402_v57 = vadd.f32 %v3874_v11, %v3370_v5  ;;  %v3333_v26 = vadd.f32 %v3307_v28, %v3172_v2  ;;  %v6418_v11 = vld [vmem:[#allocation20_spill] sm:$0xff] }
 0x5be   : > { %v3098_v15 = vpop.permute.xlu0 %3097 }
 0x5bf   : > { %v3434_v39 = vmax.f32 %v3402_v57, 0.0  ;;  %v3371_v21 = vadd.f32 %v5874_v50, %v3333_v26  ;;  %v3173_v49 = vadd.f32 %v3098_v15, %v3051_v43  ;;  %v6419_v57 = vrot.slane %v6418_v11, 2 }
 0x5c1   : > { %3466 = vst.msk [vmem:[%s5915_s1 + $0x90] sm:$0xff] %vm458_vm0, %v3434_v39  ;;  %v3403_v47 = vadd.f32 %v3875_v1, %v3371_v21  ;;  %v3334_v4 = vadd.f32 %v5816_v46, %v3173_v49  ;;  %v3052_v46 = vsel %vm2960_vm4, 0.0, %v6412_v44  ;;  %v3310_v26 = vsel %vm3217_vm3, %v6419_v57, 0.0  ;;  %v6420_v21 = vld [vmem:[#allocation17_spill] sm:$0xff]  ;;  %v6423_v44 = vld [vmem:[#allocation24_spill] sm:$0xff]  ;;  %v3886_v57 = vld [vmem:[%s4319_s28 + $0xf0] sm:$0xff] }
 0x5c2   : > { %v3100_v22 = vpop.permute.xlu1 %3099  ;;  %v6421_v49 = vrot.slane %v6420_v21, 6 }
 0x5c3   : > { %v3435_v8 = vmax.f32 %v3403_v47, 0.0  ;;  %v3372_v60 = vadd.f32 %v5874_v50, %v3334_v4  ;;  %v3174_v52 = vadd.f32 %v3100_v22, %v5807_v63 }
 0x5c4   : > { %v3054_v1 = vsel %vm2960_vm4, 0.0, %v6421_v49 }
 0x5c5   : > { %3467 = vst.msk [vmem:[%s5915_s1 + $0x98] sm:$0xff] %vm458_vm0, %v3435_v8  ;;  %v3404_v54 = vadd.f32 %v3876_v62, %v3372_v60  ;;  %v3335_v13 = vadd.f32 %v3308_v27, %v3174_v52  ;;  %v3881_v8 = vld [vmem:[%s4319_s28 + $0xc8] sm:$0xff] }
 0x5c6   : > { %v3102_v23 = vpop.permute.xlu0 %3101 }
 0x5c7   : > { %v3436_v34 = vmax.f32 %v3404_v54, 0.0  ;;  %v3373_v12 = vadd.f32 %v5874_v50, %v3335_v13  ;;  %v3175_v63 = vadd.f32 %v3102_v23, %v3052_v46  ;;  %v6422_v54 = vld [vmem:[#allocation23_spill] sm:$0xff]  ;;  %v6424_v46 = vrot.slane %v6423_v44, 2 }
 0x5c9   : > { %3468 = vst.msk [vmem:[%s5915_s1 + $0xa0] sm:$0xff] %vm458_vm0, %v3436_v34  ;;  %v3405_v25 = vadd.f32 %v3877_v53, %v3373_v12  ;;  %v3336_v42 = vadd.f32 %v5835_v29, %v3175_v63  ;;  %v3053_v29 = vsel %vm2960_vm4, 0.0, %v6415_v58  ;;  %v3311_v23 = vsel %vm3217_vm3, %v6424_v46, 0.0  ;;  %v3882_v34 = vld [vmem:[%s4319_s28 + $0xd0] sm:$0xff] }
 0x5ca   : > { %v3104_v18 = vpop.permute.xlu1 %3103  ;;  %v3312_v58 = vsel %vm3217_vm3, %v6426_v33, 0.0 }
 0x5cb   : > { %v3437_v3 = vmax.f32 %v3405_v25, 0.0  ;;  %v3374_v48 = vadd.f32 %v5874_v50, %v3336_v42  ;;  %v3176_v6 = vadd.f32 %v3104_v18, %v5826_v17 }
 0x5cd   : > { %3469 = vst.msk [vmem:[%s5915_s1 + $0xa8] sm:$0xff] %vm458_vm0, %v3437_v3  ;;  %v3406_v35 = vadd.f32 %v3878_v24, %v3374_v48  ;;  %v3337_v51 = vadd.f32 %v3309_v37, %v3176_v6  ;;  %v2925_v48 = vpop.f32.mrf.mxu1  ;;  %v3883_v6 = vld [vmem:[%s4319_s28 + $0xd8] sm:$0xff] }
 0x5ce   : > { %v3106_v16 = vpop.permute.xlu0 %3105 }
 0x5cf   : > { %v3438_v14 = vmax.f32 %v3406_v35, 0.0  ;;  %v3375_v32 = vadd.f32 %v5874_v50, %v3337_v51  ;;  %v3177_v17 = vadd.f32 %v3106_v16, %v3053_v29  ;;  %v3264_v29 = vrot.slane %v2925_v48, 2  ;;  %v3884_v16 = vld [vmem:[%s4319_s28 + $0xe0] sm:$0xff] }
 0x5d1   : > { %3470 = vst.msk [vmem:[%s5915_s1 + $0xb0] sm:$0xff] %vm458_vm0, %v3438_v14  ;;  %v3407_v61 = vadd.f32 %v3879_v20, %v3375_v32  ;;  %v3338_v31 = vadd.f32 %v6416_v30, %v3177_v17  ;;  %v3313_v11 = vsel %vm3217_vm3, %v3264_v29, 0.0 }
 0x5d2   : > { %v3108_v36 = vpop.permute.xlu1 %3107 }
 0x5d3   : > { %v3439_v5 = vmax.f32 %v3407_v61, 0.0  ;;  %v3376_v2 = vadd.f32 %v5874_v50, %v3338_v31  ;;  %v3178_v28 = vadd.f32 %v3108_v36, %v6417_v45  ;;  %v3056_v61 = vsel %vm2960_vm4, 0.0, %v3006_v40  ;;  %v3885_v36 = vld [vmem:[%s4319_s28 + $0xe8] sm:$0xff] }
 0x5d5   : > { %3471 = vst.msk [vmem:[%s5915_s1 + $0xb8] sm:$0xff] %vm458_vm0, %v3439_v5  ;;  %v3408_v43 = vadd.f32 %v3880_v56, %v3376_v2  ;;  %v3339_v15 = vadd.f32 %v3310_v26, %v3178_v28 }
 0x5d6   : > { %v3110_v39 = vpop.permute.xlu0 %3109 }
 0x5d7   : > { %v3440_v47 = vmax.f32 %v3408_v43, 0.0  ;;  %v3377_v4 = vadd.f32 %v5874_v50, %v3339_v15  ;;  %v3179_v22 = vadd.f32 %v3110_v39, %v3054_v1  ;;  %v3887_v39 = vld [vmem:[%s4319_s28 + $0xf8] sm:$0xff]  ;;  %s4105_s28 = smov [#allocation11]  }
 0x5d8   : > { %s4024_s14 = sshll.u32 %s4105_s28, 4  ;;  %s4025_s14 = int_to_ptr.vmem [resolvable:$false] %s4024_s14 }
 0x5d9   : > { %3472 = vst.msk [vmem:[%s5915_s1 + $0xc0] sm:$0xff] %vm458_vm0, %v3440_v47  ;;  %v3409_v60 = vadd.f32 %v3881_v8, %v3377_v4  ;;  %v3340_v52 = vadd.f32 %v5881_v38, %v3179_v22  ;;  %v6425_v38 = vrot.slane %v5869_v7, 6  ;;  %s4026_s21 = scalar_lea.vmem %s4025_s14, 8192  ;;  %p4027_p13 = scmp.lt.s32.totalorder %s6172_s5, %s4025_s14 }
 0x5da   : > { %v3112_v19 = vpop.permute.xlu1 %3111  ;;  %p4028_p0 = scmp.lt.s32.totalorder %s4026_s21, %s4020_s13 }
 0x5db   : > { %v3441_v27 = vmax.f32 %v3409_v60, 0.0  ;;  %v3378_v62 = vadd.f32 %v5874_v50, %v3340_v52  ;;  %v3180_v13 = vadd.f32 %v3112_v19, %v6422_v54  ;;  %v3055_v25 = vsel %vm2960_vm4, 0.0, %v6425_v38 }
 0x5dc   : > { %p4029_p11 = por %p4028_p0, %p4027_p13 }
 0x5dd   : > { %3473 = vst.msk [vmem:[%s5915_s1 + $0xc8] sm:$0xff] %vm458_vm0, %v3441_v27  ;;  %v3410_v12 = vadd.f32 %v3882_v34, %v3378_v62  ;;  %v3341_v63 = vadd.f32 %v3311_v23, %v3180_v13 }
 0x5de   : > { %v3114_v53 = vpop.permute.xlu0 %3113  ;;  %p4030_p5 = pnand %p4029_p11, %p4023_p1 }
 0x5df   : > { %v3442_v42 = vmax.f32 %v3410_v12, 0.0  ;;  %v3379_v18 = vadd.f32 %v5874_v50, %v3341_v63  ;;  %v3181_v3 = vadd.f32 %v3114_v53, %v3055_v25 }
 0x5e1   : > { %3474 = vst.msk [vmem:[%s5915_s1 + $0xd0] sm:$0xff] %vm458_vm0, %v3442_v42  ;;  %v3411_v9 = vadd.f32 %v3883_v6, %v3379_v18  ;;  %v3342_v37 = vadd.f32 %v5911_v41, %v3181_v3  ;;  %v3263_v41 = vrot.slane %v5920_v59, 2 }
 0x5e2   : > { %v3116_v24 = vpop.permute.xlu1 %3115 }
 0x5e3   : > { %v3443_v35 = vmax.f32 %v3411_v9, 0.0  ;;  %v3380_v7 = vadd.f32 %v5874_v50, %v3342_v37  ;;  %v3182_v51 = vadd.f32 %v3116_v24, %v5898_v0  ;;  %v3265_v31 = vsel %vm3217_vm3, %v3263_v41, %v3264_v29 }
 0x5e5   : > { %3475 = vst.msk [vmem:[%s5915_s1 + $0xd8] sm:$0xff] %vm458_vm0, %v3443_v35  ;;  %v3412_v14 = vadd.f32 %v3884_v16, %v3380_v7  ;;  %v3343_v32 = vadd.f32 %v3312_v58, %v3182_v51 }
 0x5e6   : > { %v3118_v17 = vpop.permute.xlu0 %3117 }
 0x5e7   : > { %v3444_v0 = vmax.f32 %v3412_v14, 0.0  ;;  %v3381_v10 = vadd.f32 %v5874_v50, %v3343_v32  ;;  %v3183_v30 = vadd.f32 %v3118_v17, %v3056_v61 }
 0x5e9   : > { %3476 = vst.msk [vmem:[%s5915_s1 + $0xe0] sm:$0xff] %vm458_vm0, %v3444_v0  ;;  %v3413_v59 = vadd.f32 %v3885_v36, %v3381_v10  ;;  %v3344_v5 = vadd.f32 %v3265_v31, %v3183_v30 }
 0x5ea   : > { %v3120_v2 = vpop.permute.xlu1 %3119 }
 0x5eb   : > { %v3445_v45 = vmax.f32 %v3413_v59, 0.0  ;;  %v3382_v28 = vadd.f32 %v5874_v50, %v3344_v5  ;;  %v3184_v40 = vadd.f32 %v3120_v2, %v5935_v55 }
 0x5ed   : > { %3477 = vst.msk [vmem:[%s5915_s1 + $0xe8] sm:$0xff] %vm458_vm0, %v3445_v45  ;;  %v3414_v26 = vadd.f32 %v3886_v57, %v3382_v28  ;;  %v3345_v56 = vadd.f32 %v3313_v11, %v3184_v40 }
 0x5ef   : > { %v3446_v43 = vmax.f32 %v3414_v26, 0.0  ;;  %v3383_v15 = vadd.f32 %v5874_v50, %v3345_v56 }
 0x5f1   : > { %3478 = vst.msk [vmem:[%s5915_s1 + $0xf0] sm:$0xff] %vm458_vm0, %v3446_v43  ;;  %v3415_v21 = vadd.f32 %v3887_v39, %v3383_v15 }
 0x5f3   : > { %v3447_v55 = vmax.f32 %v3415_v21, 0.0 }
 0x5f5   : > { %3479 = vst.msk [vmem:[%s5915_s1 + $0xf8] sm:$0xff] %vm458_vm0, %v3447_v55 }
 0x5f6   : > { %4033 = shalt.err (!%p4030_p5)
}
 0x5f7   : > { %s4034_s20 = scalar_lea.hbm %s6170_s17, 4096  ;;  %s4038_s26 = scalar_lea.hbm %s6226_s9, 8192 }
 0x5f8   : > { %p4035_p3 = scmp.ne.s32.totalorder %s6170_s17, %s4034_s20  ;;  %p4039_p8 = scmp.lt.s32.totalorder %s6170_s17, %s6226_s9 }
 0x5f9   : > { %p4040_p9 = scmp.lt.s32.totalorder %s4038_s26, %s4034_s20 }
 0x5fa   : > { %p4036_p4 = pnand %p4035_p3, %p6428_p12 }
 0x5fb   : > { %p4041_p2 = por %p4040_p9, %p4039_p8 }
 0x5fc   : > { %p4037_p6 = pneg %p4036_p4 }
 0x5fe   : > { %p4042_p10 = pnand %p4041_p2, %p4037_p6 }
 0x600   : > { %4045 = shalt.err (!%p4042_p10)
}
 0x601   : > { %s4106_s22 = smov 128   ;;  %s4107_s15 = smov 8  }
 0x602   : > { %3779 = dma.vmem_to_hbm [thread:$0]  (%p6428_p12), %s6172_s5, 4096, %s6170_s17, %s3481_s29, %s4106_s22, %s4106_s22, %s4107_s15  }
 0x603 PF: > { %s3509_s13 = sand.u32 1, %s4080_s30   ;;  %p6429_p7 = scmp.ne.s32.totalorder %s6309_s16, 0 }
 0x604   : > { %p6430_p1 = scmp.ge.s32.totalorder %s4092_s12, 2  ;;  %s3510_s28 = scalar_lea.sflag [#allocation4], %s3509_s13 }
 0x606   : > { %p3799_p13 = pnand %p6430_p1, %p6429_p7 }
 0x608   : > { %p3800_p0 = pneg %p3799_p13 }
 0x60a   : > { %4075 = dma.done.wait (%p3800_p0), %s3510_s28, 4096  }
 0x60b   : > { %4077 = vsyncadd (%p3800_p0), %s3510_s28, 4294963200  ;;  %p24_p11 = scmp.ge.s32.totalorder %s4258_s18, 4   ;;  %s6431_s30 = smov %s4084_s10 }
 0x60c   : > { %s6432_s10 = smov %s4088_s11  ;;  %s6433_s11 = smov %s4274_s23 }
 0x60d   : > { %s6434_s12 = smov %s4258_s18  ;;  %26 = sbr.rel (!%p24_p11) target bundleno = 11 (0xb), region = 117 }
 0x612   :  { %3515 = vsyncpa [#allocation3], 1 }
 0x613   :  { %3517 = vsyncpa [#allocation3 + $0x1], 1 }
 0x614   :  { %3518 = vsyncpa [#allocation6], 1 }
 0x615   :  { %3519 = vsyncpa [#allocation9], 1 }
 0x616   :  { %3520 = vsyncpa [#allocation4], 1 }
 0x617   :  { %3522 = vsyncpa [#allocation4 + $0x1], 1 }

</bundles_post_ra>
